<compile_context>
chip_gen: v6e
topology: v6e:2x2x1
jax: 0.10.0
libtpu: 0.0.40
codegen_flags: <defaults>
</compile_context>

<pallas_src>
import functools

import jax
import jax.numpy as jnp
import numpy as np
from jax.experimental import pallas as pl
from jax.experimental.pallas import tpu as pltpu


def _convgru_fused_kernel(
    # inputs (blocked per (batch, layer) grid point)
    x_ref,       # (1, H, W, C)     layer-0 input for this batch element
    h0_ref,      # (1, 1, H, W, C)  initial hidden state for (layer, batch)
    wg_ref,      # (1, k*k*2C, 2C)  fused [reset | update] gate weight (im2col)
    bg_ref,      # (1, 1, 2C)       fused gate bias
    wo_ref,      # (1, k*k*C, C)    out-conv weight (im2col)
    # outputs
    out_ref,     # (1, 1, H, W, C)  new hidden state for (layer, batch)
    # scratch (persists across the sequential layer axis)
    catpad_ref,  # VMEM (H+2p, W+2p, 2C) f32  padded cat([layer input, h])
    pg_ref,      # VMEM (H*W, k*k*2C)         gate im2col patch matrix
    po_ref,      # VMEM (H*W, k*k*C)          out-conv im2col patch matrix
    *, H, W, C, k, min_reset, min_update, zero_state, compute_dtype):
  layer = pl.program_id(1)
  p = k // 2
  N = H * W
  C2 = 2 * C

  @pl.when(layer == 0)
  def _init():
    # Zero the padded buffer once per batch element.  Only the interior is
    # rewritten below, so the halo ring stays zero for all subsequent layers.
    catpad_ref[...] = jnp.zeros(catpad_ref.shape, catpad_ref.dtype)
    catpad_ref[p:p + H, p:p + W, :C] = (
        x_ref[...].reshape(H, W, C).astype(jnp.float32))

  if not zero_state:
    # Channel layout matches torch.cat([input_, prev_state], dim=1).
    catpad_ref[p:p + H, p:p + W, C:] = (
        h0_ref[...].reshape(H, W, C).astype(jnp.float32))

  # ---- reset & update gates: ONE im2col matmul over cat([x, h]) -------------
  for tap in range(k * k):
    dy, dx = tap // k, tap % k
    slab = catpad_ref[dy:dy + H, dx:dx + W, :].reshape(N, C2)
    pg_ref[:, tap * C2:(tap + 1) * C2] = slab.astype(compute_dtype)

  gate_pre = jnp.dot(pg_ref[...], wg_ref[...].reshape(k * k * C2, C2),
                     preferred_element_type=jnp.float32)
  gate_pre = gate_pre + bg_ref[...].reshape(1, C2)
  gates = jax.nn.sigmoid(gate_pre)
  reset, update = gates[:, :C], gates[:, C:]
  if min_reset:      # static Python float; 0.0 in the module as constructed
    reset = min_reset + (1.0 - min_reset) * reset
  if min_update:
    update = min_update + (1.0 - min_update) * update

  x_c = catpad_ref[p:p + H, p:p + W, :C].reshape(N, C)
  if zero_state:
    t = x_c                                    # h == 0 -> h*reset + x == x
  else:
    h_c = catpad_ref[p:p + H, p:p + W, C:].reshape(N, C)
    t = h_c * reset + x_c

  # Reuse the x-half of the padded buffer to hold t (x is no longer needed);
  # the halo is still zero, so no re-zeroing is required.
  catpad_ref[p:p + H, p:p + W, :C] = t.reshape(H, W, C)

  # ---- out conv: ONE im2col matmul (no bias, out_act=None) ------------------
  for tap in range(k * k):
    dy, dx = tap // k, tap % k
    slab = catpad_ref[dy:dy + H, dx:dx + W, :C].reshape(N, C)
    po_ref[:, tap * C:(tap + 1) * C] = slab.astype(compute_dtype)

  out_in = jnp.dot(po_ref[...], wo_ref[...].reshape(k * k * C, C),
                   preferred_element_type=jnp.float32)

  if zero_state:
    new_h = out_in * update                    # h*(1-update) == 0
  else:
    new_h = h_c * (1.0 - update) + out_in * update

  out_ref[...] = new_h.reshape(1, 1, H, W, C).astype(out_ref.dtype)

  # Chain: this layer's output is the next layer's input (stays in VMEM).
  @pl.when(layer + 1 < pl.num_programs(1))
  def _chain():
    catpad_ref[p:p + H, p:p + W, :C] = new_h.reshape(H, W, C)


def convgru_forward(x_nchw, packed_params, kernel_size, hidden=None, *,
                    compute_dtype=jnp.float32, min_reset=0.0, min_update=0.0,
                    vmem_limit_bytes=32 * 1024 * 1024):
  """Multi-layer ConvGRU forward; all layers fused in one pallas_call.

  x_nchw: (B, C, H, W).  hidden: optional list of (B, C, H, W) per layer.
  Returns (n_layers, B, C, H, W) — the stacked updated hidden states.
  """
  wg, bg, wo = packed_params
  L = wg.shape[0]
  B, C, H, W = x_nchw.shape
  k = kernel_size
  p = k // 2
  assert wg.shape == (L, k * k * 2 * C, 2 * C) and wo.shape == (L, k * k * C, C), (
      "ConvGRU's `prev_state*reset + input_` requires hidden_size == input "
      "channels at every layer")

  x = jnp.transpose(x_nchw, (0, 2, 3, 1))            # NHWC: channels on lanes
  zero_state = hidden is None
  if zero_state:
    h0 = jnp.zeros((L, B, H, W, C), x.dtype)         # prev_state=None -> zeros
  else:
    h0 = jnp.transpose(jnp.stack(hidden, axis=0), (0, 1, 3, 4, 2))

  kernel = functools.partial(
      _convgru_fused_kernel, H=H, W=W, C=C, k=k,
      min_reset=min_reset, min_update=min_update,
      zero_state=zero_state, compute_dtype=compute_dtype)

  out = pl.pallas_call(
      kernel,
      out_shape=jax.ShapeDtypeStruct((L, B, H, W, C), x.dtype),
      grid=(B, L),
      in_specs=[
          pl.BlockSpec((1, H, W, C), lambda b, l: (b, 0, 0, 0)),
          pl.BlockSpec((1, 1, H, W, C), lambda b, l: (l, b, 0, 0, 0)),
          pl.BlockSpec((1, k * k * 2 * C, 2 * C), lambda b, l: (l, 0, 0)),
          pl.BlockSpec((1, 1, 2 * C), lambda b, l: (l, 0, 0)),
          pl.BlockSpec((1, k * k * C, C), lambda b, l: (l, 0, 0)),
      ],
      out_specs=pl.BlockSpec((1, 1, H, W, C), lambda b, l: (l, b, 0, 0, 0)),
      scratch_shapes=[
          pltpu.VMEM((H + 2 * p, W + 2 * p, 2 * C), jnp.float32),
          pltpu.VMEM((H * W, k * k * 2 * C), compute_dtype),
          pltpu.VMEM((H * W, k * k * C), compute_dtype),
      ],
      compiler_params=pltpu.CompilerParams(
          dimension_semantics=("parallel", "arbitrary"),
          vmem_limit_bytes=vmem_limit_bytes),
  )(x, h0, wg.astype(compute_dtype), bg, wo.astype(compute_dtype))

  return jnp.transpose(out, (0, 1, 4, 2, 3))         # -> (L, B, C, H, W)


def init_convgru_params(key, C, k, n_layers):
  """Deterministic synthetic parameters matching the PyTorch module's shapes.

  Per layer: gate convs Conv2d(2C -> C, k) with zero bias (orthogonal_ init
  replaced by a deterministic normal draw); out_weights = 0.75*ones/C/k**2,
  no bias.  Returns (packed-for-kernel, per-layer OIHW params for reference).
  """
  def to_im2col(w_oihw):    # (O, I, kh, kw) -> (kh*kw*I, O); row = (tap, cin)
    o, i, kh, kw = w_oihw.shape
    return jnp.transpose(w_oihw, (2, 3, 1, 0)).reshape(kh * kw * i, o)

  wg_l, bg_l, wo_l, torch_layers = [], [], [], []
  for _ in range(n_layers):
    key, kr, ku = jax.random.split(key, 3)
    wr = jax.random.normal(kr, (C, 2 * C, k, k), jnp.float32) * 0.1
    wu = jax.random.normal(ku, (C, 2 * C, k, k), jnp.float32) * 0.1
    br = jnp.zeros((C,), jnp.float32)
    bu = jnp.zeros((C,), jnp.float32)
    wo = 0.75 * jnp.ones((C, C, k, k), jnp.float32) / C / (k ** 2)
    torch_layers.append((wr, br, wu, bu, wo))
    wg_l.append(to_im2col(jnp.concatenate([wr, wu], axis=0)))   # reset | update
    bg_l.append(jnp.concatenate([br, bu]).reshape(1, 2 * C))
    wo_l.append(to_im2col(wo))

  packed = (jnp.stack(wg_l), jnp.stack(bg_l), jnp.stack(wo_l))
  return packed, torch_layers


# ------------------------- pure-JAX reference (NCHW) -------------------------

def _ref_cell(x, h, layer, k):
  wr, br, wu, bu, wo = layer
  pad = k // 2

  def conv(inp, w, b=None):
    out = jax.lax.conv_general_dilated(
        inp, w, (1, 1), [(pad, pad), (pad, pad)],
        dimension_numbers=('NCHW', 'OIHW', 'NCHW'))
    return out if b is None else out + b.reshape(1, -1, 1, 1)

  stacked = jnp.concatenate([x, h], axis=1)
  reset = jax.nn.sigmoid(conv(stacked, wr, br))
  out_in = conv(h * reset + x, wo)
  update = jax.nn.sigmoid(conv(stacked, wu, bu))
  return h * (1.0 - update) + out_in * update


def _ref_forward(x, torch_layers, k, hidden=None):
  inp, outs = x, []
  for i, layer in enumerate(torch_layers):
    C = layer[0].shape[0]
    B, _, H, W = inp.shape
    h0 = jnp.zeros((B, C, H, W), inp.dtype) if hidden is None else hidden[i]
    nh = _ref_cell(inp, h0, layer, k)
    outs.append(nh)
    inp = nh
  return jnp.stack(outs, axis=0)


if __name__ == "__main__":
  key = jax.random.PRNGKey(0)
  B, C, H, W = 2, 8, 16, 16
  n_layers, k = 2, 3
  # hidden_size == input channels is forced by the module's forward math.

  key, kx, kp, kh = jax.random.split(key, 4)
  x = jax.random.normal(kx, (B, C, H, W), jnp.float32)
  packed, torch_layers = init_convgru_params(kp, C, k, n_layers)

  # prev_state = None (the module's default call pattern).
  out = jax.block_until_ready(convgru_forward(x, packed, k))
  assert out.shape == (n_layers, B, C, H, W)
  ref = _ref_forward(x, torch_layers, k)
  np.testing.assert_allclose(np.asarray(out), np.asarray(ref),
                             rtol=1e-4, atol=1e-4)

  # Explicit per-layer hidden states (exercises the general prev_state path).
  hidden = [0.5 * jax.random.normal(jax.random.fold_in(kh, i),
                                    (B, C, H, W), jnp.float32)
            for i in range(n_layers)]
  out_h = jax.block_until_ready(convgru_forward(x, packed, k, hidden=hidden))
  ref_h = _ref_forward(x, torch_layers, k, hidden=hidden)
  np.testing.assert_allclose(np.asarray(out_h), np.asarray(ref_h),
                             rtol=1e-4, atol=1e-4)

  print("KERNEL_OK")
</pallas_src>

<mosaic_0001>
module attributes {stable_mosaic.version = 11 : i64} {
  func.func @_convgru_fused_kernel(%arg0: i32, %arg1: i32, %arg2: memref<1x16x16x8xf32, #tpu.memory_space<vmem>>, %arg3: memref<1x1x16x16x8xf32, #tpu.memory_space<vmem>>, %arg4: memref<1x144x16xf32, #tpu.memory_space<vmem>>, %arg5: memref<1x1x16xf32, #tpu.memory_space<vmem>>, %arg6: memref<1x72x8xf32, #tpu.memory_space<vmem>>, %arg7: memref<1x1x16x16x8xf32, #tpu.memory_space<vmem>>, %arg8: memref<18x18x16xf32, #tpu.memory_space<vmem>>, %arg9: memref<256x144xf32, #tpu.memory_space<vmem>>, %arg10: memref<256x72xf32, #tpu.memory_space<vmem>>) attributes {dimension_semantics = [#tpu.dimension_semantics<parallel>, #tpu.dimension_semantics<arbitrary>], iteration_bounds = array<i64: 2, 2>, scalar_prefetch = 0 : i64, scratch_operands = 3 : i64, tpu.core_type = #tpu.core_type<tc>, window_params = [{transform_indices = @transform_0, window_bounds = array<i64: 1, 16, 16, 8>}, {transform_indices = @transform_1, window_bounds = array<i64: 1, 1, 16, 16, 8>}, {transform_indices = @transform_2, window_bounds = array<i64: 1, 144, 16>}, {transform_indices = @transform_3, window_bounds = array<i64: 1, 1, 16>}, {transform_indices = @transform_4, window_bounds = array<i64: 1, 72, 8>}, {transform_indices = @transform_5, window_bounds = array<i64: 1, 1, 16, 16, 8>}]} {
    %c0_i32 = arith.constant 0 : i32
    %0 = arith.cmpi eq, %arg1, %c0_i32 : i32
    %1 = arith.extui %0 : i1 to i32
    %c0_i32_0 = arith.constant 0 : i32
    %2 = arith.cmpi ne, %1, %c0_i32_0 : i32
    scf.if %2 {
      %cst_103 = arith.constant 0.000000e+00 : f32
      %86 = vector.broadcast %cst_103 : f32 to vector<18x18x16xf32>
      %c0_104 = arith.constant 0 : index
      %c0_105 = arith.constant 0 : index
      %c0_106 = arith.constant 0 : index
      %87 = vector.load %arg8[%c0_104, %c0_105, %c0_106] : memref<18x18x16xf32, #tpu.memory_space<vmem>>, vector<18x18x16xf32>
      tpu.vector_store %arg8[%c0_104, %c0_105, %c0_106], %86 {strides = array<i32>} : memref<18x18x16xf32, #tpu.memory_space<vmem>>, vector<18x18x16xf32>,
      %c0_107 = arith.constant 0 : index
      %c0_108 = arith.constant 0 : index
      %c0_109 = arith.constant 0 : index
      %c0_110 = arith.constant 0 : index
      %88 = vector.load %arg2[%c0_107, %c0_108, %c0_109, %c0_110] : memref<1x16x16x8xf32, #tpu.memory_space<vmem>>, vector<1x16x16x8xf32>
      %89 = vector.shape_cast %88 : vector<1x16x16x8xf32> to vector<16x16x8xf32>
      %c1_111 = arith.constant 1 : index
      %c1_112 = arith.constant 1 : index
      %c0_113 = arith.constant 0 : index
      %90 = vector.load %arg8[%c1_111, %c1_112, %c0_113] : memref<18x18x16xf32, #tpu.memory_space<vmem>>, vector<16x16x8xf32>
      tpu.vector_store %arg8[%c1_111, %c1_112, %c0_113], %89 {strides = array<i32>} : memref<18x18x16xf32, #tpu.memory_space<vmem>>, vector<16x16x8xf32>,
    } else {
    }
    %c0 = arith.constant 0 : index
    %c0_1 = arith.constant 0 : index
    %c0_2 = arith.constant 0 : index
    %3 = vector.load %arg8[%c0, %c0_1, %c0_2] : memref<18x18x16xf32, #tpu.memory_space<vmem>>, vector<16x16x16xf32>
    %4 = vector.shape_cast %3 : vector<16x16x16xf32> to vector<256x16xf32>
    %c0_3 = arith.constant 0 : index
    %c0_4 = arith.constant 0 : index
    %5 = vector.load %arg9[%c0_3, %c0_4] : memref<256x144xf32, #tpu.memory_space<vmem>>, vector<256x16xf32>
    tpu.vector_store %arg9[%c0_3, %c0_4], %4 {strides = array<i32>} : memref<256x144xf32, #tpu.memory_space<vmem>>, vector<256x16xf32>,
    %c0_5 = arith.constant 0 : index
    %c1 = arith.constant 1 : index
    %c0_6 = arith.constant 0 : index
    %6 = vector.load %arg8[%c0_5, %c1, %c0_6] : memref<18x18x16xf32, #tpu.memory_space<vmem>>, vector<16x16x16xf32>
    %7 = vector.shape_cast %6 : vector<16x16x16xf32> to vector<256x16xf32>
    %c0_7 = arith.constant 0 : index
    %c16 = arith.constant 16 : index
    %8 = vector.load %arg9[%c0_7, %c16] : memref<256x144xf32, #tpu.memory_space<vmem>>, vector<256x16xf32>
    tpu.vector_store %arg9[%c0_7, %c16], %7 {strides = array<i32>} : memref<256x144xf32, #tpu.memory_space<vmem>>, vector<256x16xf32>,
    %c0_8 = arith.constant 0 : index
    %c2 = arith.constant 2 : index
    %c0_9 = arith.constant 0 : index
    %9 = vector.load %arg8[%c0_8, %c2, %c0_9] : memref<18x18x16xf32, #tpu.memory_space<vmem>>, vector<16x16x16xf32>
    %10 = vector.shape_cast %9 : vector<16x16x16xf32> to vector<256x16xf32>
    %c0_10 = arith.constant 0 : index
    %c32 = arith.constant 32 : index
    %11 = vector.load %arg9[%c0_10, %c32] : memref<256x144xf32, #tpu.memory_space<vmem>>, vector<256x16xf32>
    tpu.vector_store %arg9[%c0_10, %c32], %10 {strides = array<i32>} : memref<256x144xf32, #tpu.memory_space<vmem>>, vector<256x16xf32>,
    %c1_11 = arith.constant 1 : index
    %c0_12 = arith.constant 0 : index
    %c0_13 = arith.constant 0 : index
    %12 = vector.load %arg8[%c1_11, %c0_12, %c0_13] : memref<18x18x16xf32, #tpu.memory_space<vmem>>, vector<16x16x16xf32>
    %13 = vector.shape_cast %12 : vector<16x16x16xf32> to vector<256x16xf32>
    %c0_14 = arith.constant 0 : index
    %c48 = arith.constant 48 : index
    %14 = vector.load %arg9[%c0_14, %c48] : memref<256x144xf32, #tpu.memory_space<vmem>>, vector<256x16xf32>
    tpu.vector_store %arg9[%c0_14, %c48], %13 {strides = array<i32>} : memref<256x144xf32, #tpu.memory_space<vmem>>, vector<256x16xf32>,
    %c1_15 = arith.constant 1 : index
    %c1_16 = arith.constant 1 : index
    %c0_17 = arith.constant 0 : index
    %15 = vector.load %arg8[%c1_15, %c1_16, %c0_17] : memref<18x18x16xf32, #tpu.memory_space<vmem>>, vector<16x16x16xf32>
    %16 = vector.shape_cast %15 : vector<16x16x16xf32> to vector<256x16xf32>
    %c0_18 = arith.constant 0 : index
    %c64 = arith.constant 64 : index
    %17 = vector.load %arg9[%c0_18, %c64] : memref<256x144xf32, #tpu.memory_space<vmem>>, vector<256x16xf32>
    tpu.vector_store %arg9[%c0_18, %c64], %16 {strides = array<i32>} : memref<256x144xf32, #tpu.memory_space<vmem>>, vector<256x16xf32>,
    %c1_19 = arith.constant 1 : index
    %c2_20 = arith.constant 2 : index
    %c0_21 = arith.constant 0 : index
    %18 = vector.load %arg8[%c1_19, %c2_20, %c0_21] : memref<18x18x16xf32, #tpu.memory_space<vmem>>, vector<16x16x16xf32>
    %19 = vector.shape_cast %18 : vector<16x16x16xf32> to vector<256x16xf32>
    %c0_22 = arith.constant 0 : index
    %c80 = arith.constant 80 : index
    %20 = vector.load %arg9[%c0_22, %c80] : memref<256x144xf32, #tpu.memory_space<vmem>>, vector<256x16xf32>
    tpu.vector_store %arg9[%c0_22, %c80], %19 {strides = array<i32>} : memref<256x144xf32, #tpu.memory_space<vmem>>, vector<256x16xf32>,
    %c2_23 = arith.constant 2 : index
    %c0_24 = arith.constant 0 : index
    %c0_25 = arith.constant 0 : index
    %21 = vector.load %arg8[%c2_23, %c0_24, %c0_25] : memref<18x18x16xf32, #tpu.memory_space<vmem>>, vector<16x16x16xf32>
    %22 = vector.shape_cast %21 : vector<16x16x16xf32> to vector<256x16xf32>
    %c0_26 = arith.constant 0 : index
    %c96 = arith.constant 96 : index
    %23 = vector.load %arg9[%c0_26, %c96] : memref<256x144xf32, #tpu.memory_space<vmem>>, vector<256x16xf32>
    tpu.vector_store %arg9[%c0_26, %c96], %22 {strides = array<i32>} : memref<256x144xf32, #tpu.memory_space<vmem>>, vector<256x16xf32>,
    %c2_27 = arith.constant 2 : index
    %c1_28 = arith.constant 1 : index
    %c0_29 = arith.constant 0 : index
    %24 = vector.load %arg8[%c2_27, %c1_28, %c0_29] : memref<18x18x16xf32, #tpu.memory_space<vmem>>, vector<16x16x16xf32>
    %25 = vector.shape_cast %24 : vector<16x16x16xf32> to vector<256x16xf32>
    %c0_30 = arith.constant 0 : index
    %c112 = arith.constant 112 : index
    %26 = vector.load %arg9[%c0_30, %c112] : memref<256x144xf32, #tpu.memory_space<vmem>>, vector<256x16xf32>
    tpu.vector_store %arg9[%c0_30, %c112], %25 {strides = array<i32>} : memref<256x144xf32, #tpu.memory_space<vmem>>, vector<256x16xf32>,
    %c2_31 = arith.constant 2 : index
    %c2_32 = arith.constant 2 : index
    %c0_33 = arith.constant 0 : index
    %27 = vector.load %arg8[%c2_31, %c2_32, %c0_33] : memref<18x18x16xf32, #tpu.memory_space<vmem>>, vector<16x16x16xf32>
    %28 = vector.shape_cast %27 : vector<16x16x16xf32> to vector<256x16xf32>
    %c0_34 = arith.constant 0 : index
    %c128 = arith.constant 128 : index
    %29 = vector.load %arg9[%c0_34, %c128] : memref<256x144xf32, #tpu.memory_space<vmem>>, vector<256x16xf32>
    tpu.vector_store %arg9[%c0_34, %c128], %28 {strides = array<i32>} : memref<256x144xf32, #tpu.memory_space<vmem>>, vector<256x16xf32>,
    %c0_35 = arith.constant 0 : index
    %c0_36 = arith.constant 0 : index
    %30 = vector.load %arg9[%c0_35, %c0_36] : memref<256x144xf32, #tpu.memory_space<vmem>>, vector<256x144xf32>
    %c0_37 = arith.constant 0 : index
    %c0_38 = arith.constant 0 : index
    %c0_39 = arith.constant 0 : index
    %31 = vector.load %arg4[%c0_37, %c0_38, %c0_39] : memref<1x144x16xf32, #tpu.memory_space<vmem>>, vector<1x144x16xf32>
    %32 = vector.shape_cast %31 : vector<1x144x16xf32> to vector<144x16xf32>
    %cst = arith.constant dense<0.000000e+00> : vector<256x16xf32>
    %33 = tpu.matmul %30, %32, %cst {dimension_numbers = #tpu.dot_dimension_numbers<[1], [0], [0], [1], [0, 0, 1, 1], [], []>} : vector<256x144xf32>, vector<144x16xf32>, vector<256x16xf32> -> vector<256x16xf32>
    %c0_40 = arith.constant 0 : index
    %c0_41 = arith.constant 0 : index
    %c0_42 = arith.constant 0 : index
    %34 = vector.load %arg5[%c0_40, %c0_41, %c0_42] : memref<1x1x16xf32, #tpu.memory_space<vmem>>, vector<1x1x16xf32>
    %35 = vector.shape_cast %34 : vector<1x1x16xf32> to vector<1x16xf32>
    %36 = vector.broadcast %35 : vector<1x16xf32> to vector<256x16xf32>
    %37 = arith.addf %33, %36 : vector<256x16xf32>
    %38 = arith.negf %37 : vector<256x16xf32>
    %39 = math.exp %38 : vector<256x16xf32>
    %cst_43 = arith.constant 1.000000e+00 : f32
    %40 = vector.broadcast %cst_43 : f32 to vector<256x16xf32>
    %41 = arith.addf %40, %39 : vector<256x16xf32>
    %42 = arith.divf %40, %41 : vector<256x16xf32>
    %43 = vector.extract_strided_slice %42 {offsets = [0, 8], sizes = [256, 8], strides = [1, 1]} : vector<256x16xf32> to vector<256x8xf32>
    %c1_44 = arith.constant 1 : index
    %c1_45 = arith.constant 1 : index
    %c0_46 = arith.constant 0 : index
    %44 = vector.load %arg8[%c1_44, %c1_45, %c0_46] : memref<18x18x16xf32, #tpu.memory_space<vmem>>, vector<16x16x8xf32>
    %45 = vector.shape_cast %44 : vector<16x16x8xf32> to vector<256x8xf32>
    %46 = vector.shape_cast %45 : vector<256x8xf32> to vector<16x16x8xf32>
    %c1_47 = arith.constant 1 : index
    %c1_48 = arith.constant 1 : index
    %c0_49 = arith.constant 0 : index
    %47 = vector.load %arg8[%c1_47, %c1_48, %c0_49] : memref<18x18x16xf32, #tpu.memory_space<vmem>>, vector<16x16x8xf32>
    tpu.vector_store %arg8[%c1_47, %c1_48, %c0_49], %46 {strides = array<i32>} : memref<18x18x16xf32, #tpu.memory_space<vmem>>, vector<16x16x8xf32>,
    %c0_50 = arith.constant 0 : index
    %c0_51 = arith.constant 0 : index
    %c0_52 = arith.constant 0 : index
    %48 = vector.load %arg8[%c0_50, %c0_51, %c0_52] : memref<18x18x16xf32, #tpu.memory_space<vmem>>, vector<16x16x8xf32>
    %49 = vector.shape_cast %48 : vector<16x16x8xf32> to vector<256x8xf32>
    %c0_53 = arith.constant 0 : index
    %c0_54 = arith.constant 0 : index
    %50 = vector.load %arg10[%c0_53, %c0_54] : memref<256x72xf32, #tpu.memory_space<vmem>>, vector<256x8xf32>
    tpu.vector_store %arg10[%c0_53, %c0_54], %49 {strides = array<i32>} : memref<256x72xf32, #tpu.memory_space<vmem>>, vector<256x8xf32>,
    %c0_55 = arith.constant 0 : index
    %c1_56 = arith.constant 1 : index
    %c0_57 = arith.constant 0 : index
    %51 = vector.load %arg8[%c0_55, %c1_56, %c0_57] : memref<18x18x16xf32, #tpu.memory_space<vmem>>, vector<16x16x8xf32>
    %52 = vector.shape_cast %51 : vector<16x16x8xf32> to vector<256x8xf32>
    %c0_58 = arith.constant 0 : index
    %c8 = arith.constant 8 : index
    %53 = vector.load %arg10[%c0_58, %c8] : memref<256x72xf32, #tpu.memory_space<vmem>>, vector<256x8xf32>
    tpu.vector_store %arg10[%c0_58, %c8], %52 {strides = array<i32>} : memref<256x72xf32, #tpu.memory_space<vmem>>, vector<256x8xf32>,
    %c0_59 = arith.constant 0 : index
    %c2_60 = arith.constant 2 : index
    %c0_61 = arith.constant 0 : index
    %54 = vector.load %arg8[%c0_59, %c2_60, %c0_61] : memref<18x18x16xf32, #tpu.memory_space<vmem>>, vector<16x16x8xf32>
    %55 = vector.shape_cast %54 : vector<16x16x8xf32> to vector<256x8xf32>
    %c0_62 = arith.constant 0 : index
    %c16_63 = arith.constant 16 : index
    %56 = vector.load %arg10[%c0_62, %c16_63] : memref<256x72xf32, #tpu.memory_space<vmem>>, vector<256x8xf32>
    tpu.vector_store %arg10[%c0_62, %c16_63], %55 {strides = array<i32>} : memref<256x72xf32, #tpu.memory_space<vmem>>, vector<256x8xf32>,
    %c1_64 = arith.constant 1 : index
    %c0_65 = arith.constant 0 : index
    %c0_66 = arith.constant 0 : index
    %57 = vector.load %arg8[%c1_64, %c0_65, %c0_66] : memref<18x18x16xf32, #tpu.memory_space<vmem>>, vector<16x16x8xf32>
    %58 = vector.shape_cast %57 : vector<16x16x8xf32> to vector<256x8xf32>
    %c0_67 = arith.constant 0 : index
    %c24 = arith.constant 24 : index
    %59 = vector.load %arg10[%c0_67, %c24] : memref<256x72xf32, #tpu.memory_space<vmem>>, vector<256x8xf32>
    tpu.vector_store %arg10[%c0_67, %c24], %58 {strides = array<i32>} : memref<256x72xf32, #tpu.memory_space<vmem>>, vector<256x8xf32>,
    %c1_68 = arith.constant 1 : index
    %c1_69 = arith.constant 1 : index
    %c0_70 = arith.constant 0 : index
    %60 = vector.load %arg8[%c1_68, %c1_69, %c0_70] : memref<18x18x16xf32, #tpu.memory_space<vmem>>, vector<16x16x8xf32>
    %61 = vector.shape_cast %60 : vector<16x16x8xf32> to vector<256x8xf32>
    %c0_71 = arith.constant 0 : index
    %c32_72 = arith.constant 32 : index
    %62 = vector.load %arg10[%c0_71, %c32_72] : memref<256x72xf32, #tpu.memory_space<vmem>>, vector<256x8xf32>
    tpu.vector_store %arg10[%c0_71, %c32_72], %61 {strides = array<i32>} : memref<256x72xf32, #tpu.memory_space<vmem>>, vector<256x8xf32>,
    %c1_73 = arith.constant 1 : index
    %c2_74 = arith.constant 2 : index
    %c0_75 = arith.constant 0 : index
    %63 = vector.load %arg8[%c1_73, %c2_74, %c0_75] : memref<18x18x16xf32, #tpu.memory_space<vmem>>, vector<16x16x8xf32>
    %64 = vector.shape_cast %63 : vector<16x16x8xf32> to vector<256x8xf32>
    %c0_76 = arith.constant 0 : index
    %c40 = arith.constant 40 : index
    %65 = vector.load %arg10[%c0_76, %c40] : memref<256x72xf32, #tpu.memory_space<vmem>>, vector<256x8xf32>
    tpu.vector_store %arg10[%c0_76, %c40], %64 {strides = array<i32>} : memref<256x72xf32, #tpu.memory_space<vmem>>, vector<256x8xf32>,
    %c2_77 = arith.constant 2 : index
    %c0_78 = arith.constant 0 : index
    %c0_79 = arith.constant 0 : index
    %66 = vector.load %arg8[%c2_77, %c0_78, %c0_79] : memref<18x18x16xf32, #tpu.memory_space<vmem>>, vector<16x16x8xf32>
    %67 = vector.shape_cast %66 : vector<16x16x8xf32> to vector<256x8xf32>
    %c0_80 = arith.constant 0 : index
    %c48_81 = arith.constant 48 : index
    %68 = vector.load %arg10[%c0_80, %c48_81] : memref<256x72xf32, #tpu.memory_space<vmem>>, vector<256x8xf32>
    tpu.vector_store %arg10[%c0_80, %c48_81], %67 {strides = array<i32>} : memref<256x72xf32, #tpu.memory_space<vmem>>, vector<256x8xf32>,
    %c2_82 = arith.constant 2 : index
    %c1_83 = arith.constant 1 : index
    %c0_84 = arith.constant 0 : index
    %69 = vector.load %arg8[%c2_82, %c1_83, %c0_84] : memref<18x18x16xf32, #tpu.memory_space<vmem>>, vector<16x16x8xf32>
    %70 = vector.shape_cast %69 : vector<16x16x8xf32> to vector<256x8xf32>
    %c0_85 = arith.constant 0 : index
    %c56 = arith.constant 56 : index
    %71 = vector.load %arg10[%c0_85, %c56] : memref<256x72xf32, #tpu.memory_space<vmem>>, vector<256x8xf32>
    tpu.vector_store %arg10[%c0_85, %c56], %70 {strides = array<i32>} : memref<256x72xf32, #tpu.memory_space<vmem>>, vector<256x8xf32>,
    %c2_86 = arith.constant 2 : index
    %c2_87 = arith.constant 2 : index
    %c0_88 = arith.constant 0 : index
    %72 = vector.load %arg8[%c2_86, %c2_87, %c0_88] : memref<18x18x16xf32, #tpu.memory_space<vmem>>, vector<16x16x8xf32>
    %73 = vector.shape_cast %72 : vector<16x16x8xf32> to vector<256x8xf32>
    %c0_89 = arith.constant 0 : index
    %c64_90 = arith.constant 64 : index
    %74 = vector.load %arg10[%c0_89, %c64_90] : memref<256x72xf32, #tpu.memory_space<vmem>>, vector<256x8xf32>
    tpu.vector_store %arg10[%c0_89, %c64_90], %73 {strides = array<i32>} : memref<256x72xf32, #tpu.memory_space<vmem>>, vector<256x8xf32>,
    %c0_91 = arith.constant 0 : index
    %c0_92 = arith.constant 0 : index
    %75 = vector.load %arg10[%c0_91, %c0_92] : memref<256x72xf32, #tpu.memory_space<vmem>>, vector<256x72xf32>
    %c0_93 = arith.constant 0 : index
    %c0_94 = arith.constant 0 : index
    %c0_95 = arith.constant 0 : index
    %76 = vector.load %arg6[%c0_93, %c0_94, %c0_95] : memref<1x72x8xf32, #tpu.memory_space<vmem>>, vector<1x72x8xf32>
    %77 = vector.shape_cast %76 : vector<1x72x8xf32> to vector<72x8xf32>
    %cst_96 = arith.constant dense<0.000000e+00> : vector<256x8xf32>
    %78 = tpu.matmul %75, %77, %cst_96 {dimension_numbers = #tpu.dot_dimension_numbers<[1], [0], [0], [1], [0, 0, 1, 1], [], []>} : vector<256x72xf32>, vector<72x8xf32>, vector<256x8xf32> -> vector<256x8xf32>
    %79 = arith.mulf %78, %43 : vector<256x8xf32>
    %80 = vector.shape_cast %79 : vector<256x8xf32> to vector<1x1x16x16x8xf32>
    %c0_97 = arith.constant 0 : index
    %c0_98 = arith.constant 0 : index
    %c0_99 = arith.constant 0 : index
    %c0_100 = arith.constant 0 : index
    %c0_101 = arith.constant 0 : index
    %81 = vector.load %arg7[%c0_97, %c0_98, %c0_99, %c0_100, %c0_101] : memref<1x1x16x16x8xf32, #tpu.memory_space<vmem>>, vector<1x1x16x16x8xf32>
    tpu.vector_store %arg7[%c0_97, %c0_98, %c0_99, %c0_100, %c0_101], %80 {strides = array<i32>} : memref<1x1x16x16x8xf32, #tpu.memory_space<vmem>>, vector<1x1x16x16x8xf32>,
    %c1_i32 = arith.constant 1 : i32
    %82 = arith.addi %arg1, %c1_i32 : i32
    %c2_i32 = arith.constant 2 : i32
    %83 = arith.cmpi slt, %82, %c2_i32 : i32
    %84 = arith.extui %83 : i1 to i32
    %c0_i32_102 = arith.constant 0 : i32
    %85 = arith.cmpi ne, %84, %c0_i32_102 : i32
    scf.if %85 {
      %86 = vector.shape_cast %79 : vector<256x8xf32> to vector<16x16x8xf32>
      %c1_103 = arith.constant 1 : index
      %c1_104 = arith.constant 1 : index
      %c0_105 = arith.constant 0 : index
      %87 = vector.load %arg8[%c1_103, %c1_104, %c0_105] : memref<18x18x16xf32, #tpu.memory_space<vmem>>, vector<16x16x8xf32>
      tpu.vector_store %arg8[%c1_103, %c1_104, %c0_105], %86 {strides = array<i32>} : memref<18x18x16xf32, #tpu.memory_space<vmem>>, vector<16x16x8xf32>,
    } else {
    }
    return
  }
  func.func @transform_0(%arg0: i32, %arg1: i32) -> (i32, i32, i32, i32) {
    %c0_i32 = arith.constant 0 : i32
    %c0_i32_0 = arith.constant 0 : i32
    %c0_i32_1 = arith.constant 0 : i32
    %c0_i32_2 = arith.constant 0 : i32
    return %arg0, %c0_i32, %c0_i32_0, %c0_i32_1 : i32, i32, i32, i32
  }
  func.func @transform_1(%arg0: i32, %arg1: i32) -> (i32, i32, i32, i32, i32) {
    %c0_i32 = arith.constant 0 : i32
    %c0_i32_0 = arith.constant 0 : i32
    %c0_i32_1 = arith.constant 0 : i32
    %c0_i32_2 = arith.constant 0 : i32
    return %arg1, %arg0, %c0_i32, %c0_i32_0, %c0_i32_1 : i32, i32, i32, i32, i32
  }
  func.func @transform_2(%arg0: i32, %arg1: i32) -> (i32, i32, i32) {
    %c0_i32 = arith.constant 0 : i32
    %c0_i32_0 = arith.constant 0 : i32
    %c0_i32_1 = arith.constant 0 : i32
    return %arg1, %c0_i32, %c0_i32_0 : i32, i32, i32
  }
  func.func @transform_3(%arg0: i32, %arg1: i32) -> (i32, i32, i32) {
    %c0_i32 = arith.constant 0 : i32
    %c0_i32_0 = arith.constant 0 : i32
    %c0_i32_1 = arith.constant 0 : i32
    return %arg1, %c0_i32, %c0_i32_0 : i32, i32, i32
  }
  func.func @transform_4(%arg0: i32, %arg1: i32) -> (i32, i32, i32) {
    %c0_i32 = arith.constant 0 : i32
    %c0_i32_0 = arith.constant 0 : i32
    %c0_i32_1 = arith.constant 0 : i32
    return %arg1, %c0_i32, %c0_i32_0 : i32, i32, i32
  }
  func.func @transform_5(%arg0: i32, %arg1: i32) -> (i32, i32, i32, i32, i32) {
    %c0_i32 = arith.constant 0 : i32
    %c0_i32_0 = arith.constant 0 : i32
    %c0_i32_1 = arith.constant 0 : i32
    %c0_i32_2 = arith.constant 0 : i32
    return %arg1, %arg0, %c0_i32, %c0_i32_0, %c0_i32_1 : i32, i32, i32, i32, i32
  }
}

</mosaic_0001>

<bundles_post_ra>
// kernel: tpu_custom_call.1
= control target key start
LH: loop header
LB: loop body
LE: loop exit
PB: predicated region body
PF: predicated region fallthrough
CT: control target
= control target key end

     0   :  { %s5475_s18 = smov 0   ;;  %s5477_s19 = smov 0   ;;  %s7956_s0 = inlined_call_operand.vmem [shape: f32[2,16,16,8], index: 0, kind: input, shape index: {}]   ;;  %s7957_s1 = inlined_call_operand.vmem [shape: f32[2,2,16,16,8], index: 1, kind: input, shape index: {}]   ;;  %s7958_s2 = inlined_call_operand.vmem [shape: f32[2,144,16], index: 2, kind: input, shape index: {}]   ;;  %s7959_s3 = inlined_call_operand.vmem [shape: f32[2,1,16], index: 3, kind: input, shape index: {}]   ;;  %s7960_s4 = inlined_call_operand.vmem [shape: f32[2,72,8], index: 4, kind: input, shape index: {}]   ;;  %s7961_s5 = inlined_call_operand.vmem [shape: f32[2,2,16,16,8], index: 5, kind: output, shape index: {}]  }
   0x1   :  { %s5479_s20 = smov 0   ;;  %s5481_s21 = smov 0  }
   0x2   :  { %s5483_s1 = smov 0  }
   0x3 LB: > { %s24_s22 = sadd.s32 1, %s5421_s20  ;;  %s27_s23 = sadd.s32 1, %s5425_s21  ;;  %s5429_s1 = sphi %s5483_s1, %s15_s1   ;;  %s5425_s21 = sphi %s5481_s21, %s8067_s21   ;;  %s5421_s20 = sphi %s5479_s20, %s8066_s20   ;;  %s5417_s19 = sphi %s5477_s19, %s8065_s19   ;;  %s5413_s18 = sphi %s5475_s18, %s8064_s18  }
   0x4   : > { %p25_p0 = scmp.ge.s32.totalorder %s24_s22, 2  ;;  %p4954_p1 = scmp.ge.s32.totalorder %s5429_s1, 1 }
   0x5   : > { %p245_p2 = scmp.lt.s32.totalorder %s5429_s1, 5 }
   0x6   : > { %s8069_s22 = smov (%p25_p0, %s24_s22), 0  ;;  %s8071_s23 = smov (!%p25_p0, %s27_s23), %s5425_s21 }
   0x7   : > { %p246_p3 = pnand %p4954_p1, %p245_p2  ;;  %p29_p4 = scmp.ge.s32.totalorder %s8071_s23, 2 }
   0x9   : > { %s8073_s23 = smov (%p29_p4, %s8071_s23), 0  ;;  %249 = sbr.rel (%p246_p3) target bundleno = 1367 (0x557), region = 40 }
   0xe   : > { %p299_p5 = scmp.lt.s32.totalorder %s5417_s19, 1  ;;  %p313_p6 = scmp.lt.s32.totalorder %s5413_s18, 1 }
   0xf   : > { %p4962_p7 = scmp.ne.s32.totalorder %s5413_s18, 0 }
  0x10   : > { %s8075_s19 = smov (!%p299_p5, %s5417_s19), 1 }
  0x11   : > { %s5509_s24 = scalar_select %p313_p6, %s5413_s18, 1 }
  0x12   : > { %s5063_s25 = sshll.u32 %s8075_s19, 8  ;;  %s4959_s26 = sshll.u32 %s8075_s19, 5 }
  0x13   : > { %s5514_s29 = scalar_lea.vmem %s7956_s0, %s5063_s25  ;;  %s5207_s30 = smul.u32 144, %s5509_s24 }
  0x14   : > { %s320_s8 = scalar_lea.vmem %s7959_s3, %s5509_s24  ;;  %s5208_s9 = smul.u32 72, %s5509_s24 }
  0x15   : > { %s5525_s12 = scalar_lea.vmem %s7958_s2, %s5207_s30  ;;  %s4960_s13 = sshll.u32 %s5509_s24, 6 }
  0x16   : > { %s5531_s16 = scalar_lea.vmem %s7960_s4, %s5208_s9  ;;  %s332_s17 = sadd.s32 %s4960_s13, %s4959_s26 }
  0x17   : > { %s4961_s19 = sshll.u32 %s332_s17, 3  ;;  %338 = sbr.rel (%p4962_p7) target bundleno = 72 (0x48), region = 44 }
  0x18   : > { %s5536_s28 = scalar_lea.vmem %s7961_s5, %s4961_s19 }
  0x1c   : > { %vm339_vm0 = vcmask 130048   ;;  %vm342_vm1 = vcmask 123904   ;;  %v395_v0 = vld [vmem:[%s5514_s29] sm:$0xff]  ;;  %vm428_vm2 = vcmask 64512   ;;  %v396_v1 = vld [vmem:[%s5514_s29 + $0x8] sm:$0xff]  ;;  %v5431_v2 = vmov 0.0  }
  0x1d   : > { %344 = vst.msk [vmem:[#allocation2 + $0x18] sm:$0xff] %vm339_vm0, %v5431_v2  ;;  %340 = vst.msk [vmem:[#allocation2] sm:$0xff] %vm339_vm0, %v5431_v2  ;;  %v397_v3 = vld [vmem:[%s5514_s29 + $0x10] sm:$0xff]  ;;  %v398_v4 = vld [vmem:[%s5514_s29 + $0x18] sm:$0xff] }
  0x1e   : > { %341 = vst.msk [vmem:[#allocation2 + $0x8] sm:$0xff] %vm339_vm0, %v5431_v2  ;;  %345 = vst.msk [vmem:[#allocation2 + $0x20] sm:$0xff] %vm339_vm0, %v5431_v2  ;;  %v399_v5 = vld [vmem:[%s5514_s29 + $0x20] sm:$0xff]  ;;  %v400_v6 = vld [vmem:[%s5514_s29 + $0x28] sm:$0xff] }
  0x1f   : > { %347 = vst.msk [vmem:[#allocation2 + $0x30] sm:$0xff] %vm339_vm0, %v5431_v2  ;;  %348 = vst.msk [vmem:[#allocation2 + $0x38] sm:$0xff] %vm339_vm0, %v5431_v2  ;;  %v401_v7 = vld [vmem:[%s5514_s29 + $0x30] sm:$0xff]  ;;  %v402_v8 = vld [vmem:[%s5514_s29 + $0x38] sm:$0xff] }
  0x20   : > { %350 = vst.msk [vmem:[#allocation2 + $0x48] sm:$0xff] %vm339_vm0, %v5431_v2  ;;  %351 = vst.msk [vmem:[#allocation2 + $0x50] sm:$0xff] %vm339_vm0, %v5431_v2  ;;  %v403_v9 = vld [vmem:[%s5514_s29 + $0x40] sm:$0xff]  ;;  %v404_v10 = vld [vmem:[%s5514_s29 + $0x48] sm:$0xff] }
  0x21   : > { %353 = vst.msk [vmem:[#allocation2 + $0x60] sm:$0xff] %vm339_vm0, %v5431_v2  ;;  %354 = vst.msk [vmem:[#allocation2 + $0x68] sm:$0xff] %vm339_vm0, %v5431_v2  ;;  %v405_v11 = vld [vmem:[%s5514_s29 + $0x50] sm:$0xff]  ;;  %v406_v12 = vld [vmem:[%s5514_s29 + $0x58] sm:$0xff] }
  0x22   : > { %356 = vst.msk [vmem:[#allocation2 + $0x78] sm:$0xff] %vm339_vm0, %v5431_v2  ;;  %357 = vst.msk [vmem:[#allocation2 + $0x80] sm:$0xff] %vm339_vm0, %v5431_v2  ;;  %v407_v13 = vld [vmem:[%s5514_s29 + $0x60] sm:$0xff]  ;;  %v408_v14 = vld [vmem:[%s5514_s29 + $0x68] sm:$0xff] }
  0x23   : > { %359 = vst.msk [vmem:[#allocation2 + $0x90] sm:$0xff] %vm339_vm0, %v5431_v2  ;;  %360 = vst.msk [vmem:[#allocation2 + $0x98] sm:$0xff] %vm339_vm0, %v5431_v2  ;;  %v409_v15 = vld [vmem:[%s5514_s29 + $0x70] sm:$0xff]  ;;  %v410_v16 = vld [vmem:[%s5514_s29 + $0x78] sm:$0xff] }
  0x24   : > { %362 = vst.msk [vmem:[#allocation2 + $0xa8] sm:$0xff] %vm339_vm0, %v5431_v2  ;;  %363 = vst.msk [vmem:[#allocation2 + $0xb0] sm:$0xff] %vm339_vm0, %v5431_v2  ;;  %v411_v17 = vld [vmem:[%s5514_s29 + $0x80] sm:$0xff]  ;;  %v412_v18 = vld [vmem:[%s5514_s29 + $0x88] sm:$0xff] }
  0x25   : > { %365 = vst.msk [vmem:[#allocation2 + $0xc0] sm:$0xff] %vm339_vm0, %v5431_v2  ;;  %366 = vst.msk [vmem:[#allocation2 + $0xc8] sm:$0xff] %vm339_vm0, %v5431_v2  ;;  %v413_v19 = vld [vmem:[%s5514_s29 + $0x90] sm:$0xff]  ;;  %v414_v20 = vld [vmem:[%s5514_s29 + $0x98] sm:$0xff] }
  0x26   : > { %368 = vst.msk [vmem:[#allocation2 + $0xd8] sm:$0xff] %vm339_vm0, %v5431_v2  ;;  %369 = vst.msk [vmem:[#allocation2 + $0xe0] sm:$0xff] %vm339_vm0, %v5431_v2  ;;  %v415_v21 = vld [vmem:[%s5514_s29 + $0xa0] sm:$0xff]  ;;  %v416_v22 = vld [vmem:[%s5514_s29 + $0xa8] sm:$0xff] }
  0x27   : > { %371 = vst.msk [vmem:[#allocation2 + $0xf0] sm:$0xff] %vm339_vm0, %v5431_v2  ;;  %372 = vst.msk [vmem:[#allocation2 + $0xf8] sm:$0xff] %vm339_vm0, %v5431_v2  ;;  %v417_v23 = vld [vmem:[%s5514_s29 + $0xb0] sm:$0xff]  ;;  %v418_v24 = vld [vmem:[%s5514_s29 + $0xb8] sm:$0xff] }
  0x28   : > { %374 = vst.msk [vmem:[#allocation2 + $0x108] sm:$0xff] %vm339_vm0, %v5431_v2  ;;  %375 = vst.msk [vmem:[#allocation2 + $0x110] sm:$0xff] %vm339_vm0, %v5431_v2  ;;  %v419_v25 = vld [vmem:[%s5514_s29 + $0xc0] sm:$0xff]  ;;  %v420_v26 = vld [vmem:[%s5514_s29 + $0xc8] sm:$0xff] }
  0x29   : > { %377 = vst.msk [vmem:[#allocation2 + $0x120] sm:$0xff] %vm339_vm0, %v5431_v2  ;;  %378 = vst.msk [vmem:[#allocation2 + $0x128] sm:$0xff] %vm339_vm0, %v5431_v2  ;;  %v421_v27 = vld [vmem:[%s5514_s29 + $0xd0] sm:$0xff]  ;;  %v422_v28 = vld [vmem:[%s5514_s29 + $0xd8] sm:$0xff] }
  0x2a   : > { %380 = vst.msk [vmem:[#allocation2 + $0x138] sm:$0xff] %vm339_vm0, %v5431_v2  ;;  %381 = vst.msk [vmem:[#allocation2 + $0x140] sm:$0xff] %vm339_vm0, %v5431_v2  ;;  %v423_v29 = vld [vmem:[%s5514_s29 + $0xe0] sm:$0xff]  ;;  %v424_v30 = vld [vmem:[%s5514_s29 + $0xe8] sm:$0xff] }
  0x2b   : > { %383 = vst.msk [vmem:[#allocation2 + $0x150] sm:$0xff] %vm339_vm0, %v5431_v2  ;;  %384 = vst.msk [vmem:[#allocation2 + $0x158] sm:$0xff] %vm339_vm0, %v5431_v2  ;;  %v425_v31 = vld [vmem:[%s5514_s29 + $0xf0] sm:$0xff]  ;;  %v426_v32 = vld [vmem:[%s5514_s29 + $0xf8] sm:$0xff] }
  0x2c   : > { %386 = vst.msk [vmem:[#allocation2 + $0x168] sm:$0xff] %vm339_vm0, %v5431_v2  ;;  %387 = vst.msk [vmem:[#allocation2 + $0x170] sm:$0xff] %vm339_vm0, %v5431_v2 }
  0x2d   : > { %389 = vst.msk [vmem:[#allocation2 + $0x180] sm:$0xff] %vm339_vm0, %v5431_v2  ;;  %390 = vst.msk [vmem:[#allocation2 + $0x188] sm:$0xff] %vm339_vm0, %v5431_v2 }
  0x2e   : > { %392 = vst.msk [vmem:[#allocation2 + $0x198] sm:$0xff] %vm339_vm0, %v5431_v2  ;;  %393 = vst.msk [vmem:[#allocation2 + $0x1a0] sm:$0xff] %vm339_vm0, %v5431_v2 }
  0x2f   : > { %346 = vst.msk [vmem:[#allocation2 + $0x28] sm:$0x3] %vm342_vm1, %v5431_v2  ;;  %343 = vst.msk [vmem:[#allocation2 + $0x10] sm:$0x3] %vm342_vm1, %v5431_v2 }
  0x30   : > { %349 = vst.msk [vmem:[#allocation2 + $0x40] sm:$0x3] %vm342_vm1, %v5431_v2  ;;  %352 = vst.msk [vmem:[#allocation2 + $0x58] sm:$0x3] %vm342_vm1, %v5431_v2 }
  0x31   : > { %355 = vst.msk [vmem:[#allocation2 + $0x70] sm:$0x3] %vm342_vm1, %v5431_v2  ;;  %358 = vst.msk [vmem:[#allocation2 + $0x88] sm:$0x3] %vm342_vm1, %v5431_v2 }
  0x32   : > { %361 = vst.msk [vmem:[#allocation2 + $0xa0] sm:$0x3] %vm342_vm1, %v5431_v2  ;;  %364 = vst.msk [vmem:[#allocation2 + $0xb8] sm:$0x3] %vm342_vm1, %v5431_v2 }
  0x33   : > { %367 = vst.msk [vmem:[#allocation2 + $0xd0] sm:$0x3] %vm342_vm1, %v5431_v2  ;;  %370 = vst.msk [vmem:[#allocation2 + $0xe8] sm:$0x3] %vm342_vm1, %v5431_v2 }
  0x34   : > { %373 = vst.msk [vmem:[#allocation2 + $0x100] sm:$0x3] %vm342_vm1, %v5431_v2  ;;  %376 = vst.msk [vmem:[#allocation2 + $0x118] sm:$0x3] %vm342_vm1, %v5431_v2 }
  0x35   : > { %379 = vst.msk [vmem:[#allocation2 + $0x130] sm:$0x3] %vm342_vm1, %v5431_v2  ;;  %382 = vst.msk [vmem:[#allocation2 + $0x148] sm:$0x3] %vm342_vm1, %v5431_v2 }
  0x36   : > { %385 = vst.msk [vmem:[#allocation2 + $0x160] sm:$0x3] %vm342_vm1, %v5431_v2  ;;  %388 = vst.msk [vmem:[#allocation2 + $0x178] sm:$0x3] %vm342_vm1, %v5431_v2 }
  0x37   : > { %391 = vst.msk [vmem:[#allocation2 + $0x190] sm:$0x3] %vm342_vm1, %v5431_v2  ;;  %394 = vst.msk [vmem:[#allocation2 + $0x1a8] sm:$0x3] %vm342_vm1, %v5431_v2 }
  0x38   : > { %429 = vst.msk [vmem:[#allocation2 + $0x19] sm:$0xff] %vm428_vm2, %v395_v0  ;;  %430 = vst.msk [vmem:[#allocation2 + $0x21] sm:$0xff] %vm428_vm2, %v396_v1 }
  0x39   : > { %431 = vst.msk [vmem:[#allocation2 + $0x31] sm:$0xff] %vm428_vm2, %v397_v3  ;;  %432 = vst.msk [vmem:[#allocation2 + $0x39] sm:$0xff] %vm428_vm2, %v398_v4 }
  0x3a   : > { %433 = vst.msk [vmem:[#allocation2 + $0x49] sm:$0xff] %vm428_vm2, %v399_v5  ;;  %434 = vst.msk [vmem:[#allocation2 + $0x51] sm:$0xff] %vm428_vm2, %v400_v6 }
  0x3b   : > { %435 = vst.msk [vmem:[#allocation2 + $0x61] sm:$0xff] %vm428_vm2, %v401_v7  ;;  %436 = vst.msk [vmem:[#allocation2 + $0x69] sm:$0xff] %vm428_vm2, %v402_v8 }
  0x3c   : > { %437 = vst.msk [vmem:[#allocation2 + $0x79] sm:$0xff] %vm428_vm2, %v403_v9  ;;  %438 = vst.msk [vmem:[#allocation2 + $0x81] sm:$0xff] %vm428_vm2, %v404_v10 }
  0x3d   : > { %439 = vst.msk [vmem:[#allocation2 + $0x91] sm:$0xff] %vm428_vm2, %v405_v11  ;;  %440 = vst.msk [vmem:[#allocation2 + $0x99] sm:$0xff] %vm428_vm2, %v406_v12 }
  0x3e   : > { %441 = vst.msk [vmem:[#allocation2 + $0xa9] sm:$0xff] %vm428_vm2, %v407_v13  ;;  %442 = vst.msk [vmem:[#allocation2 + $0xb1] sm:$0xff] %vm428_vm2, %v408_v14 }
  0x3f   : > { %443 = vst.msk [vmem:[#allocation2 + $0xc1] sm:$0xff] %vm428_vm2, %v409_v15  ;;  %444 = vst.msk [vmem:[#allocation2 + $0xc9] sm:$0xff] %vm428_vm2, %v410_v16 }
  0x40   : > { %445 = vst.msk [vmem:[#allocation2 + $0xd9] sm:$0xff] %vm428_vm2, %v411_v17  ;;  %446 = vst.msk [vmem:[#allocation2 + $0xe1] sm:$0xff] %vm428_vm2, %v412_v18 }
  0x41   : > { %447 = vst.msk [vmem:[#allocation2 + $0xf1] sm:$0xff] %vm428_vm2, %v413_v19  ;;  %448 = vst.msk [vmem:[#allocation2 + $0xf9] sm:$0xff] %vm428_vm2, %v414_v20 }
  0x42   : > { %449 = vst.msk [vmem:[#allocation2 + $0x109] sm:$0xff] %vm428_vm2, %v415_v21  ;;  %450 = vst.msk [vmem:[#allocation2 + $0x111] sm:$0xff] %vm428_vm2, %v416_v22 }
  0x43   : > { %451 = vst.msk [vmem:[#allocation2 + $0x121] sm:$0xff] %vm428_vm2, %v417_v23  ;;  %452 = vst.msk [vmem:[#allocation2 + $0x129] sm:$0xff] %vm428_vm2, %v418_v24 }
  0x44   : > { %453 = vst.msk [vmem:[#allocation2 + $0x139] sm:$0xff] %vm428_vm2, %v419_v25  ;;  %454 = vst.msk [vmem:[#allocation2 + $0x141] sm:$0xff] %vm428_vm2, %v420_v26 }
  0x45   : > { %455 = vst.msk [vmem:[#allocation2 + $0x151] sm:$0xff] %vm428_vm2, %v421_v27  ;;  %456 = vst.msk [vmem:[#allocation2 + $0x159] sm:$0xff] %vm428_vm2, %v422_v28 }
  0x46   : > { %457 = vst.msk [vmem:[#allocation2 + $0x169] sm:$0xff] %vm428_vm2, %v423_v29  ;;  %458 = vst.msk [vmem:[#allocation2 + $0x171] sm:$0xff] %vm428_vm2, %v424_v30 }
  0x47   : > { %459 = vst.msk [vmem:[#allocation2 + $0x181] sm:$0xff] %vm428_vm2, %v425_v31  ;;  %460 = vst.msk [vmem:[#allocation2 + $0x189] sm:$0xff] %vm428_vm2, %v426_v32 }
  0x48 PF: > { %v5657_v33 = vld [vmem:[#allocation2 + $0x19] sm:$0xff]  ;;  %v526_v34 = vld [vmem:[#allocation2 + $0x1] sm:$0xff]  ;;  %s5432_s26 = smov 16   ;;  %v527_v36 = vld [vmem:[#allocation2 + $0x9] sm:$0xff]  ;;  %vm493_vm3 = vcmask 130048   ;;  %s5433_s29 = smov 32  }
  0x49   : > { %594 = vrot.lane.b32.xlu1 %v5657_v33, %s5432_s26  ;;  %590 = vrot.lane.b32.xlu0 %v526_v34, %s5432_s26  ;;  %v5662_v35 = vld [vmem:[#allocation2 + $0x21] sm:$0xff]  ;;  %v5667_v37 = vld [vmem:[#allocation2 + $0x39] sm:$0xff]  ;;  %v5669_v38 = vld [vmem:[#allocation2 + $0x31] sm:$0xff]  ;;  %vm686_vm4 = vcmask 261248   ;;  %s5434_s30 = smov 48   ;;  %vm2577_vm5 = vcmask 64512  }
  0x4a   : > { %v5675_v39 = vld [vmem:[#allocation2 + $0x51] sm:$0xff]  ;;  %v5677_v40 = vld [vmem:[#allocation2 + $0x49] sm:$0xff]  ;;  %v5685_v42 = vld [vmem:[#allocation2 + $0x61] sm:$0xff]  ;;  %vm879_vm6 = vcmask 392448   ;;  %s5435_s6 = smov 64   ;;  %vm1073_vm7 = vcmask 523648  }
  0x4b   : > { %v5683_v41 = vld [vmem:[#allocation2 + $0x69] sm:$0xff]  ;;  %v5691_v43 = vld [vmem:[#allocation2 + $0x81] sm:$0xff]  ;;  %v5693_v44 = vld [vmem:[#allocation2 + $0x79] sm:$0xff]  ;;  %s5436_s7 = smov 80   ;;  %vm1266_vm8 = vcmask 654848   ;;  %s5437_s9 = smov 96  }
  0x4c   : > { %v5695_v45 = vld [vmem:[#allocation2 + $0x18] sm:$0xff]  ;;  %v461_v46 = vld [vmem:[#allocation2] sm:$0xff]  ;;  %v462_v49 = vld [vmem:[#allocation2 + $0x8] sm:$0xff]  ;;  %vm1459_vm9 = vcmask 786048   ;;  %s5439_s10 = smov 112   ;;  %vm1653_vm10 = vcmask 917248  }
  0x4d   : > { %596 = vrot.lane.b32.xlu1 %v5662_v35, %s5432_s26  ;;  %592 = vrot.lane.b32.xlu0 %v527_v36, %s5432_s26  ;;  %496 = vst.msk [vmem:[#allocation3 + $0x20] sm:$0xff] %vm493_vm3, %v5695_v45  ;;  %494 = vst.msk [vmem:[#allocation3] sm:$0xff] %vm493_vm3, %v461_v46  ;;  %v5700_v47 = vld [vmem:[#allocation2 + $0x20] sm:$0xff]  ;;  %v5710_v50 = vld [vmem:[#allocation2 + $0x91] sm:$0xff]  ;;  %s5440_s11 = smov 8   ;;  %vm1846_vm11 = vcmask 1048448  }
  0x4e   : > { %v5706_v48 = vld [vmem:[#allocation2 + $0x99] sm:$0xff]  ;;  %497 = vst.msk [vmem:[#allocation3 + $0x30] sm:$0xff] %vm493_vm3, %v5700_v47  ;;  %495 = vst.msk [vmem:[#allocation3 + $0x10] sm:$0xff] %vm493_vm3, %v462_v49  ;;  %v5715_v52 = vld [vmem:[#allocation2 + $0x30] sm:$0xff]  ;;  %vm2834_vm12 = vcmask 130112   ;;  %vm3027_vm13 = vcmask 195712  }
  0x4f   : > { %v5713_v51 = vld [vmem:[#allocation2 + $0x38] sm:$0xff]  ;;  %498 = vst.msk [vmem:[#allocation3 + $0x40] sm:$0xff] %vm493_vm3, %v5715_v52  ;;  %v5721_v53 = vld [vmem:[#allocation2 + $0x50] sm:$0xff]  ;;  %v5723_v54 = vld [vmem:[#allocation2 + $0x48] sm:$0xff]  ;;  %vm3220_vm14 = vcmask 261312   ;;  %s5442_s13 = smov 40  }
  0x50   : > { %499 = vst.msk [vmem:[#allocation3 + $0x50] sm:$0xff] %vm493_vm3, %v5713_v51  ;;  %v5725_v55 = vld [vmem:[#allocation2 + $0xb1] sm:$0xff]  ;;  %v5727_v56 = vld [vmem:[#allocation2 + $0xa9] sm:$0xff]  ;;  %501 = vst.msk [vmem:[#allocation3 + $0x70] sm:$0xff] %vm493_vm3, %v5721_v53  ;;  %s5443_s14 = smov 56   ;;  %vm3413_vm15 = vcmask 326912  }
  0x51   : > { %600 = vrot.lane.b32.xlu1 %v5667_v37, %s5432_s26  ;;  %598 = vrot.lane.b32.xlu0 %v5669_v38, %s5432_s26  ;;  %500 = vst.msk [vmem:[#allocation3 + $0x60] sm:$0xff] %vm493_vm3, %v5723_v54  ;;  %v5733_v57 = vld [vmem:[#allocation2 + $0x68] sm:$0xff]  ;;  %v5735_v58 = vld [vmem:[#allocation2 + $0x60] sm:$0xff]  ;;  %v5749_v60 = vld [vmem:[#allocation2 + $0x78] sm:$0xff]  ;;  %vm3606_vm0 = vcmask 392512   ;;  %vm3799_vm1 = vcmask 458112  }
  0x52   : > { %v5737_v59 = vld [vmem:[#allocation2 + $0x80] sm:$0xff]  ;;  %503 = vst.msk [vmem:[#allocation3 + $0x90] sm:$0xff] %vm493_vm3, %v5733_v57  ;;  %502 = vst.msk [vmem:[#allocation3 + $0x80] sm:$0xff] %vm493_vm3, %v5735_v58  ;;  %v5751_v61 = vld [vmem:[#allocation2 + $0x98] sm:$0xff]  ;;  %vm3992_vm2 = vcmask 523712   ;;  %s5444_s24 = smov 120  }
  0x53   : > { %505 = vst.msk [vmem:[#allocation3 + $0xb0] sm:$0xff] %vm493_vm3, %v5737_v59  ;;  %v5753_v62 = vld [vmem:[#allocation2 + $0x90] sm:$0xff]  ;;  %504 = vst.msk [vmem:[#allocation3 + $0xa0] sm:$0xff] %vm493_vm3, %v5749_v60  ;;  %v5763_v0 = vld [vmem:[#allocation2 + $0xa8] sm:$0xff] }
  0x54   : > { %507 = vst.msk [vmem:[#allocation3 + $0xd0] sm:$0xff] %vm493_vm3, %v5751_v61  ;;  %506 = vst.msk [vmem:[#allocation3 + $0xc0] sm:$0xff] %vm493_vm3, %v5753_v62  ;;  %v5761_v63 = vld [vmem:[#allocation2 + $0xb0] sm:$0xff]  ;;  %v5765_v1 = vld [vmem:[#allocation2 + $0xc8] sm:$0xff] }
  0x55   : > { %604 = vrot.lane.b32.xlu1 %v5675_v39, %s5432_s26  ;;  %602 = vrot.lane.b32.xlu0 %v5677_v40, %s5432_s26  ;;  %509 = vst.msk [vmem:[#allocation3 + $0xf0] sm:$0xff] %vm493_vm3, %v5761_v63  ;;  %508 = vst.msk [vmem:[#allocation3 + $0xe0] sm:$0xff] %vm493_vm3, %v5763_v0  ;;  %v5773_v2 = vld [vmem:[#allocation2 + $0xc0] sm:$0xff]  ;;  %v5777_v4 = vld [vmem:[#allocation2 + $0xd8] sm:$0xff] }
  0x56   : > { %511 = vst.msk [vmem:[#allocation3 + $0x110] sm:$0xff] %vm493_vm3, %v5765_v1  ;;  %v5775_v3 = vld [vmem:[#allocation2 + $0xe0] sm:$0xff]  ;;  %510 = vst.msk [vmem:[#allocation3 + $0x100] sm:$0xff] %vm493_vm3, %v5773_v2  ;;  %v5785_v5 = vld [vmem:[#allocation2 + $0xf8] sm:$0xff] }
  0x57   : > { %513 = vst.msk [vmem:[#allocation3 + $0x130] sm:$0xff] %vm493_vm3, %v5775_v3  ;;  %512 = vst.msk [vmem:[#allocation3 + $0x120] sm:$0xff] %vm493_vm3, %v5777_v4  ;;  %v5787_v6 = vld [vmem:[#allocation2 + $0xf0] sm:$0xff]  ;;  %v5799_v8 = vld [vmem:[#allocation2 + $0xc1] sm:$0xff] }
  0x58   : > { %515 = vst.msk [vmem:[#allocation3 + $0x150] sm:$0xff] %vm493_vm3, %v5785_v5  ;;  %514 = vst.msk [vmem:[#allocation3 + $0x140] sm:$0xff] %vm493_vm3, %v5787_v6  ;;  %v5797_v7 = vld [vmem:[#allocation2 + $0xc9] sm:$0xff]  ;;  %v5813_v11 = vld [vmem:[#allocation2 + $0xe1] sm:$0xff] }
  0x59   : > { %608 = vrot.lane.b32.xlu1 %v5683_v41, %s5432_s26  ;;  %606 = vrot.lane.b32.xlu0 %v5685_v42, %s5432_s26  ;;  %v5801_v9 = vld [vmem:[#allocation2 + $0x108] sm:$0xff]  ;;  %v5803_v10 = vld [vmem:[#allocation2 + $0x110] sm:$0xff]  ;;  %v5815_v12 = vld [vmem:[#allocation2 + $0xd9] sm:$0xff] }
  0x5a   : > { %516 = vst.msk [vmem:[#allocation3 + $0x160] sm:$0xff] %vm493_vm3, %v5801_v9  ;;  %517 = vst.msk [vmem:[#allocation3 + $0x170] sm:$0xff] %vm493_vm3, %v5803_v10  ;;  %v5817_v13 = vld [vmem:[#allocation2 + $0x120] sm:$0xff]  ;;  %v5819_v14 = vld [vmem:[#allocation2 + $0x128] sm:$0xff] }
  0x5b   : > { %518 = vst.msk [vmem:[#allocation3 + $0x180] sm:$0xff] %vm493_vm3, %v5817_v13  ;;  %519 = vst.msk [vmem:[#allocation3 + $0x190] sm:$0xff] %vm493_vm3, %v5819_v14  ;;  %v5829_v15 = vld [vmem:[#allocation2 + $0xf9] sm:$0xff]  ;;  %v5831_v16 = vld [vmem:[#allocation2 + $0xf1] sm:$0xff] }
  0x5c   : > { %v5833_v17 = vld [vmem:[#allocation2 + $0x138] sm:$0xff]  ;;  %v5835_v18 = vld [vmem:[#allocation2 + $0x140] sm:$0xff]  ;;  %v5847_v20 = vld [vmem:[#allocation2 + $0x109] sm:$0xff] }
  0x5d   : > { %612 = vrot.lane.b32.xlu1 %v5691_v43, %s5432_s26  ;;  %610 = vrot.lane.b32.xlu0 %v5693_v44, %s5432_s26  ;;  %520 = vst.msk [vmem:[#allocation3 + $0x1a0] sm:$0xff] %vm493_vm3, %v5833_v17  ;;  %521 = vst.msk [vmem:[#allocation3 + $0x1b0] sm:$0xff] %vm493_vm3, %v5835_v18  ;;  %v5845_v19 = vld [vmem:[#allocation2 + $0x111] sm:$0xff]  ;;  %v5861_v23 = vld [vmem:[#allocation2 + $0x129] sm:$0xff] }
  0x5e   : > { %v5849_v21 = vld [vmem:[#allocation2 + $0x150] sm:$0xff]  ;;  %v5851_v22 = vld [vmem:[#allocation2 + $0x158] sm:$0xff]  ;;  %v5863_v24 = vld [vmem:[#allocation2 + $0x121] sm:$0xff] }
  0x5f   : > { %7996 = vst [vmem:[#allocation5_spill] sm:$0xff] %v5851_v22  ;;  %522 = vst.msk [vmem:[#allocation3 + $0x1c0] sm:$0xff] %vm493_vm3, %v5849_v21  ;;  %v5865_v25 = vld [vmem:[#allocation2 + $0x168] sm:$0xff]  ;;  %v5867_v26 = vld [vmem:[#allocation2 + $0x170] sm:$0xff] }
  0x60   : > { %523 = vst.msk [vmem:[#allocation3 + $0x1d0] sm:$0xff] %vm493_vm3, %v5851_v22  ;;  %7997 = vst [vmem:[#allocation6_spill] sm:$0xff] %v5867_v26  ;;  %v5877_v27 = vld [vmem:[#allocation2 + $0x141] sm:$0xff]  ;;  %v5879_v28 = vld [vmem:[#allocation2 + $0x139] sm:$0xff] }
  0x61   : > { %616 = vrot.lane.b32.xlu1 %v5706_v48, %s5432_s26  ;;  %614 = vrot.lane.b32.xlu0 %v5710_v50, %s5432_s26  ;;  %524 = vst.msk [vmem:[#allocation3 + $0x1e0] sm:$0xff] %vm493_vm3, %v5865_v25  ;;  %525 = vst.msk [vmem:[#allocation3 + $0x1f0] sm:$0xff] %vm493_vm3, %v5867_v26  ;;  %v5885_v29 = vld [vmem:[#allocation2 + $0x159] sm:$0xff]  ;;  %v5887_v30 = vld [vmem:[#allocation2 + $0x151] sm:$0xff] }
  0x62   : > { %7998 = vst [vmem:[#allocation7_spill] sm:$0xff] %v5885_v29  ;;  %7999 = vst [vmem:[#allocation8_spill] sm:$0xff] %v5887_v30  ;;  %v5893_v31 = vld [vmem:[#allocation2 + $0x171] sm:$0xff]  ;;  %v5895_v32 = vld [vmem:[#allocation2 + $0x169] sm:$0xff] }
  0x63   : > { %8000 = vst [vmem:[#allocation9_spill] sm:$0xff] %v5893_v31  ;;  %8001 = vst [vmem:[#allocation10_spill] sm:$0xff] %v5895_v32  ;;  %v720_v34 = vld [vmem:[#allocation2 + $0xa] sm:$0xff]  ;;  %v719_v36 = vld [vmem:[#allocation2 + $0x2] sm:$0xff] }
  0x64   : > { %v5903_v46 = vld [vmem:[#allocation2 + $0x22] sm:$0xff]  ;;  %v5905_v49 = vld [vmem:[#allocation2 + $0x1a] sm:$0xff] }
  0x65   : > { %620 = vrot.lane.b32.xlu1 %v5725_v55, %s5432_s26  ;;  %618 = vrot.lane.b32.xlu0 %v5727_v56, %s5432_s26  ;;  %8002 = vst [vmem:[#allocation11_spill] sm:$0xff] %v5903_v46  ;;  %8003 = vst [vmem:[#allocation12_spill] sm:$0xff] %v5905_v49 }
  0x66   : > { %2578 = vst.msk [vmem:[#allocation2 + $0x19] sm:$0xff] %vm2577_vm5, %v5657_v33  ;;  %2579 = vst.msk [vmem:[#allocation2 + $0x21] sm:$0xff] %vm2577_vm5, %v5662_v35 }
  0x69   : > { %624 = vrot.lane.b32.xlu1 %v5797_v7, %s5432_s26  ;;  %622 = vrot.lane.b32.xlu0 %v5799_v8, %s5432_s26 }
  0x6d   : > { %628 = vrot.lane.b32.xlu1 %v5813_v11, %s5432_s26  ;;  %626 = vrot.lane.b32.xlu0 %v5815_v12, %s5432_s26 }
  0x71   : > { %632 = vrot.lane.b32.xlu1 %v5829_v15, %s5432_s26  ;;  %630 = vrot.lane.b32.xlu0 %v5831_v16, %s5432_s26 }
  0x75   : > { %636 = vrot.lane.b32.xlu1 %v5845_v19, %s5432_s26  ;;  %634 = vrot.lane.b32.xlu0 %v5847_v20, %s5432_s26 }
  0x79   : > { %640 = vrot.lane.b32.xlu1 %v5861_v23, %s5432_s26  ;;  %638 = vrot.lane.b32.xlu0 %v5863_v24, %s5432_s26 }
  0x7d   : > { %644 = vrot.lane.b32.xlu1 %v5877_v27, %s5432_s26  ;;  %642 = vrot.lane.b32.xlu0 %v5879_v28, %s5432_s26 }
  0x81   : > { %648 = vrot.lane.b32.xlu1 %v5885_v29, %s5432_s26  ;;  %646 = vrot.lane.b32.xlu0 %v5887_v30, %s5432_s26 }
  0x85   : > { %652 = vrot.lane.b32.xlu1 %v5893_v31, %s5432_s26  ;;  %650 = vrot.lane.b32.xlu0 %v5895_v32, %s5432_s26  ;;  %v5911_v31 = vld [vmem:[#allocation2 + $0x3a] sm:$0xff]  ;;  %v5913_v32 = vld [vmem:[#allocation2 + $0x32] sm:$0xff] }
  0x86   : > { %8004 = vst [vmem:[#allocation13_spill] sm:$0xff] %v5911_v31  ;;  %8005 = vst [vmem:[#allocation14_spill] sm:$0xff] %v5913_v32 }
  0x89   : > { %785 = vrot.lane.b32.xlu1 %v720_v34, %s5433_s29  ;;  %783 = vrot.lane.b32.xlu0 %v719_v36, %s5433_s29  ;;  %v5919_v34 = vld [vmem:[#allocation2 + $0x52] sm:$0xff]  ;;  %v5921_v36 = vld [vmem:[#allocation2 + $0x4a] sm:$0xff] }
  0x8a   : > { %8006 = vst [vmem:[#allocation15_spill] sm:$0xff] %v5919_v34  ;;  %8007 = vst [vmem:[#allocation16_spill] sm:$0xff] %v5921_v36 }
  0x8d   : > { %789 = vrot.lane.b32.xlu1 %v5903_v46, %s5433_s29  ;;  %787 = vrot.lane.b32.xlu0 %v5905_v49, %s5433_s29  ;;  %v5927_v49 = vld [vmem:[#allocation2 + $0x6a] sm:$0xff]  ;;  %v5929_v46 = vld [vmem:[#allocation2 + $0x62] sm:$0xff] }
  0x8e   : > { %8008 = vst [vmem:[#allocation17_spill] sm:$0xff] %v5927_v49  ;;  %8009 = vst [vmem:[#allocation18_spill] sm:$0xff] %v5929_v46 }
  0x91   : > { %793 = vrot.lane.b32.xlu1 %v5911_v31, %s5433_s29  ;;  %791 = vrot.lane.b32.xlu0 %v5913_v32, %s5433_s29  ;;  %v5935_v32 = vld [vmem:[#allocation2 + $0x82] sm:$0xff]  ;;  %v5937_v31 = vld [vmem:[#allocation2 + $0x7a] sm:$0xff] }
  0x92   : > { %8010 = vst [vmem:[#allocation19_spill] sm:$0xff] %v5935_v32  ;;  %8011 = vst [vmem:[#allocation20_spill] sm:$0xff] %v5937_v31 }
  0x95   : > { %797 = vrot.lane.b32.xlu1 %v5919_v34, %s5433_s29  ;;  %795 = vrot.lane.b32.xlu0 %v5921_v36, %s5433_s29  ;;  %v5943_v36 = vld [vmem:[#allocation2 + $0x9a] sm:$0xff]  ;;  %v5945_v34 = vld [vmem:[#allocation2 + $0x92] sm:$0xff] }
  0x96   : > { %8012 = vst [vmem:[#allocation21_spill] sm:$0xff] %v5943_v36  ;;  %8013 = vst [vmem:[#allocation22_spill] sm:$0xff] %v5945_v34 }
  0x99   : > { %801 = vrot.lane.b32.xlu1 %v5927_v49, %s5433_s29  ;;  %799 = vrot.lane.b32.xlu0 %v5929_v46, %s5433_s29  ;;  %v5951_v46 = vld [vmem:[#allocation2 + $0xb2] sm:$0xff]  ;;  %v5953_v49 = vld [vmem:[#allocation2 + $0xaa] sm:$0xff] }
  0x9a   : > { %8014 = vst [vmem:[#allocation23_spill] sm:$0xff] %v5951_v46  ;;  %8015 = vst [vmem:[#allocation24_spill] sm:$0xff] %v5953_v49 }
  0x9d   : > { %805 = vrot.lane.b32.xlu1 %v5935_v32, %s5433_s29  ;;  %803 = vrot.lane.b32.xlu0 %v5937_v31, %s5433_s29  ;;  %v5959_v31 = vld [vmem:[#allocation2 + $0xca] sm:$0xff]  ;;  %v5961_v32 = vld [vmem:[#allocation2 + $0xc2] sm:$0xff] }
  0x9e   : > { %8016 = vst [vmem:[#allocation25_spill] sm:$0xff] %v5959_v31  ;;  %8017 = vst [vmem:[#allocation26_spill] sm:$0xff] %v5961_v32 }
  0xa1   : > { %809 = vrot.lane.b32.xlu1 %v5943_v36, %s5433_s29  ;;  %807 = vrot.lane.b32.xlu0 %v5945_v34, %s5433_s29  ;;  %v5967_v34 = vld [vmem:[#allocation2 + $0xe2] sm:$0xff]  ;;  %v5969_v36 = vld [vmem:[#allocation2 + $0xda] sm:$0xff] }
  0xa2   : > { %8018 = vst [vmem:[#allocation27_spill] sm:$0xff] %v5967_v34  ;;  %8019 = vst [vmem:[#allocation28_spill] sm:$0xff] %v5969_v36 }
  0xa5   : > { %813 = vrot.lane.b32.xlu1 %v5951_v46, %s5433_s29  ;;  %811 = vrot.lane.b32.xlu0 %v5953_v49, %s5433_s29  ;;  %v5975_v49 = vld [vmem:[#allocation2 + $0xfa] sm:$0xff]  ;;  %v5977_v46 = vld [vmem:[#allocation2 + $0xf2] sm:$0xff] }
  0xa6   : > { %8020 = vst [vmem:[#allocation29_spill] sm:$0xff] %v5975_v49  ;;  %8021 = vst [vmem:[#allocation30_spill] sm:$0xff] %v5977_v46 }
  0xa9   : > { %817 = vrot.lane.b32.xlu1 %v5959_v31, %s5433_s29  ;;  %815 = vrot.lane.b32.xlu0 %v5961_v32, %s5433_s29  ;;  %v5983_v32 = vld [vmem:[#allocation2 + $0x112] sm:$0xff]  ;;  %v5985_v31 = vld [vmem:[#allocation2 + $0x10a] sm:$0xff] }
  0xaa   : > { %8022 = vst [vmem:[#allocation31_spill] sm:$0xff] %v5983_v32  ;;  %8023 = vst [vmem:[#allocation32_spill] sm:$0xff] %v5985_v31 }
  0xad   : > { %821 = vrot.lane.b32.xlu1 %v5967_v34, %s5433_s29  ;;  %819 = vrot.lane.b32.xlu0 %v5969_v36, %s5433_s29  ;;  %v5991_v36 = vld [vmem:[#allocation2 + $0x12a] sm:$0xff]  ;;  %v5993_v34 = vld [vmem:[#allocation2 + $0x122] sm:$0xff] }
  0xae   : > { %8024 = vst [vmem:[#allocation33_spill] sm:$0xff] %v5991_v36  ;;  %8025 = vst [vmem:[#allocation34_spill] sm:$0xff] %v5993_v34 }
  0xb1   : > { %825 = vrot.lane.b32.xlu1 %v5975_v49, %s5433_s29  ;;  %823 = vrot.lane.b32.xlu0 %v5977_v46, %s5433_s29  ;;  %v5999_v46 = vld [vmem:[#allocation2 + $0x142] sm:$0xff]  ;;  %v6001_v49 = vld [vmem:[#allocation2 + $0x13a] sm:$0xff] }
  0xb2   : > { %8026 = vst [vmem:[#allocation35_spill] sm:$0xff] %v5999_v46  ;;  %8027 = vst [vmem:[#allocation36_spill] sm:$0xff] %v6001_v49 }
  0xb5   : > { %829 = vrot.lane.b32.xlu1 %v5983_v32, %s5433_s29  ;;  %827 = vrot.lane.b32.xlu0 %v5985_v31, %s5433_s29 }
  0xb9   : > { %833 = vrot.lane.b32.xlu1 %v5991_v36, %s5433_s29  ;;  %831 = vrot.lane.b32.xlu0 %v5993_v34, %s5433_s29  ;;  %v6009_v36 = vld [vmem:[#allocation2 + $0x15a] sm:$0xff]  ;;  %v6011_v34 = vld [vmem:[#allocation2 + $0x152] sm:$0xff] }
  0xbb   : > { %v595_v30 = vpop.permute.xlu1 %594  ;;  %v591_v32 = vpop.permute.xlu0 %590 }
  0xbc   : > { %689 = vst.msk [vmem:[#allocation3 + $0x20] sm:$0xff] %vm686_vm4, %v595_v30  ;;  %687 = vst.msk [vmem:[#allocation3] sm:$0xff] %vm686_vm4, %v591_v32  ;;  %v6019_v30 = vld [vmem:[#allocation2 + $0x172] sm:$0xff]  ;;  %v6021_v32 = vld [vmem:[#allocation2 + $0x16a] sm:$0xff] }
  0xbd   : > { %837 = vrot.lane.b32.xlu1 %v5999_v46, %s5433_s29  ;;  %835 = vrot.lane.b32.xlu0 %v6001_v49, %s5433_s29 }
  0xbf   : > { %v597_v31 = vpop.permute.xlu1 %596  ;;  %v593_v29 = vpop.permute.xlu0 %592 }
  0xc0   : > { %690 = vst.msk [vmem:[#allocation3 + $0x30] sm:$0xff] %vm686_vm4, %v597_v31  ;;  %688 = vst.msk [vmem:[#allocation3 + $0x10] sm:$0xff] %vm686_vm4, %v593_v29 }
  0xc1   : > { %841 = vrot.lane.b32.xlu1 %v6009_v36, %s5433_s29  ;;  %839 = vrot.lane.b32.xlu0 %v6011_v34, %s5433_s29 }
  0xc3   : > { %v601_v49 = vpop.permute.xlu1 %600  ;;  %v599_v46 = vpop.permute.xlu0 %598 }
  0xc4   : > { %692 = vst.msk [vmem:[#allocation3 + $0x50] sm:$0xff] %vm686_vm4, %v601_v49  ;;  %691 = vst.msk [vmem:[#allocation3 + $0x40] sm:$0xff] %vm686_vm4, %v599_v46 }
  0xc5   : > { %845 = vrot.lane.b32.xlu1 %v6019_v30, %s5433_s29  ;;  %843 = vrot.lane.b32.xlu0 %v6021_v32, %s5433_s29 }
  0xc7   : > { %v605_v29 = vpop.permute.xlu1 %604  ;;  %v603_v31 = vpop.permute.xlu0 %602 }
  0xc8   : > { %694 = vst.msk [vmem:[#allocation3 + $0x70] sm:$0xff] %vm686_vm4, %v605_v29  ;;  %693 = vst.msk [vmem:[#allocation3 + $0x60] sm:$0xff] %vm686_vm4, %v603_v31 }
  0xc9   : > { %979 = vrot.lane.b32.xlu1 %v5700_v47, %s5434_s30  ;;  %977 = vrot.lane.b32.xlu0 %v5695_v45, %s5434_s30 }
  0xcb   : > { %v609_v46 = vpop.permute.xlu1 %608  ;;  %v607_v49 = vpop.permute.xlu0 %606 }
  0xcc   : > { %696 = vst.msk [vmem:[#allocation3 + $0x90] sm:$0xff] %vm686_vm4, %v609_v46  ;;  %695 = vst.msk [vmem:[#allocation3 + $0x80] sm:$0xff] %vm686_vm4, %v607_v49 }
  0xcd   : > { %983 = vrot.lane.b32.xlu1 %v5713_v51, %s5434_s30  ;;  %981 = vrot.lane.b32.xlu0 %v5715_v52, %s5434_s30 }
  0xcf   : > { %v613_v45 = vpop.permute.xlu1 %612  ;;  %v611_v47 = vpop.permute.xlu0 %610 }
  0xd0   : > { %698 = vst.msk [vmem:[#allocation3 + $0xb0] sm:$0xff] %vm686_vm4, %v613_v45  ;;  %697 = vst.msk [vmem:[#allocation3 + $0xa0] sm:$0xff] %vm686_vm4, %v611_v47 }
  0xd1   : > { %987 = vrot.lane.b32.xlu1 %v5721_v53, %s5434_s30  ;;  %985 = vrot.lane.b32.xlu0 %v5723_v54, %s5434_s30 }
  0xd3   : > { %v617_v29 = vpop.permute.xlu1 %616  ;;  %v615_v31 = vpop.permute.xlu0 %614 }
  0xd4   : > { %700 = vst.msk [vmem:[#allocation3 + $0xd0] sm:$0xff] %vm686_vm4, %v617_v29  ;;  %699 = vst.msk [vmem:[#allocation3 + $0xc0] sm:$0xff] %vm686_vm4, %v615_v31 }
  0xd5   : > { %991 = vrot.lane.b32.xlu1 %v5733_v57, %s5434_s30  ;;  %989 = vrot.lane.b32.xlu0 %v5735_v58, %s5434_s30 }
  0xd7   : > { %v621_v46 = vpop.permute.xlu1 %620  ;;  %v619_v49 = vpop.permute.xlu0 %618 }
  0xd8   : > { %702 = vst.msk [vmem:[#allocation3 + $0xf0] sm:$0xff] %vm686_vm4, %v621_v46  ;;  %701 = vst.msk [vmem:[#allocation3 + $0xe0] sm:$0xff] %vm686_vm4, %v619_v49 }
  0xd9   : > { %995 = vrot.lane.b32.xlu1 %v5737_v59, %s5434_s30  ;;  %993 = vrot.lane.b32.xlu0 %v5749_v60, %s5434_s30 }
  0xdb   : > { %v625_v45 = vpop.permute.xlu1 %624  ;;  %v623_v47 = vpop.permute.xlu0 %622 }
  0xdc   : > { %704 = vst.msk [vmem:[#allocation3 + $0x110] sm:$0xff] %vm686_vm4, %v625_v45  ;;  %703 = vst.msk [vmem:[#allocation3 + $0x100] sm:$0xff] %vm686_vm4, %v623_v47 }
  0xdd   : > { %999 = vrot.lane.b32.xlu1 %v5751_v61, %s5434_s30  ;;  %997 = vrot.lane.b32.xlu0 %v5753_v62, %s5434_s30 }
  0xdf   : > { %v629_v29 = vpop.permute.xlu1 %628  ;;  %v627_v31 = vpop.permute.xlu0 %626 }
  0xe0   : > { %706 = vst.msk [vmem:[#allocation3 + $0x130] sm:$0xff] %vm686_vm4, %v629_v29  ;;  %705 = vst.msk [vmem:[#allocation3 + $0x120] sm:$0xff] %vm686_vm4, %v627_v31 }
  0xe1   : > { %1003 = vrot.lane.b32.xlu1 %v5761_v63, %s5434_s30  ;;  %1001 = vrot.lane.b32.xlu0 %v5763_v0, %s5434_s30 }
  0xe3   : > { %v633_v46 = vpop.permute.xlu1 %632  ;;  %v631_v49 = vpop.permute.xlu0 %630 }
  0xe4   : > { %708 = vst.msk [vmem:[#allocation3 + $0x150] sm:$0xff] %vm686_vm4, %v633_v46  ;;  %707 = vst.msk [vmem:[#allocation3 + $0x140] sm:$0xff] %vm686_vm4, %v631_v49 }
  0xe5   : > { %1007 = vrot.lane.b32.xlu1 %v5765_v1, %s5434_s30  ;;  %1005 = vrot.lane.b32.xlu0 %v5773_v2, %s5434_s30 }
  0xe7   : > { %v637_v45 = vpop.permute.xlu1 %636  ;;  %v635_v47 = vpop.permute.xlu0 %634 }
  0xe8   : > { %710 = vst.msk [vmem:[#allocation3 + $0x170] sm:$0xff] %vm686_vm4, %v637_v45  ;;  %709 = vst.msk [vmem:[#allocation3 + $0x160] sm:$0xff] %vm686_vm4, %v635_v47 }
  0xe9   : > { %1011 = vrot.lane.b32.xlu1 %v5775_v3, %s5434_s30  ;;  %1009 = vrot.lane.b32.xlu0 %v5777_v4, %s5434_s30 }
  0xeb   : > { %v641_v29 = vpop.permute.xlu1 %640  ;;  %v639_v31 = vpop.permute.xlu0 %638 }
  0xec   : > { %712 = vst.msk [vmem:[#allocation3 + $0x190] sm:$0xff] %vm686_vm4, %v641_v29  ;;  %711 = vst.msk [vmem:[#allocation3 + $0x180] sm:$0xff] %vm686_vm4, %v639_v31 }
  0xed   : > { %1015 = vrot.lane.b32.xlu1 %v5785_v5, %s5434_s30  ;;  %1013 = vrot.lane.b32.xlu0 %v5787_v6, %s5434_s30 }
  0xef   : > { %v645_v46 = vpop.permute.xlu1 %644  ;;  %v643_v49 = vpop.permute.xlu0 %642 }
  0xf0   : > { %714 = vst.msk [vmem:[#allocation3 + $0x1b0] sm:$0xff] %vm686_vm4, %v645_v46  ;;  %713 = vst.msk [vmem:[#allocation3 + $0x1a0] sm:$0xff] %vm686_vm4, %v643_v49 }
  0xf1   : > { %1019 = vrot.lane.b32.xlu1 %v5803_v10, %s5434_s30  ;;  %1017 = vrot.lane.b32.xlu0 %v5801_v9, %s5434_s30 }
  0xf3   : > { %v649_v45 = vpop.permute.xlu1 %648  ;;  %v647_v47 = vpop.permute.xlu0 %646 }
  0xf4   : > { %716 = vst.msk [vmem:[#allocation3 + $0x1d0] sm:$0xff] %vm686_vm4, %v649_v45  ;;  %715 = vst.msk [vmem:[#allocation3 + $0x1c0] sm:$0xff] %vm686_vm4, %v647_v47 }
  0xf5   : > { %1023 = vrot.lane.b32.xlu1 %v5819_v14, %s5434_s30  ;;  %1021 = vrot.lane.b32.xlu0 %v5817_v13, %s5434_s30 }
  0xf7   : > { %v653_v29 = vpop.permute.xlu1 %652  ;;  %v651_v31 = vpop.permute.xlu0 %650 }
  0xf8   : > { %718 = vst.msk [vmem:[#allocation3 + $0x1f0] sm:$0xff] %vm686_vm4, %v653_v29  ;;  %717 = vst.msk [vmem:[#allocation3 + $0x1e0] sm:$0xff] %vm686_vm4, %v651_v31  ;;  %v6123_v29 = vld [vmem:[#allocation2 + $0x188] sm:$0xff]  ;;  %v6125_v31 = vld [vmem:[#allocation2 + $0x180] sm:$0xff]  ;;  %vm4259_vm4 = vcmask 588800  }
  0xf9   : > { %1027 = vrot.lane.b32.xlu1 %v5835_v18, %s5434_s30  ;;  %1025 = vrot.lane.b32.xlu0 %v5833_v17, %s5434_s30  ;;  %8028 = vst [vmem:[#allocation37_spill] sm:$0xff] %v6123_v29  ;;  %8029 = vst [vmem:[#allocation38_spill] sm:$0xff] %v6125_v31 }
  0xfb   : > { %v786_v46 = vpop.permute.xlu1 %785  ;;  %v784_v49 = vpop.permute.xlu0 %783 }
  0xfc   : > { %881 = vst.msk [vmem:[#allocation3 + $0x10] sm:$0xff] %vm879_vm6, %v786_v46  ;;  %880 = vst.msk [vmem:[#allocation3] sm:$0xff] %vm879_vm6, %v784_v49 }
  0xfd   : > { %1031 = vrot.lane.b32.xlu1 %v5851_v22, %s5434_s30  ;;  %1029 = vrot.lane.b32.xlu0 %v5849_v21, %s5434_s30  ;;  %v6127_v22 = vld [vmem:[#allocation2 + $0x189] sm:$0xff] }
  0xff   : > { %v790_v45 = vpop.permute.xlu1 %789  ;;  %v788_v47 = vpop.permute.xlu0 %787 }
 0x100   : > { %883 = vst.msk [vmem:[#allocation3 + $0x30] sm:$0xff] %vm879_vm6, %v790_v45  ;;  %882 = vst.msk [vmem:[#allocation3 + $0x20] sm:$0xff] %vm879_vm6, %v788_v47  ;;  %v6131_v45 = vld [vmem:[#allocation2 + $0x181] sm:$0xff]  ;;  %v6133_v47 = vld [vmem:[#allocation2 + $0x18a] sm:$0xff] }
 0x101   : > { %1035 = vrot.lane.b32.xlu1 %v5867_v26, %s5434_s30  ;;  %1033 = vrot.lane.b32.xlu0 %v5865_v25, %s5434_s30  ;;  %v6135_v26 = vld [vmem:[#allocation2 + $0x182] sm:$0xff]  ;;  %1940 = vst.msk [vmem:[#allocation3 + $0x1d8] sm:$0xff] %vm493_vm3, %v6133_v47 }
 0x102   : > { %2609 = vst.msk [vmem:[#allocation2 + $0x189] sm:$0xff] %vm2577_vm5, %v6127_v22  ;;  %2608 = vst.msk [vmem:[#allocation2 + $0x181] sm:$0xff] %vm2577_vm5, %v6131_v45 }
 0x103   : > { %v794_v46 = vpop.permute.xlu1 %793  ;;  %v792_v49 = vpop.permute.xlu0 %791  ;;  %1939 = vst.msk [vmem:[#allocation3 + $0x1c8] sm:$0xff] %vm493_vm3, %v6135_v26 }
 0x104   : > { %885 = vst.msk [vmem:[#allocation3 + $0x50] sm:$0xff] %vm879_vm6, %v794_v46  ;;  %884 = vst.msk [vmem:[#allocation3 + $0x40] sm:$0xff] %vm879_vm6, %v792_v49 }
 0x105   : > { %1039 = vrot.lane.b32.xlu1 %v6123_v29, %s5434_s30  ;;  %1037 = vrot.lane.b32.xlu0 %v6125_v31, %s5434_s30 }
 0x107   : > { %v798_v46 = vpop.permute.xlu1 %797  ;;  %v796_v49 = vpop.permute.xlu0 %795 }
 0x108   : > { %887 = vst.msk [vmem:[#allocation3 + $0x70] sm:$0xff] %vm879_vm6, %v798_v46  ;;  %886 = vst.msk [vmem:[#allocation3 + $0x60] sm:$0xff] %vm879_vm6, %v796_v49 }
 0x109   : > { %1172 = vrot.lane.b32.xlu1 %v5662_v35, %s5435_s6  ;;  %1170 = vrot.lane.b32.xlu0 %v5657_v33, %s5435_s6 }
 0x10b   : > { %v802_v31 = vpop.permute.xlu1 %801  ;;  %v800_v29 = vpop.permute.xlu0 %799 }
 0x10c   : > { %889 = vst.msk [vmem:[#allocation3 + $0x90] sm:$0xff] %vm879_vm6, %v802_v31  ;;  %888 = vst.msk [vmem:[#allocation3 + $0x80] sm:$0xff] %vm879_vm6, %v800_v29 }
 0x10d   : > { %1176 = vrot.lane.b32.xlu1 %v5667_v37, %s5435_s6  ;;  %1174 = vrot.lane.b32.xlu0 %v5669_v38, %s5435_s6 }
 0x10f   : > { %v806_v46 = vpop.permute.xlu1 %805  ;;  %v804_v49 = vpop.permute.xlu0 %803 }
 0x110   : > { %891 = vst.msk [vmem:[#allocation3 + $0xb0] sm:$0xff] %vm879_vm6, %v806_v46  ;;  %890 = vst.msk [vmem:[#allocation3 + $0xa0] sm:$0xff] %vm879_vm6, %v804_v49 }
 0x111   : > { %1180 = vrot.lane.b32.xlu1 %v5675_v39, %s5435_s6  ;;  %1178 = vrot.lane.b32.xlu0 %v5677_v40, %s5435_s6 }
 0x113   : > { %v810_v33 = vpop.permute.xlu1 %809  ;;  %v808_v35 = vpop.permute.xlu0 %807 }
 0x114   : > { %893 = vst.msk [vmem:[#allocation3 + $0xd0] sm:$0xff] %vm879_vm6, %v810_v33  ;;  %892 = vst.msk [vmem:[#allocation3 + $0xc0] sm:$0xff] %vm879_vm6, %v808_v35 }
 0x115   : > { %1184 = vrot.lane.b32.xlu1 %v5683_v41, %s5435_s6  ;;  %1182 = vrot.lane.b32.xlu0 %v5685_v42, %s5435_s6 }
 0x117   : > { %v814_v37 = vpop.permute.xlu1 %813  ;;  %v812_v38 = vpop.permute.xlu0 %811 }
 0x118   : > { %895 = vst.msk [vmem:[#allocation3 + $0xf0] sm:$0xff] %vm879_vm6, %v814_v37  ;;  %894 = vst.msk [vmem:[#allocation3 + $0xe0] sm:$0xff] %vm879_vm6, %v812_v38  ;;  %v8034_v37 = vld [vmem:[#allocation11_spill] sm:$0xff]  ;;  %v8035_v38 = vld [vmem:[#allocation12_spill] sm:$0xff] }
 0x119   : > { %1188 = vrot.lane.b32.xlu1 %v5691_v43, %s5435_s6  ;;  %1186 = vrot.lane.b32.xlu0 %v5693_v44, %s5435_s6 }
 0x11b   : > { %v818_v39 = vpop.permute.xlu1 %817  ;;  %v816_v40 = vpop.permute.xlu0 %815 }
 0x11c   : > { %897 = vst.msk [vmem:[#allocation3 + $0x110] sm:$0xff] %vm879_vm6, %v818_v39  ;;  %896 = vst.msk [vmem:[#allocation3 + $0x100] sm:$0xff] %vm879_vm6, %v816_v40 }
 0x11d   : > { %1192 = vrot.lane.b32.xlu1 %v5706_v48, %s5435_s6  ;;  %1190 = vrot.lane.b32.xlu0 %v5710_v50, %s5435_s6 }
 0x11f   : > { %v822_v41 = vpop.permute.xlu1 %821  ;;  %v820_v42 = vpop.permute.xlu0 %819 }
 0x120   : > { %899 = vst.msk [vmem:[#allocation3 + $0x130] sm:$0xff] %vm879_vm6, %v822_v41  ;;  %898 = vst.msk [vmem:[#allocation3 + $0x120] sm:$0xff] %vm879_vm6, %v820_v42  ;;  %v8036_v41 = vld [vmem:[#allocation13_spill] sm:$0xff]  ;;  %v8037_v42 = vld [vmem:[#allocation14_spill] sm:$0xff] }
 0x121   : > { %1196 = vrot.lane.b32.xlu1 %v5725_v55, %s5435_s6  ;;  %1194 = vrot.lane.b32.xlu0 %v5727_v56, %s5435_s6 }
 0x123   : > { %v826_v43 = vpop.permute.xlu1 %825  ;;  %v824_v44 = vpop.permute.xlu0 %823 }
 0x124   : > { %901 = vst.msk [vmem:[#allocation3 + $0x150] sm:$0xff] %vm879_vm6, %v826_v43  ;;  %900 = vst.msk [vmem:[#allocation3 + $0x140] sm:$0xff] %vm879_vm6, %v824_v44 }
 0x125   : > { %1200 = vrot.lane.b32.xlu1 %v5797_v7, %s5435_s6  ;;  %1198 = vrot.lane.b32.xlu0 %v5799_v8, %s5435_s6 }
 0x127   : > { %v830_v48 = vpop.permute.xlu1 %829  ;;  %v828_v50 = vpop.permute.xlu0 %827 }
 0x128   : > { %903 = vst.msk [vmem:[#allocation3 + $0x170] sm:$0xff] %vm879_vm6, %v830_v48  ;;  %902 = vst.msk [vmem:[#allocation3 + $0x160] sm:$0xff] %vm879_vm6, %v828_v50  ;;  %v8038_v48 = vld [vmem:[#allocation15_spill] sm:$0xff]  ;;  %v8039_v50 = vld [vmem:[#allocation16_spill] sm:$0xff] }
 0x129   : > { %1204 = vrot.lane.b32.xlu1 %v5813_v11, %s5435_s6  ;;  %1202 = vrot.lane.b32.xlu0 %v5815_v12, %s5435_s6 }
 0x12b   : > { %v834_v55 = vpop.permute.xlu1 %833  ;;  %v832_v56 = vpop.permute.xlu0 %831 }
 0x12c   : > { %905 = vst.msk [vmem:[#allocation3 + $0x190] sm:$0xff] %vm879_vm6, %v834_v55  ;;  %904 = vst.msk [vmem:[#allocation3 + $0x180] sm:$0xff] %vm879_vm6, %v832_v56 }
 0x12d   : > { %1208 = vrot.lane.b32.xlu1 %v5829_v15, %s5435_s6  ;;  %1206 = vrot.lane.b32.xlu0 %v5831_v16, %s5435_s6 }
 0x12f   : > { %v838_v7 = vpop.permute.xlu1 %837  ;;  %v836_v8 = vpop.permute.xlu0 %835 }
 0x130   : > { %907 = vst.msk [vmem:[#allocation3 + $0x1b0] sm:$0xff] %vm879_vm6, %v838_v7  ;;  %906 = vst.msk [vmem:[#allocation3 + $0x1a0] sm:$0xff] %vm879_vm6, %v836_v8  ;;  %v8040_v7 = vld [vmem:[#allocation17_spill] sm:$0xff]  ;;  %v8041_v8 = vld [vmem:[#allocation18_spill] sm:$0xff] }
 0x131   : > { %1212 = vrot.lane.b32.xlu1 %v5845_v19, %s5435_s6  ;;  %1210 = vrot.lane.b32.xlu0 %v5847_v20, %s5435_s6 }
 0x133   : > { %v842_v11 = vpop.permute.xlu1 %841  ;;  %v840_v12 = vpop.permute.xlu0 %839 }
 0x134   : > { %909 = vst.msk [vmem:[#allocation3 + $0x1d0] sm:$0xff] %vm879_vm6, %v842_v11  ;;  %908 = vst.msk [vmem:[#allocation3 + $0x1c0] sm:$0xff] %vm879_vm6, %v840_v12 }
 0x135   : > { %1216 = vrot.lane.b32.xlu1 %v5861_v23, %s5435_s6  ;;  %1214 = vrot.lane.b32.xlu0 %v5863_v24, %s5435_s6  ;;  %v8030_v23 = vld [vmem:[#allocation7_spill] sm:$0xff]  ;;  %v8031_v24 = vld [vmem:[#allocation8_spill] sm:$0xff] }
 0x137   : > { %v846_v15 = vpop.permute.xlu1 %845  ;;  %v844_v16 = vpop.permute.xlu0 %843 }
 0x138   : > { %911 = vst.msk [vmem:[#allocation3 + $0x1f0] sm:$0xff] %vm879_vm6, %v846_v15  ;;  %910 = vst.msk [vmem:[#allocation3 + $0x1e0] sm:$0xff] %vm879_vm6, %v844_v16  ;;  %v8042_v15 = vld [vmem:[#allocation19_spill] sm:$0xff]  ;;  %v8043_v16 = vld [vmem:[#allocation20_spill] sm:$0xff] }
 0x139   : > { %1220 = vrot.lane.b32.xlu1 %v5877_v27, %s5435_s6  ;;  %1218 = vrot.lane.b32.xlu0 %v5879_v28, %s5435_s6  ;;  %v8032_v27 = vld [vmem:[#allocation9_spill] sm:$0xff]  ;;  %v8033_v28 = vld [vmem:[#allocation10_spill] sm:$0xff] }
 0x13b   : > { %v980_v19 = vpop.permute.xlu1 %979  ;;  %v978_v20 = vpop.permute.xlu0 %977 }
 0x13c   : > { %1075 = vst.msk [vmem:[#allocation3 + $0x10] sm:$0xff] %vm1073_vm7, %v980_v19  ;;  %1074 = vst.msk [vmem:[#allocation3] sm:$0xff] %vm1073_vm7, %v978_v20 }
 0x13d   : > { %1224 = vrot.lane.b32.xlu1 %v8030_v23, %s5435_s6  ;;  %1222 = vrot.lane.b32.xlu0 %v8031_v24, %s5435_s6  ;;  %v8044_v23 = vld [vmem:[#allocation21_spill] sm:$0xff]  ;;  %v8045_v24 = vld [vmem:[#allocation22_spill] sm:$0xff] }
 0x13f   : > { %v984_v29 = vpop.permute.xlu1 %983  ;;  %v982_v31 = vpop.permute.xlu0 %981 }
 0x140   : > { %1077 = vst.msk [vmem:[#allocation3 + $0x30] sm:$0xff] %vm1073_vm7, %v984_v29  ;;  %1076 = vst.msk [vmem:[#allocation3 + $0x20] sm:$0xff] %vm1073_vm7, %v982_v31 }
 0x141   : > { %1228 = vrot.lane.b32.xlu1 %v8032_v27, %s5435_s6  ;;  %1226 = vrot.lane.b32.xlu0 %v8033_v28, %s5435_s6  ;;  %v8046_v27 = vld [vmem:[#allocation23_spill] sm:$0xff]  ;;  %v8047_v28 = vld [vmem:[#allocation24_spill] sm:$0xff] }
 0x143   : > { %v988_v46 = vpop.permute.xlu1 %987  ;;  %v986_v49 = vpop.permute.xlu0 %985 }
 0x144   : > { %1079 = vst.msk [vmem:[#allocation3 + $0x50] sm:$0xff] %vm1073_vm7, %v988_v46  ;;  %1078 = vst.msk [vmem:[#allocation3 + $0x40] sm:$0xff] %vm1073_vm7, %v986_v49 }
 0x145   : > { %1232 = vrot.lane.b32.xlu1 %v6127_v22, %s5435_s6  ;;  %1230 = vrot.lane.b32.xlu0 %v6131_v45, %s5435_s6 }
 0x147   : > { %v992_v33 = vpop.permute.xlu1 %991  ;;  %v990_v35 = vpop.permute.xlu0 %989 }
 0x148   : > { %1081 = vst.msk [vmem:[#allocation3 + $0x70] sm:$0xff] %vm1073_vm7, %v992_v33  ;;  %1080 = vst.msk [vmem:[#allocation3 + $0x60] sm:$0xff] %vm1073_vm7, %v990_v35  ;;  %v8048_v33 = vld [vmem:[#allocation25_spill] sm:$0xff]  ;;  %v8049_v35 = vld [vmem:[#allocation26_spill] sm:$0xff] }
 0x149   : > { %1365 = vrot.lane.b32.xlu1 %v8034_v37, %s5436_s7  ;;  %1363 = vrot.lane.b32.xlu0 %v8035_v38, %s5436_s7 }
 0x14b   : > { %v996_v39 = vpop.permute.xlu1 %995  ;;  %v994_v40 = vpop.permute.xlu0 %993 }
 0x14c   : > { %1083 = vst.msk [vmem:[#allocation3 + $0x90] sm:$0xff] %vm1073_vm7, %v996_v39  ;;  %1082 = vst.msk [vmem:[#allocation3 + $0x80] sm:$0xff] %vm1073_vm7, %v994_v40  ;;  %v8050_v39 = vld [vmem:[#allocation27_spill] sm:$0xff]  ;;  %v8051_v40 = vld [vmem:[#allocation28_spill] sm:$0xff] }
 0x14d   : > { %1369 = vrot.lane.b32.xlu1 %v8036_v41, %s5436_s7  ;;  %1367 = vrot.lane.b32.xlu0 %v8037_v42, %s5436_s7 }
 0x14f   : > { %v1000_v43 = vpop.permute.xlu1 %999  ;;  %v998_v44 = vpop.permute.xlu0 %997 }
 0x150   : > { %1085 = vst.msk [vmem:[#allocation3 + $0xb0] sm:$0xff] %vm1073_vm7, %v1000_v43  ;;  %1084 = vst.msk [vmem:[#allocation3 + $0xa0] sm:$0xff] %vm1073_vm7, %v998_v44  ;;  %v8052_v43 = vld [vmem:[#allocation29_spill] sm:$0xff]  ;;  %v8053_v44 = vld [vmem:[#allocation30_spill] sm:$0xff] }
 0x151   : > { %1373 = vrot.lane.b32.xlu1 %v8038_v48, %s5436_s7  ;;  %1371 = vrot.lane.b32.xlu0 %v8039_v50, %s5436_s7 }
 0x153   : > { %v1004_v55 = vpop.permute.xlu1 %1003  ;;  %v1002_v56 = vpop.permute.xlu0 %1001 }
 0x154   : > { %1087 = vst.msk [vmem:[#allocation3 + $0xd0] sm:$0xff] %vm1073_vm7, %v1004_v55  ;;  %1086 = vst.msk [vmem:[#allocation3 + $0xc0] sm:$0xff] %vm1073_vm7, %v1002_v56  ;;  %v8054_v55 = vld [vmem:[#allocation31_spill] sm:$0xff]  ;;  %v8055_v56 = vld [vmem:[#allocation32_spill] sm:$0xff] }
 0x155   : > { %1377 = vrot.lane.b32.xlu1 %v8040_v7, %s5436_s7  ;;  %1375 = vrot.lane.b32.xlu0 %v8041_v8, %s5436_s7 }
 0x157   : > { %v1008_v11 = vpop.permute.xlu1 %1007  ;;  %v1006_v12 = vpop.permute.xlu0 %1005 }
 0x158   : > { %1089 = vst.msk [vmem:[#allocation3 + $0xf0] sm:$0xff] %vm1073_vm7, %v1008_v11  ;;  %1088 = vst.msk [vmem:[#allocation3 + $0xe0] sm:$0xff] %vm1073_vm7, %v1006_v12  ;;  %v8056_v11 = vld [vmem:[#allocation33_spill] sm:$0xff]  ;;  %v8057_v12 = vld [vmem:[#allocation34_spill] sm:$0xff] }
 0x159   : > { %1381 = vrot.lane.b32.xlu1 %v8042_v15, %s5436_s7  ;;  %1379 = vrot.lane.b32.xlu0 %v8043_v16, %s5436_s7 }
 0x15b   : > { %v1012_v19 = vpop.permute.xlu1 %1011  ;;  %v1010_v20 = vpop.permute.xlu0 %1009 }
 0x15c   : > { %1091 = vst.msk [vmem:[#allocation3 + $0x110] sm:$0xff] %vm1073_vm7, %v1012_v19  ;;  %1090 = vst.msk [vmem:[#allocation3 + $0x100] sm:$0xff] %vm1073_vm7, %v1010_v20  ;;  %v8058_v19 = vld [vmem:[#allocation35_spill] sm:$0xff]  ;;  %v8059_v20 = vld [vmem:[#allocation36_spill] sm:$0xff] }
 0x15d   : > { %1385 = vrot.lane.b32.xlu1 %v8044_v23, %s5436_s7  ;;  %1383 = vrot.lane.b32.xlu0 %v8045_v24, %s5436_s7 }
 0x15f   : > { %v1016_v29 = vpop.permute.xlu1 %1015  ;;  %v1014_v31 = vpop.permute.xlu0 %1013 }
 0x160   : > { %1093 = vst.msk [vmem:[#allocation3 + $0x130] sm:$0xff] %vm1073_vm7, %v1016_v29  ;;  %1092 = vst.msk [vmem:[#allocation3 + $0x120] sm:$0xff] %vm1073_vm7, %v1014_v31 }
 0x161   : > { %1389 = vrot.lane.b32.xlu1 %v8046_v27, %s5436_s7  ;;  %1387 = vrot.lane.b32.xlu0 %v8047_v28, %s5436_s7 }
 0x163   : > { %v1020_v46 = vpop.permute.xlu1 %1019  ;;  %v1018_v49 = vpop.permute.xlu0 %1017 }
 0x164   : > { %1095 = vst.msk [vmem:[#allocation3 + $0x150] sm:$0xff] %vm1073_vm7, %v1020_v46  ;;  %1094 = vst.msk [vmem:[#allocation3 + $0x140] sm:$0xff] %vm1073_vm7, %v1018_v49  ;;  %v1880_v46 = vld [vmem:[#allocation2 + $0x3a] sm:$0xff] }
 0x165   : > { %1393 = vrot.lane.b32.xlu1 %v8048_v33, %s5436_s7  ;;  %1391 = vrot.lane.b32.xlu0 %v8049_v35, %s5436_s7  ;;  %1912 = vst.msk [vmem:[#allocation3 + $0x18] sm:$0xff] %vm493_vm3, %v1880_v46  ;;  %v6365_v33 = vld [vmem:[#allocation2 + $0x51] sm:$0xff] }
 0x166   : > { %v1882_v35 = vld [vmem:[#allocation2 + $0x52] sm:$0xff] }
 0x167   : > { %v1024_v37 = vpop.permute.xlu1 %1023  ;;  %v1022_v38 = vpop.permute.xlu0 %1021  ;;  %1914 = vst.msk [vmem:[#allocation3 + $0x38] sm:$0xff] %vm493_vm3, %v1882_v35  ;;  %v6481_v46 = vld [vmem:[#allocation2 + $0xf1] sm:$0xff]  ;;  %v1896_v35 = vld [vmem:[#allocation2 + $0xfa] sm:$0xff] }
 0x168   : > { %1097 = vst.msk [vmem:[#allocation3 + $0x170] sm:$0xff] %vm1073_vm7, %v1024_v37  ;;  %1096 = vst.msk [vmem:[#allocation3 + $0x160] sm:$0xff] %vm1073_vm7, %v1022_v38 }
 0x169   : > { %1397 = vrot.lane.b32.xlu1 %v8050_v39, %s5436_s7  ;;  %1395 = vrot.lane.b32.xlu0 %v8051_v40, %s5436_s7  ;;  %v6373_v39 = vld [vmem:[#allocation2 + $0x69] sm:$0xff]  ;;  %1928 = vst.msk [vmem:[#allocation3 + $0x118] sm:$0xff] %vm493_vm3, %v1896_v35 }
 0x16a   : > { %v1884_v40 = vld [vmem:[#allocation2 + $0x6a] sm:$0xff] }
 0x16b   : > { %v1028_v41 = vpop.permute.xlu1 %1027  ;;  %v1026_v42 = vpop.permute.xlu0 %1025  ;;  %1916 = vst.msk [vmem:[#allocation3 + $0x58] sm:$0xff] %vm493_vm3, %v1884_v40  ;;  %v6509_v40 = vld [vmem:[#allocation2 + $0x111] sm:$0xff] }
 0x16c   : > { %1099 = vst.msk [vmem:[#allocation3 + $0x190] sm:$0xff] %vm1073_vm7, %v1028_v41  ;;  %1098 = vst.msk [vmem:[#allocation3 + $0x180] sm:$0xff] %vm1073_vm7, %v1026_v42  ;;  %v8062_v35 = vld [vmem:[#allocation37_spill] sm:$0xff] }
 0x16d   : > { %1401 = vrot.lane.b32.xlu1 %v8052_v43, %s5436_s7  ;;  %1399 = vrot.lane.b32.xlu0 %v8053_v44, %s5436_s7  ;;  %v6389_v43 = vld [vmem:[#allocation2 + $0x81] sm:$0xff] }
 0x16e   : > { %v1886_v44 = vld [vmem:[#allocation2 + $0x82] sm:$0xff] }
 0x16f   : > { %v1032_v48 = vpop.permute.xlu1 %1031  ;;  %v1030_v50 = vpop.permute.xlu0 %1029  ;;  %1918 = vst.msk [vmem:[#allocation3 + $0x78] sm:$0xff] %vm493_vm3, %v1886_v44  ;;  %v1899_v44 = vld [vmem:[#allocation2 + $0x122] sm:$0xff] }
 0x170   : > { %1101 = vst.msk [vmem:[#allocation3 + $0x1b0] sm:$0xff] %vm1073_vm7, %v1032_v48  ;;  %1100 = vst.msk [vmem:[#allocation3 + $0x1a0] sm:$0xff] %vm1073_vm7, %v1030_v50 }
 0x171   : > { %1405 = vrot.lane.b32.xlu1 %v8054_v55, %s5436_s7  ;;  %1403 = vrot.lane.b32.xlu0 %v8055_v56, %s5436_s7  ;;  %v1887_v55 = vld [vmem:[#allocation2 + $0x92] sm:$0xff]  ;;  %v1888_v56 = vld [vmem:[#allocation2 + $0x9a] sm:$0xff]  ;;  %1931 = vst.msk [vmem:[#allocation3 + $0x148] sm:$0xff] %vm493_vm3, %v1899_v44 }
 0x172   : > { %1919 = vst.msk [vmem:[#allocation3 + $0x88] sm:$0xff] %vm493_vm3, %v1887_v55  ;;  %1920 = vst.msk [vmem:[#allocation3 + $0x98] sm:$0xff] %vm493_vm3, %v1888_v56  ;;  %v1900_v55 = vld [vmem:[#allocation2 + $0x12a] sm:$0xff] }
 0x173   : > { %v1036_v7 = vpop.permute.xlu1 %1035  ;;  %v1034_v8 = vpop.permute.xlu0 %1033  ;;  %1932 = vst.msk [vmem:[#allocation3 + $0x158] sm:$0xff] %vm493_vm3, %v1900_v55  ;;  %v2007_v55 = vld [vmem:[%s5525_s12] sm:$0xff] }
 0x174   : > { %1103 = vst.msk [vmem:[#allocation3 + $0x1d0] sm:$0xff] %vm1073_vm7, %v1036_v7  ;;  %1102 = vst.msk [vmem:[#allocation3 + $0x1c0] sm:$0xff] %vm1073_vm7, %v1034_v8 }
 0x175   : > { %1409 = vrot.lane.b32.xlu1 %v8056_v11, %s5436_s7  ;;  %1407 = vrot.lane.b32.xlu0 %v8057_v12, %s5436_s7  ;;  %v6429_v11 = vld [vmem:[#allocation2 + $0xb1] sm:$0xff] }
 0x176   : > { %v1890_v12 = vld [vmem:[#allocation2 + $0xb2] sm:$0xff] }
 0x177   : > { %v1040_v15 = vpop.permute.xlu1 %1039  ;;  %v1038_v16 = vpop.permute.xlu0 %1037  ;;  %1922 = vst.msk [vmem:[#allocation3 + $0xb8] sm:$0xff] %vm493_vm3, %v1890_v12  ;;  %v1902_v12 = vld [vmem:[#allocation2 + $0x142] sm:$0xff] }
 0x178   : > { %1105 = vst.msk [vmem:[#allocation3 + $0x1f0] sm:$0xff] %vm1073_vm7, %v1040_v15  ;;  %1104 = vst.msk [vmem:[#allocation3 + $0x1e0] sm:$0xff] %vm1073_vm7, %v1038_v16 }
 0x179   : > { %1413 = vrot.lane.b32.xlu1 %v8058_v19, %s5436_s7  ;;  %1411 = vrot.lane.b32.xlu0 %v8059_v20, %s5436_s7  ;;  %v2022_v19 = vld [vmem:[%s5525_s12 + $0x78] sm:$0xff]  ;;  %v1891_v20 = vld [vmem:[#allocation2 + $0xc2] sm:$0xff]  ;;  %1934 = vst.msk [vmem:[#allocation3 + $0x178] sm:$0xff] %vm493_vm3, %v1902_v12 }
 0x17a   : > { %1923 = vst.msk [vmem:[#allocation3 + $0xc8] sm:$0xff] %vm493_vm3, %v1891_v20  ;;  %v8060_v20 = vld [vmem:[#allocation5_spill] sm:$0xff] }
 0x17b   : > { %v1173_v23 = vpop.permute.xlu1 %1172  ;;  %v1171_v24 = vpop.permute.xlu0 %1170 }
 0x17c   : > { %1268 = vst.msk [vmem:[#allocation3 + $0x10] sm:$0xff] %vm1266_vm8, %v1173_v23  ;;  %1267 = vst.msk [vmem:[#allocation3] sm:$0xff] %vm1266_vm8, %v1171_v24  ;;  %v6448_v23 = vld [vmem:[#allocation2 + $0xc9] sm:$0xff] }
 0x17d   : > { %1417 = vrot.lane.b32.xlu1 %v6009_v36, %s5436_s7  ;;  %1415 = vrot.lane.b32.xlu0 %v6011_v34, %s5436_s7  ;;  %v2021_v24 = vld [vmem:[%s5525_s12 + $0x70] sm:$0xff] }
 0x17f   : > { %v1177_v29 = vpop.permute.xlu1 %1176  ;;  %v1175_v31 = vpop.permute.xlu0 %1174 }
 0x180   : > { %1270 = vst.msk [vmem:[#allocation3 + $0x30] sm:$0xff] %vm1266_vm8, %v1177_v29  ;;  %1269 = vst.msk [vmem:[#allocation3 + $0x20] sm:$0xff] %vm1266_vm8, %v1175_v31  ;;  %v1892_v29 = vld [vmem:[#allocation2 + $0xca] sm:$0xff] }
 0x181   : > { %1421 = vrot.lane.b32.xlu1 %v6019_v30, %s5436_s7  ;;  %1419 = vrot.lane.b32.xlu0 %v6021_v32, %s5436_s7  ;;  %v6343_v30 = vld [vmem:[#allocation2 + $0x31] sm:$0xff]  ;;  %2593 = vst.msk [vmem:[#allocation2 + $0xc9] sm:$0xff] %vm2577_vm5, %v6448_v23 }
 0x182   : > { %v1879_v32 = vld [vmem:[#allocation2 + $0x32] sm:$0xff]  ;;  %1924 = vst.msk [vmem:[#allocation3 + $0xd8] sm:$0xff] %vm493_vm3, %v1892_v29  ;;  %v2012_v29 = vld [vmem:[%s5525_s12 + $0x28] sm:$0xff] }
 0x183   : > { %v1181_v27 = vpop.permute.xlu1 %1180  ;;  %v1179_v28 = vpop.permute.xlu0 %1178  ;;  %1911 = vst.msk [vmem:[#allocation3 + $0x8] sm:$0xff] %vm493_vm3, %v1879_v32  ;;  %v2019_v32 = vld [vmem:[%s5525_s12 + $0x60] sm:$0xff] }
 0x184   : > { %1272 = vst.msk [vmem:[#allocation3 + $0x50] sm:$0xff] %vm1266_vm8, %v1181_v27  ;;  %1271 = vst.msk [vmem:[#allocation3 + $0x40] sm:$0xff] %vm1266_vm8, %v1179_v28  ;;  %v2020_v27 = vld [vmem:[%s5525_s12 + $0x68] sm:$0xff]  ;;  %v1893_v28 = vld [vmem:[#allocation2 + $0xda] sm:$0xff] }
 0x185   : > { %1425 = vrot.lane.b32.xlu1 %v6133_v47, %s5436_s7  ;;  %1423 = vrot.lane.b32.xlu0 %v6135_v26, %s5436_s7  ;;  %v6349_v47 = vld [vmem:[#allocation2 + $0x39] sm:$0xff]  ;;  %2580 = vst.msk [vmem:[#allocation2 + $0x31] sm:$0xff] %vm2577_vm5, %v6343_v30 }
 0x186   : > { %2581 = vst.msk [vmem:[#allocation2 + $0x39] sm:$0xff] %vm2577_vm5, %v6349_v47 }
 0x187   : > { %v1185_v34 = vpop.permute.xlu1 %1184  ;;  %v1183_v36 = vpop.permute.xlu0 %1182  ;;  %1925 = vst.msk [vmem:[#allocation3 + $0xe8] sm:$0xff] %vm493_vm3, %v1893_v28  ;;  %v2011_v28 = vld [vmem:[%s5525_s12 + $0x20] sm:$0xff] }
 0x188   : > { %1274 = vst.msk [vmem:[#allocation3 + $0x70] sm:$0xff] %vm1266_vm8, %v1185_v34  ;;  %1273 = vst.msk [vmem:[#allocation3 + $0x60] sm:$0xff] %vm1266_vm8, %v1183_v36  ;;  %v6468_v34 = vld [vmem:[#allocation2 + $0xe1] sm:$0xff] }
 0x189   : > { %1559 = vrot.lane.b32.xlu1 %v5713_v51, %s5437_s9  ;;  %1557 = vrot.lane.b32.xlu0 %v5715_v52, %s5437_s9  ;;  %v6359_v51 = vld [vmem:[#allocation2 + $0x49] sm:$0xff] }
 0x18a   : > { %v1881_v52 = vld [vmem:[#allocation2 + $0x4a] sm:$0xff]  ;;  %v1894_v36 = vld [vmem:[#allocation2 + $0xe2] sm:$0xff] }
 0x18b   : > { %v1189_v26 = vpop.permute.xlu1 %1188  ;;  %v1187_v49 = vpop.permute.xlu0 %1186  ;;  %1913 = vst.msk [vmem:[#allocation3 + $0x28] sm:$0xff] %vm493_vm3, %v1881_v52  ;;  %1926 = vst.msk [vmem:[#allocation3 + $0xf8] sm:$0xff] %vm493_vm3, %v1894_v36  ;;  %v2018_v52 = vld [vmem:[%s5525_s12 + $0x58] sm:$0xff]  ;;  %v1905_v36 = vld [vmem:[#allocation2 + $0x16a] sm:$0xff] }
 0x18c   : > { %1276 = vst.msk [vmem:[#allocation3 + $0x90] sm:$0xff] %vm1266_vm8, %v1189_v26  ;;  %1275 = vst.msk [vmem:[#allocation3 + $0x80] sm:$0xff] %vm1266_vm8, %v1187_v49  ;;  %v1895_v26 = vld [vmem:[#allocation2 + $0xf2] sm:$0xff] }
 0x18d   : > { %1563 = vrot.lane.b32.xlu1 %v5721_v53, %s5437_s9  ;;  %1561 = vrot.lane.b32.xlu0 %v5723_v54, %s5437_s9  ;;  %2582 = vst.msk [vmem:[#allocation2 + $0x49] sm:$0xff] %vm2577_vm5, %v6359_v51  ;;  %2583 = vst.msk [vmem:[#allocation2 + $0x51] sm:$0xff] %vm2577_vm5, %v6365_v33  ;;  %v6377_v53 = vld [vmem:[#allocation2 + $0x61] sm:$0xff]  ;;  %v6489_v49 = vld [vmem:[#allocation2 + $0xf9] sm:$0xff] }
 0x18e   : > { %v1883_v54 = vld [vmem:[#allocation2 + $0x62] sm:$0xff]  ;;  %2595 = vst.msk [vmem:[#allocation2 + $0xe1] sm:$0xff] %vm2577_vm5, %v6468_v34  ;;  %2596 = vst.msk [vmem:[#allocation2 + $0xf1] sm:$0xff] %vm2577_vm5, %v6481_v46 }
 0x18f   : > { %v1193_v37 = vpop.permute.xlu1 %1192  ;;  %v1191_v38 = vpop.permute.xlu0 %1190  ;;  %2585 = vst.msk [vmem:[#allocation2 + $0x69] sm:$0xff] %vm2577_vm5, %v6373_v39  ;;  %2584 = vst.msk [vmem:[#allocation2 + $0x61] sm:$0xff] %vm2577_vm5, %v6377_v53 }
 0x190   : > { %1278 = vst.msk [vmem:[#allocation3 + $0xb0] sm:$0xff] %vm1266_vm8, %v1193_v37  ;;  %1277 = vst.msk [vmem:[#allocation3 + $0xa0] sm:$0xff] %vm1266_vm8, %v1191_v38  ;;  %v2017_v38 = vld [vmem:[%s5525_s12 + $0x50] sm:$0xff] }
 0x191   : > { %1567 = vrot.lane.b32.xlu1 %v5733_v57, %s5437_s9  ;;  %1565 = vrot.lane.b32.xlu0 %v5735_v58, %s5437_s9  ;;  %1915 = vst.msk [vmem:[#allocation3 + $0x48] sm:$0xff] %vm493_vm3, %v1883_v54  ;;  %v6393_v57 = vld [vmem:[#allocation2 + $0x79] sm:$0xff]  ;;  %1927 = vst.msk [vmem:[#allocation3 + $0x108] sm:$0xff] %vm493_vm3, %v1895_v26  ;;  %v1897_v54 = vld [vmem:[#allocation2 + $0x10a] sm:$0xff] }
 0x192   : > { %v1885_v58 = vld [vmem:[#allocation2 + $0x7a] sm:$0xff]  ;;  %2597 = vst.msk [vmem:[#allocation2 + $0xf9] sm:$0xff] %vm2577_vm5, %v6489_v49 }
 0x193   : > { %v1197_v41 = vpop.permute.xlu1 %1196  ;;  %v1195_v42 = vpop.permute.xlu0 %1194  ;;  %2587 = vst.msk [vmem:[#allocation2 + $0x81] sm:$0xff] %vm2577_vm5, %v6389_v43  ;;  %2586 = vst.msk [vmem:[#allocation2 + $0x79] sm:$0xff] %vm2577_vm5, %v6393_v57 }
 0x194   : > { %1280 = vst.msk [vmem:[#allocation3 + $0xd0] sm:$0xff] %vm1266_vm8, %v1197_v41  ;;  %1279 = vst.msk [vmem:[#allocation3 + $0xc0] sm:$0xff] %vm1266_vm8, %v1195_v42  ;;  %v1898_v41 = vld [vmem:[#allocation2 + $0x112] sm:$0xff]  ;;  %v2016_v42 = vld [vmem:[%s5525_s12 + $0x48] sm:$0xff] }
 0x195   : > { %1571 = vrot.lane.b32.xlu1 %v5737_v59, %s5437_s9  ;;  %1569 = vrot.lane.b32.xlu0 %v5749_v60, %s5437_s9  ;;  %1917 = vst.msk [vmem:[#allocation3 + $0x68] sm:$0xff] %vm493_vm3, %v1885_v58  ;;  %v6407_v59 = vld [vmem:[#allocation2 + $0x91] sm:$0xff]  ;;  %v6413_v60 = vld [vmem:[#allocation2 + $0x99] sm:$0xff]  ;;  %1929 = vst.msk [vmem:[#allocation3 + $0x128] sm:$0xff] %vm493_vm3, %v1897_v54 }
 0x196   : > { %2588 = vst.msk [vmem:[#allocation2 + $0x91] sm:$0xff] %vm2577_vm5, %v6407_v59  ;;  %2589 = vst.msk [vmem:[#allocation2 + $0x99] sm:$0xff] %vm2577_vm5, %v6413_v60  ;;  %v6522_v58 = vld [vmem:[#allocation2 + $0x121] sm:$0xff]  ;;  %v1523_v54 = vld [vmem:[#allocation2 + $0x198] sm:$0xff] }
 0x197   : > { %v1201_v48 = vpop.permute.xlu1 %1200  ;;  %v1199_v50 = vpop.permute.xlu0 %1198  ;;  %2599 = vst.msk [vmem:[#allocation2 + $0x111] sm:$0xff] %vm2577_vm5, %v6509_v40  ;;  %2600 = vst.msk [vmem:[#allocation2 + $0x121] sm:$0xff] %vm2577_vm5, %v6522_v58 }
 0x198   : > { %1282 = vst.msk [vmem:[#allocation3 + $0xf0] sm:$0xff] %vm1266_vm8, %v1201_v48  ;;  %1281 = vst.msk [vmem:[#allocation3 + $0xe0] sm:$0xff] %vm1266_vm8, %v1199_v50  ;;  %v6530_v48 = vld [vmem:[#allocation2 + $0x129] sm:$0xff]  ;;  %v2015_v50 = vld [vmem:[%s5525_s12 + $0x40] sm:$0xff] }
 0x199   : > { %1575 = vrot.lane.b32.xlu1 %v5751_v61, %s5437_s9  ;;  %1573 = vrot.lane.b32.xlu0 %v5753_v62, %s5437_s9  ;;  %v6423_v61 = vld [vmem:[#allocation2 + $0xa9] sm:$0xff]  ;;  %1930 = vst.msk [vmem:[#allocation3 + $0x138] sm:$0xff] %vm493_vm3, %v1898_v41  ;;  %1937 = vst.msk [vmem:[#allocation3 + $0x1a8] sm:$0xff] %vm493_vm3, %v1905_v36  ;;  %v1944_v41 = vld [vmem:[#allocation3 + $0x8] sm:$0xff] }
 0x19a   : > { %v1889_v62 = vld [vmem:[#allocation2 + $0xaa] sm:$0xff]  ;;  %2601 = vst.msk [vmem:[#allocation2 + $0x129] sm:$0xff] %vm2577_vm5, %v6530_v48  ;;  %4964 = vmatprep.mubr.msk.f32.mxu0 %vm493_vm3, %v1944_v41  ;;  %v6769_v41 = vld [vmem:[#allocation2 + $0x80] sm:$0xff] }
 0x19b   : > { %v1205_v7 = vpop.permute.xlu1 %1204  ;;  %v1203_v8 = vpop.permute.xlu0 %1202  ;;  %1921 = vst.msk [vmem:[#allocation3 + $0xa8] sm:$0xff] %vm493_vm3, %v1889_v62  ;;  %v6550_v62 = vld [vmem:[#allocation2 + $0x141] sm:$0xff] }
 0x19c   : > { %1284 = vst.msk [vmem:[#allocation3 + $0x110] sm:$0xff] %vm1266_vm8, %v1205_v7  ;;  %1283 = vst.msk [vmem:[#allocation3 + $0x100] sm:$0xff] %vm1266_vm8, %v1203_v8  ;;  %v2014_v7 = vld [vmem:[%s5525_s12 + $0x38] sm:$0xff]  ;;  %v6746_v36 = vld [vmem:[#allocation2 + $0x48] sm:$0xff] }
 0x19d   : > { %1579 = vrot.lane.b32.xlu1 %v5761_v63, %s5437_s9  ;;  %1577 = vrot.lane.b32.xlu0 %v5763_v0, %s5437_s9  ;;  %2590 = vst.msk [vmem:[#allocation2 + $0xa9] sm:$0xff] %vm2577_vm5, %v6423_v61  ;;  %2591 = vst.msk [vmem:[#allocation2 + $0xb1] sm:$0xff] %vm2577_vm5, %v6429_v11  ;;  %v6439_v63 = vld [vmem:[#allocation2 + $0xc1] sm:$0xff]  ;;  %v5438_v0 = vmov 0.0  }
 0x19e   : > { %2128 = vmatprep.subr.mxu0 %v5438_v0  ;;  %5171 = vmatprep.subr.mxu1 %v5438_v0  ;;  %2592 = vst.msk [vmem:[#allocation2 + $0xc1] sm:$0xff] %vm2577_vm5, %v6439_v63  ;;  %v1901_v8 = vld [vmem:[#allocation2 + $0x13a] sm:$0xff]  ;;  %2648 = vst.msk [vmem:[#allocation4 + $0x30] sm:$0xff] %vm2577_vm5, %v6746_v36 }
 0x19f   : > { %v1209_v15 = vpop.permute.xlu1 %1208  ;;  %v1207_v16 = vpop.permute.xlu0 %1206  ;;  %2129 = vmatpush1.msra.mxu0 %v2022_v19  ;;  %5189 = vmatpush1.msra.mxu1 %v2022_v19  ;;  %1933 = vst.msk [vmem:[#allocation3 + $0x168] sm:$0xff] %vm493_vm3, %v1901_v8  ;;  %v1903_v19 = vld [vmem:[#allocation2 + $0x152] sm:$0xff]  ;;  %v2023_v8 = vld [vmem:[%s5525_s12 + $0x80] sm:$0xff] }
 0x1a0   : > { %1286 = vst.msk [vmem:[#allocation3 + $0x130] sm:$0xff] %vm1266_vm8, %v1209_v15  ;;  %1285 = vst.msk [vmem:[#allocation3 + $0x120] sm:$0xff] %vm1266_vm8, %v1207_v16  ;;  %2130 = vmatprep.subr.mxu0 %v5438_v0  ;;  %5172 = vmatprep.subr.mxu1 %v5438_v0  ;;  %v2013_v15 = vld [vmem:[%s5525_s12 + $0x30] sm:$0xff] }
 0x1a1   : > { %1583 = vrot.lane.b32.xlu1 %v5765_v1, %s5437_s9  ;;  %1581 = vrot.lane.b32.xlu0 %v5773_v2, %s5437_s9  ;;  %v6461_v2 = vld [vmem:[#allocation2 + $0xd9] sm:$0xff]  ;;  %2603 = vst.msk [vmem:[#allocation2 + $0x141] sm:$0xff] %vm2577_vm5, %v6550_v62  ;;  %v6563_v16 = vld [vmem:[#allocation2 + $0x151] sm:$0xff]  ;;  %2653 = vst.msk [vmem:[#allocation4 + $0x58] sm:$0xff] %vm2577_vm5, %v6769_v41 }
 0x1a2   : > { %2131 = vmatpush1.msra.mxu0 %v2021_v24  ;;  %5190 = vmatpush1.msra.mxu1 %v2021_v24  ;;  %2594 = vst.msk [vmem:[#allocation2 + $0xd9] sm:$0xff] %vm2577_vm5, %v6461_v2  ;;  %v6571_v24 = vld [vmem:[#allocation2 + $0x159] sm:$0xff]  ;;  %2604 = vst.msk [vmem:[#allocation2 + $0x151] sm:$0xff] %vm2577_vm5, %v6563_v16 }
 0x1a3   : > { %v1213_v1 = vpop.permute.xlu1 %1212  ;;  %v1211_v31 = vpop.permute.xlu0 %1210  ;;  %2132 = vmatprep.subr.mxu0 %v5438_v0  ;;  %5173 = vmatprep.subr.mxu1 %v5438_v0  ;;  %1935 = vst.msk [vmem:[#allocation3 + $0x188] sm:$0xff] %vm493_vm3, %v1903_v19  ;;  %v6719_v19 = vld [vmem:[#allocation2 + $0x20] sm:$0xff] }
 0x1a4   : > { %1288 = vst.msk [vmem:[#allocation3 + $0x150] sm:$0xff] %vm1266_vm8, %v1213_v1  ;;  %1287 = vst.msk [vmem:[#allocation3 + $0x140] sm:$0xff] %vm1266_vm8, %v1211_v31  ;;  %2133 = vmatpush1.msra.mxu0 %v2020_v27  ;;  %5191 = vmatpush1.msra.mxu1 %v2020_v27  ;;  %v1904_v1 = vld [vmem:[#allocation2 + $0x15a] sm:$0xff]  ;;  %v6584_v27 = vld [vmem:[#allocation2 + $0x169] sm:$0xff] }
 0x1a5   : > { %1587 = vrot.lane.b32.xlu1 %v5775_v3, %s5437_s9  ;;  %1585 = vrot.lane.b32.xlu0 %v5777_v4, %s5437_s9  ;;  %2605 = vst.msk [vmem:[#allocation2 + $0x159] sm:$0xff] %vm2577_vm5, %v6571_v24  ;;  %2606 = vst.msk [vmem:[#allocation2 + $0x169] sm:$0xff] %vm2577_vm5, %v6584_v27 }
 0x1a6   : > { %2134 = vmatprep.subr.mxu0 %v5438_v0  ;;  %5174 = vmatprep.subr.mxu1 %v5438_v0  ;;  %1936 = vst.msk [vmem:[#allocation3 + $0x198] sm:$0xff] %vm493_vm3, %v1904_v1  ;;  %v6733_v1 = vld [vmem:[#allocation2 + $0x30] sm:$0xff] }
 0x1a7   : > { %v1217_v3 = vpop.permute.xlu1 %1216  ;;  %v1215_v4 = vpop.permute.xlu0 %1214  ;;  %2135 = vmatpush1.msra.mxu0 %v2019_v32  ;;  %5192 = vmatpush1.msra.mxu1 %v2019_v32  ;;  %v1906_v32 = vld [vmem:[#allocation2 + $0x172] sm:$0xff]  ;;  %2645 = vst.msk [vmem:[#allocation4 + $0x18] sm:$0xff] %vm2577_vm5, %v6719_v19  ;;  %2646 = vst.msk [vmem:[#allocation4 + $0x20] sm:$0xff] %vm2577_vm5, %v6733_v1 }
 0x1a8   : > { %1290 = vst.msk [vmem:[#allocation3 + $0x170] sm:$0xff] %vm1266_vm8, %v1217_v3  ;;  %1289 = vst.msk [vmem:[#allocation3 + $0x160] sm:$0xff] %vm1266_vm8, %v1215_v4  ;;  %2136 = vmatprep.subr.mxu0 %v5438_v0  ;;  %5175 = vmatprep.subr.mxu1 %v5438_v0  ;;  %v8061_v3 = vld [vmem:[#allocation6_spill] sm:$0xff] }
 0x1a9   : > { %1591 = vrot.lane.b32.xlu1 %v5785_v5, %s5437_s9  ;;  %1589 = vrot.lane.b32.xlu0 %v5787_v6, %s5437_s9  ;;  %v6502_v6 = vld [vmem:[#allocation2 + $0x109] sm:$0xff]  ;;  %v6591_v4 = vld [vmem:[#allocation2 + $0x171] sm:$0xff]  ;;  %1938 = vst.msk [vmem:[#allocation3 + $0x1b8] sm:$0xff] %vm493_vm3, %v1906_v32 }
 0x1aa   : > { %2137 = vmatpush1.msra.mxu0 %v2018_v52  ;;  %5193 = vmatpush1.msra.mxu1 %v2018_v52  ;;  %2598 = vst.msk [vmem:[#allocation2 + $0x109] sm:$0xff] %vm2577_vm5, %v6502_v6  ;;  %2607 = vst.msk [vmem:[#allocation2 + $0x171] sm:$0xff] %vm2577_vm5, %v6591_v4  ;;  %v2010_v52 = vld [vmem:[%s5525_s12 + $0x18] sm:$0xff]  ;;  %v1910_v32 = vld [vmem:[#allocation2 + $0x1a2] sm:$0xff] }
 0x1ab   : > { %v1221_v5 = vpop.permute.xlu1 %1220  ;;  %v1219_v37 = vpop.permute.xlu0 %1218  ;;  %2138 = vmatprep.subr.mxu0 %v5438_v0  ;;  %5176 = vmatprep.subr.mxu1 %v5438_v0  ;;  %1942 = vst.msk [vmem:[#allocation3 + $0x1f8] sm:$0xff] %vm493_vm3, %v1910_v32 }
 0x1ac   : > { %1292 = vst.msk [vmem:[#allocation3 + $0x190] sm:$0xff] %vm1266_vm8, %v1221_v5  ;;  %1291 = vst.msk [vmem:[#allocation3 + $0x180] sm:$0xff] %vm1266_vm8, %v1219_v37  ;;  %2139 = vmatpush1.msra.mxu0 %v2017_v38  ;;  %5194 = vmatpush1.msra.mxu1 %v2017_v38  ;;  %v8063_v5 = vld [vmem:[#allocation38_spill] sm:$0xff]  ;;  %v2009_v37 = vld [vmem:[%s5525_s12 + $0x10] sm:$0xff] }
 0x1ad   : > { %1595 = vrot.lane.b32.xlu1 %v5803_v10, %s5437_s9  ;;  %1593 = vrot.lane.b32.xlu0 %v5801_v9, %s5437_s9  ;;  %v1524_v38 = vld [vmem:[#allocation2 + $0x1a0] sm:$0xff] }
 0x1ae   : > { %2140 = vmatprep.subr.mxu0 %v5438_v0  ;;  %5177 = vmatprep.subr.mxu1 %v5438_v0 }
 0x1af   : > { %v1225_v10 = vpop.permute.xlu1 %1224  ;;  %v1223_v9 = vpop.permute.xlu0 %1222  ;;  %2141 = vmatpush1.msra.mxu0 %v2016_v42  ;;  %5195 = vmatpush1.msra.mxu1 %v2016_v42  ;;  %v2008_v42 = vld [vmem:[%s5525_s12 + $0x8] sm:$0xff] }
 0x1b0   : > { %1294 = vst.msk [vmem:[#allocation3 + $0x1b0] sm:$0xff] %vm1266_vm8, %v1225_v10  ;;  %1293 = vst.msk [vmem:[#allocation3 + $0x1a0] sm:$0xff] %vm1266_vm8, %v1223_v9  ;;  %2142 = vmatprep.subr.mxu0 %v5438_v0  ;;  %5178 = vmatprep.subr.mxu1 %v5438_v0 }
 0x1b1   : > { %1599 = vrot.lane.b32.xlu1 %v5819_v14, %s5437_s9  ;;  %1597 = vrot.lane.b32.xlu0 %v5817_v13, %s5437_s9  ;;  %v6543_v13 = vld [vmem:[#allocation2 + $0x139] sm:$0xff] }
 0x1b2   : > { %2143 = vmatpush1.msra.mxu0 %v2015_v50  ;;  %5196 = vmatpush1.msra.mxu1 %v2015_v50  ;;  %2602 = vst.msk [vmem:[#allocation2 + $0x139] sm:$0xff] %vm2577_vm5, %v6543_v13 }
 0x1b3   : > { %v1229_v14 = vpop.permute.xlu1 %1228  ;;  %v1227_v56 = vpop.permute.xlu0 %1226  ;;  %2144 = vmatprep.subr.mxu0 %v5438_v0  ;;  %5179 = vmatprep.subr.mxu1 %v5438_v0 }
 0x1b4   : > { %1296 = vst.msk [vmem:[#allocation3 + $0x1d0] sm:$0xff] %vm1266_vm8, %v1229_v14  ;;  %1295 = vst.msk [vmem:[#allocation3 + $0x1c0] sm:$0xff] %vm1266_vm8, %v1227_v56  ;;  %2145 = vmatpush1.msra.mxu0 %v2014_v7  ;;  %5197 = vmatpush1.msra.mxu1 %v2014_v7  ;;  %v2024_v14 = vld [vmem:[%s5525_s12 + $0x88] sm:$0xff]  ;;  %s5441_s12 = smov 24  }
 0x1b5   : > { %1603 = vrot.lane.b32.xlu1 %v5835_v18, %s5437_s9  ;;  %1601 = vrot.lane.b32.xlu0 %v5833_v17, %s5437_s9 }
 0x1b6   : > { %2146 = vmatprep.subr.mxu0 %v5438_v0  ;;  %5180 = vmatprep.subr.mxu1 %v5438_v0 }
 0x1b7   : > { %v1233_v18 = vpop.permute.xlu1 %1232  ;;  %v1231_v17 = vpop.permute.xlu0 %1230  ;;  %2147 = vmatpush1.msra.mxu0 %v2013_v15  ;;  %5198 = vmatpush1.msra.mxu1 %v2013_v15 }
 0x1b8   : > { %1298 = vst.msk [vmem:[#allocation3 + $0x1f0] sm:$0xff] %vm1266_vm8, %v1233_v18  ;;  %1297 = vst.msk [vmem:[#allocation3 + $0x1e0] sm:$0xff] %vm1266_vm8, %v1231_v17  ;;  %2148 = vmatprep.subr.mxu0 %v5438_v0  ;;  %5181 = vmatprep.subr.mxu1 %v5438_v0 }
 0x1b9   : > { %1607 = vrot.lane.b32.xlu1 %v8060_v20, %s5437_s9  ;;  %1605 = vrot.lane.b32.xlu0 %v5849_v21, %s5437_s9  ;;  %v1717_v20 = vld [vmem:[#allocation2 + $0x1a1] sm:$0xff]  ;;  %v6869_v32 = vld [vmem:[#allocation2 + $0x138] sm:$0xff] }
 0x1ba   : > { %2149 = vmatpush1.msra.mxu0 %v2012_v29  ;;  %5199 = vmatpush1.msra.mxu1 %v2012_v29  ;;  %v6731_v29 = vld [vmem:[#allocation2 + $0x38] sm:$0xff]  ;;  %2668 = vst.msk [vmem:[#allocation4 + $0xd0] sm:$0xff] %vm2577_vm5, %v6869_v32 }
 0x1bb   : > { %v1366_v31 = vpop.permute.xlu1 %1365  ;;  %v1364_v21 = vpop.permute.xlu0 %1363  ;;  %2150 = vmatprep.subr.mxu0 %v5438_v0  ;;  %5182 = vmatprep.subr.mxu1 %v5438_v0  ;;  %2647 = vst.msk [vmem:[#allocation4 + $0x28] sm:$0xff] %vm2577_vm5, %v6731_v29 }
 0x1bc   : > { %1461 = vst.msk [vmem:[#allocation3 + $0x10] sm:$0xff] %vm1459_vm9, %v1366_v31  ;;  %1460 = vst.msk [vmem:[#allocation3] sm:$0xff] %vm1459_vm9, %v1364_v21  ;;  %2151 = vmatpush1.msra.mxu0 %v2011_v28  ;;  %5200 = vmatpush1.msra.mxu1 %v2011_v28  ;;  %v6744_v28 = vld [vmem:[#allocation2 + $0x50] sm:$0xff] }
 0x1bd   : > { %1611 = vrot.lane.b32.xlu1 %v8061_v3, %s5437_s9  ;;  %1609 = vrot.lane.b32.xlu0 %v5865_v25, %s5437_s9  ;;  %2649 = vst.msk [vmem:[#allocation4 + $0x38] sm:$0xff] %vm2577_vm5, %v6744_v28 }
 0x1be   : > { %2152 = vmatprep.subr.mxu0 %v5438_v0  ;;  %5183 = vmatprep.subr.mxu1 %v5438_v0 }
 0x1bf   : > { %v1370_v26 = vpop.permute.xlu1 %1369  ;;  %v1368_v25 = vpop.permute.xlu0 %1367  ;;  %2153 = vmatpush1.msra.mxu0 %v2010_v52  ;;  %5201 = vmatpush1.msra.mxu1 %v2010_v52  ;;  %v6757_v52 = vld [vmem:[#allocation2 + $0x68] sm:$0xff] }
 0x1c0   : > { %1463 = vst.msk [vmem:[#allocation3 + $0x30] sm:$0xff] %vm1459_vm9, %v1370_v26  ;;  %1462 = vst.msk [vmem:[#allocation3 + $0x20] sm:$0xff] %vm1459_vm9, %v1368_v25  ;;  %2154 = vmatprep.subr.mxu0 %v5438_v0  ;;  %5184 = vmatprep.subr.mxu1 %v5438_v0  ;;  %v2677_v26 = vld [vmem:[#allocation2 + $0x21] sm:$0xff]  ;;  %v2676_v25 = vld [vmem:[#allocation2 + $0x19] sm:$0xff] }
 0x1c1   : > { %1615 = vrot.lane.b32.xlu1 %v8062_v35, %s5437_s9  ;;  %1613 = vrot.lane.b32.xlu0 %v8063_v5, %s5437_s9  ;;  %v6759_v35 = vld [vmem:[#allocation2 + $0x60] sm:$0xff]  ;;  %2651 = vst.msk [vmem:[#allocation4 + $0x48] sm:$0xff] %vm2577_vm5, %v6757_v52 }
 0x1c2   : > { %2155 = vmatpush1.msra.mxu0 %v2009_v37  ;;  %5202 = vmatpush1.msra.mxu1 %v2009_v37  ;;  %2650 = vst.msk [vmem:[#allocation4 + $0x40] sm:$0xff] %vm2577_vm5, %v6759_v35 }
 0x1c3   : > { %v1374_v10 = vpop.permute.xlu1 %1373  ;;  %v1372_v9 = vpop.permute.xlu0 %1371  ;;  %2156 = vmatprep.subr.mxu0 %v5438_v0  ;;  %5185 = vmatprep.subr.mxu1 %v5438_v0 }
 0x1c4   : > { %1465 = vst.msk [vmem:[#allocation3 + $0x50] sm:$0xff] %vm1459_vm9, %v1374_v10  ;;  %1464 = vst.msk [vmem:[#allocation3 + $0x40] sm:$0xff] %vm1459_vm9, %v1372_v9  ;;  %2157 = vmatpush1.msra.mxu0 %v2008_v42  ;;  %5203 = vmatpush1.msra.mxu1 %v2008_v42  ;;  %v6771_v10 = vld [vmem:[#allocation2 + $0x78] sm:$0xff] }
 0x1c5   : > { %1619 = vrot.lane.b32.xlu1 %v1524_v38, %s5437_s9  ;;  %1617 = vrot.lane.b32.xlu0 %v1523_v54, %s5437_s9  ;;  %v2678_v38 = vld [vmem:[#allocation2 + $0x31] sm:$0xff]  ;;  %v2679_v54 = vld [vmem:[#allocation2 + $0x39] sm:$0xff]  ;;  %2652 = vst.msk [vmem:[#allocation4 + $0x50] sm:$0xff] %vm2577_vm5, %v6771_v10 }
 0x1c6   : > { %2158 = vmatprep.subr.mxu0 %v5438_v0  ;;  %5186 = vmatprep.subr.mxu1 %v5438_v0 }
 0x1c7   : > { %v1378_v44 = vpop.permute.xlu1 %1377  ;;  %v1376_v50 = vpop.permute.xlu0 %1375  ;;  %2159 = vmatpush1.msra.mxu0 %v2007_v55  ;;  %5204 = vmatpush1.msra.mxu1 %v2007_v55  ;;  %v2680_v55 = vld [vmem:[#allocation2 + $0x49] sm:$0xff] }
 0x1c8   : > { %1467 = vst.msk [vmem:[#allocation3 + $0x70] sm:$0xff] %vm1459_vm9, %v1378_v44  ;;  %1466 = vst.msk [vmem:[#allocation3 + $0x60] sm:$0xff] %vm1459_vm9, %v1376_v50  ;;  %2188 = vmatprep.subr.mxu0 %v5438_v0  ;;  %5187 = vmatprep.subr.mxu1 %v5438_v0  ;;  %v6781_v44 = vld [vmem:[#allocation2 + $0x98] sm:$0xff] }
 0x1c9   : > { %1752 = vrot.lane.b32.xlu1 %v6349_v47, %s5439_s10  ;;  %1750 = vrot.lane.b32.xlu0 %v6343_v30, %s5439_s10  ;;  %v2681_v50 = vld [vmem:[#allocation2 + $0x51] sm:$0xff]  ;;  %2655 = vst.msk [vmem:[#allocation4 + $0x68] sm:$0xff] %vm2577_vm5, %v6781_v44 }
 0x1ca   : > { %2189 = vmatpush2.msra.mxu0 %v2024_v14  ;;  %5205 = vmatpush2.msra.mxu1 %v2024_v14  ;;  %v6785_v14 = vld [vmem:[#allocation2 + $0x90] sm:$0xff] }
 0x1cb   : > { %v1382_v56 = vpop.permute.xlu1 %1381  ;;  %v1380_v7 = vpop.permute.xlu0 %1379  ;;  %2190 = vmatprep.subr.mxu0 %v5438_v0  ;;  %5188 = vmatprep.subr.mxu1 %v5438_v0  ;;  %2654 = vst.msk [vmem:[#allocation4 + $0x60] sm:$0xff] %vm2577_vm5, %v6785_v14 }
 0x1cc   : > { %1469 = vst.msk [vmem:[#allocation3 + $0x90] sm:$0xff] %vm1459_vm9, %v1382_v56  ;;  %1468 = vst.msk [vmem:[#allocation3 + $0x80] sm:$0xff] %vm1459_vm9, %v1380_v7  ;;  %2191 = vmatpush2.msra.mxu0 %v2023_v8  ;;  %5206 = vmatpush2.msra.mxu1 %v2023_v8  ;;  %v6793_v8 = vld [vmem:[#allocation2 + $0xb0] sm:$0xff] }
 0x1cd   : > { %1756 = vrot.lane.b32.xlu1 %v6365_v33, %s5439_s10  ;;  %1754 = vrot.lane.b32.xlu0 %v6359_v51, %s5439_s10  ;;  %2657 = vst.msk [vmem:[#allocation4 + $0x78] sm:$0xff] %vm2577_vm5, %v6793_v8 }
 0x1cf   : > { %v1386_v30 = vpop.permute.xlu1 %1385  ;;  %v1384_v47 = vpop.permute.xlu0 %1383 }
 0x1d0   : > { %1471 = vst.msk [vmem:[#allocation3 + $0xb0] sm:$0xff] %vm1459_vm9, %v1386_v30  ;;  %1470 = vst.msk [vmem:[#allocation3 + $0xa0] sm:$0xff] %vm1459_vm9, %v1384_v47  ;;  %v2683_v30 = vld [vmem:[#allocation2 + $0x69] sm:$0xff]  ;;  %v2682_v47 = vld [vmem:[#allocation2 + $0x61] sm:$0xff] }
 0x1d1   : > { %1760 = vrot.lane.b32.xlu1 %v6373_v39, %s5439_s10  ;;  %1758 = vrot.lane.b32.xlu0 %v6377_v53, %s5439_s10 }
 0x1d3   : > { %v1390_v51 = vpop.permute.xlu1 %1389  ;;  %v1388_v33 = vpop.permute.xlu0 %1387 }
 0x1d4   : > { %1473 = vst.msk [vmem:[#allocation3 + $0xd0] sm:$0xff] %vm1459_vm9, %v1390_v51  ;;  %1472 = vst.msk [vmem:[#allocation3 + $0xc0] sm:$0xff] %vm1459_vm9, %v1388_v33  ;;  %v6797_v51 = vld [vmem:[#allocation2 + $0xa8] sm:$0xff] }
 0x1d5   : > { %1764 = vrot.lane.b32.xlu1 %v6389_v43, %s5439_s10  ;;  %1762 = vrot.lane.b32.xlu0 %v6393_v57, %s5439_s10  ;;  %2656 = vst.msk [vmem:[#allocation4 + $0x70] sm:$0xff] %vm2577_vm5, %v6797_v51 }
 0x1d7   : > { %v1394_v0 = vpop.permute.xlu1 %1393  ;;  %v1392_v12 = vpop.permute.xlu0 %1391 }
 0x1d8   : > { %1475 = vst.msk [vmem:[#allocation3 + $0xf0] sm:$0xff] %vm1459_vm9, %v1394_v0  ;;  %1474 = vst.msk [vmem:[#allocation3 + $0xe0] sm:$0xff] %vm1459_vm9, %v1392_v12  ;;  %v6805_v12 = vld [vmem:[#allocation2 + $0xc8] sm:$0xff] }
 0x1d9   : > { %1768 = vrot.lane.b32.xlu1 %v6413_v60, %s5439_s10  ;;  %1766 = vrot.lane.b32.xlu0 %v6407_v59, %s5439_s10  ;;  %2659 = vst.msk [vmem:[#allocation4 + $0x88] sm:$0xff] %vm2577_vm5, %v6805_v12 }
 0x1db   : > { %v1398_v39 = vpop.permute.xlu1 %1397  ;;  %v1396_v53 = vpop.permute.xlu0 %1395 }
 0x1dc   : > { %1477 = vst.msk [vmem:[#allocation3 + $0x110] sm:$0xff] %vm1459_vm9, %v1398_v39  ;;  %1476 = vst.msk [vmem:[#allocation3 + $0x100] sm:$0xff] %vm1459_vm9, %v1396_v53  ;;  %v2685_v39 = vld [vmem:[#allocation2 + $0x81] sm:$0xff]  ;;  %v2684_v53 = vld [vmem:[#allocation2 + $0x79] sm:$0xff] }
 0x1dd   : > { %1772 = vrot.lane.b32.xlu1 %v6429_v11, %s5439_s10  ;;  %1770 = vrot.lane.b32.xlu0 %v6423_v61, %s5439_s10 }
 0x1df   : > { %v1402_v43 = vpop.permute.xlu1 %1401  ;;  %v1400_v57 = vpop.permute.xlu0 %1399 }
 0x1e0   : > { %1479 = vst.msk [vmem:[#allocation3 + $0x130] sm:$0xff] %vm1459_vm9, %v1402_v43  ;;  %1478 = vst.msk [vmem:[#allocation3 + $0x120] sm:$0xff] %vm1459_vm9, %v1400_v57  ;;  %v6809_v43 = vld [vmem:[#allocation2 + $0xc0] sm:$0xff] }
 0x1e1   : > { %1776 = vrot.lane.b32.xlu1 %v6448_v23, %s5439_s10  ;;  %1774 = vrot.lane.b32.xlu0 %v6439_v63, %s5439_s10  ;;  %2658 = vst.msk [vmem:[#allocation4 + $0x80] sm:$0xff] %vm2577_vm5, %v6809_v43 }
 0x1e3   : > { %v1406_v59 = vpop.permute.xlu1 %1405  ;;  %v1404_v60 = vpop.permute.xlu0 %1403 }
 0x1e4   : > { %1481 = vst.msk [vmem:[#allocation3 + $0x150] sm:$0xff] %vm1459_vm9, %v1406_v59  ;;  %1480 = vst.msk [vmem:[#allocation3 + $0x140] sm:$0xff] %vm1459_vm9, %v1404_v60  ;;  %v6817_v60 = vld [vmem:[#allocation2 + $0xe0] sm:$0xff] }
 0x1e5   : > { %1780 = vrot.lane.b32.xlu1 %v6468_v34, %s5439_s10  ;;  %1778 = vrot.lane.b32.xlu0 %v6461_v2, %s5439_s10  ;;  %2661 = vst.msk [vmem:[#allocation4 + $0x98] sm:$0xff] %vm2577_vm5, %v6817_v60 }
 0x1e7   : > { %v1410_v61 = vpop.permute.xlu1 %1409  ;;  %v1408_v11 = vpop.permute.xlu0 %1407 }
 0x1e8   : > { %1483 = vst.msk [vmem:[#allocation3 + $0x170] sm:$0xff] %vm1459_vm9, %v1410_v61  ;;  %1482 = vst.msk [vmem:[#allocation3 + $0x160] sm:$0xff] %vm1459_vm9, %v1408_v11  ;;  %v2687_v61 = vld [vmem:[#allocation2 + $0x99] sm:$0xff]  ;;  %v2686_v11 = vld [vmem:[#allocation2 + $0x91] sm:$0xff] }
 0x1e9   : > { %1784 = vrot.lane.b32.xlu1 %v6489_v49, %s5439_s10  ;;  %1782 = vrot.lane.b32.xlu0 %v6481_v46, %s5439_s10  ;;  %v1992_v46 = vld [vmem:[#allocation3 + $0x188] sm:$0xff] }
 0x1ea   : > { %4988 = vmatprep.mubr.msk.f32.mxu1 %vm493_vm3, %v1992_v46  ;;  %v2689_v46 = vld [vmem:[#allocation2 + $0xb1] sm:$0xff] }
 0x1eb   : > { %v1414_v63 = vpop.permute.xlu1 %1413  ;;  %v1412_v23 = vpop.permute.xlu0 %1411 }
 0x1ec   : > { %1485 = vst.msk [vmem:[#allocation3 + $0x190] sm:$0xff] %vm1459_vm9, %v1414_v63  ;;  %1484 = vst.msk [vmem:[#allocation3 + $0x180] sm:$0xff] %vm1459_vm9, %v1412_v23  ;;  %v6821_v63 = vld [vmem:[#allocation2 + $0xd8] sm:$0xff] }
 0x1ed   : > { %1788 = vrot.lane.b32.xlu1 %v6509_v40, %s5439_s10  ;;  %1786 = vrot.lane.b32.xlu0 %v6502_v6, %s5439_s10  ;;  %2660 = vst.msk [vmem:[#allocation4 + $0x90] sm:$0xff] %vm2577_vm5, %v6821_v63 }
 0x1ef   : > { %v1418_v2 = vpop.permute.xlu1 %1417  ;;  %v1416_v34 = vpop.permute.xlu0 %1415 }
 0x1f0   : > { %1487 = vst.msk [vmem:[#allocation3 + $0x1b0] sm:$0xff] %vm1459_vm9, %v1418_v2  ;;  %1486 = vst.msk [vmem:[#allocation3 + $0x1a0] sm:$0xff] %vm1459_vm9, %v1416_v34  ;;  %v6829_v34 = vld [vmem:[#allocation2 + $0xf8] sm:$0xff] }
 0x1f1   : > { %1792 = vrot.lane.b32.xlu1 %v6530_v48, %s5439_s10  ;;  %1790 = vrot.lane.b32.xlu0 %v6522_v58, %s5439_s10  ;;  %v2611_v58 = vld [vmem:[#allocation2 + $0x8] sm:$0xff]  ;;  %v2610_v48 = vld [vmem:[#allocation2] sm:$0xff]  ;;  %2663 = vst.msk [vmem:[#allocation4 + $0xa8] sm:$0xff] %vm2577_vm5, %v6829_v34 }
 0x1f2   : > { %2643 = vst.msk [vmem:[#allocation4 + $0x8] sm:$0xff] %vm2577_vm5, %v2611_v58  ;;  %2642 = vst.msk [vmem:[#allocation4] sm:$0xff] %vm2577_vm5, %v2610_v48  ;;  %v6841_v58 = vld [vmem:[#allocation2 + $0x110] sm:$0xff] }
 0x1f3   : > { %v1422_v49 = vpop.permute.xlu1 %1421  ;;  %v1420_v18 = vpop.permute.xlu0 %1419  ;;  %v2691_v48 = vld [vmem:[#allocation2 + $0xc9] sm:$0xff]  ;;  %2665 = vst.msk [vmem:[#allocation4 + $0xb8] sm:$0xff] %vm2577_vm5, %v6841_v58 }
 0x1f4   : > { %1489 = vst.msk [vmem:[#allocation3 + $0x1d0] sm:$0xff] %vm1459_vm9, %v1422_v49  ;;  %1488 = vst.msk [vmem:[#allocation3 + $0x1c0] sm:$0xff] %vm1459_vm9, %v1420_v18  ;;  %v2688_v49 = vld [vmem:[#allocation2 + $0xa9] sm:$0xff] }
 0x1f5   : > { %1796 = vrot.lane.b32.xlu1 %v6550_v62, %s5439_s10  ;;  %1794 = vrot.lane.b32.xlu0 %v6543_v13, %s5439_s10  ;;  %v6717_v13 = vld [vmem:[#allocation2 + $0x18] sm:$0xff]  ;;  %v6833_v18 = vld [vmem:[#allocation2 + $0xf0] sm:$0xff] }
 0x1f6   : > { %2644 = vst.msk [vmem:[#allocation4 + $0x10] sm:$0xff] %vm2577_vm5, %v6717_v13  ;;  %2662 = vst.msk [vmem:[#allocation4 + $0xa0] sm:$0xff] %vm2577_vm5, %v6833_v18 }
 0x1f7   : > { %v1426_v6 = vpop.permute.xlu1 %1425  ;;  %v1424_v40 = vpop.permute.xlu0 %1423 }
 0x1f8   : > { %1491 = vst.msk [vmem:[#allocation3 + $0x1f0] sm:$0xff] %vm1459_vm9, %v1426_v6  ;;  %1490 = vst.msk [vmem:[#allocation3 + $0x1e0] sm:$0xff] %vm1459_vm9, %v1424_v40 }
 0x1f9   : > { %1800 = vrot.lane.b32.xlu1 %v6571_v24, %s5439_s10  ;;  %1798 = vrot.lane.b32.xlu0 %v6563_v16, %s5439_s10  ;;  %v1716_v24 = vld [vmem:[#allocation2 + $0x199] sm:$0xff] }
 0x1fb   : > { %v1560_v62 = vpop.permute.xlu1 %1559  ;;  %v1558_v17 = vpop.permute.xlu0 %1557 }
 0x1fc   : > { %1655 = vst.msk [vmem:[#allocation3 + $0x10] sm:$0xff] %vm1653_vm10, %v1560_v62  ;;  %1654 = vst.msk [vmem:[#allocation3] sm:$0xff] %vm1653_vm10, %v1558_v17  ;;  %v2690_v62 = vld [vmem:[#allocation2 + $0xc1] sm:$0xff] }
 0x1fd   : > { %1804 = vrot.lane.b32.xlu1 %v6591_v4, %s5439_s10  ;;  %1802 = vrot.lane.b32.xlu0 %v6584_v27, %s5439_s10  ;;  %v1909_v27 = vld [vmem:[#allocation2 + $0x19a] sm:$0xff]  ;;  %v6845_v17 = vld [vmem:[#allocation2 + $0x108] sm:$0xff] }
 0x1fe   : > { %1941 = vst.msk [vmem:[#allocation3 + $0x1e8] sm:$0xff] %vm493_vm3, %v1909_v27 }
 0x1ff   : > { %v1564_v15 = vpop.permute.xlu1 %1563  ;;  %v1562_v16 = vpop.permute.xlu0 %1561  ;;  %2664 = vst.msk [vmem:[#allocation4 + $0xb0] sm:$0xff] %vm2577_vm5, %v6845_v17 }
 0x200   : > { %1657 = vst.msk [vmem:[#allocation3 + $0x30] sm:$0xff] %vm1653_vm10, %v1564_v15  ;;  %1656 = vst.msk [vmem:[#allocation3 + $0x20] sm:$0xff] %vm1653_vm10, %v1562_v16 }
 0x201   : > { %1808 = vrot.lane.b32.xlu1 %v6127_v22, %s5439_s10  ;;  %1806 = vrot.lane.b32.xlu0 %v6131_v45, %s5439_s10  ;;  %v2675_v22 = vld [vmem:[#allocation2 + $0x9] sm:$0xff]  ;;  %v2674_v45 = vld [vmem:[#allocation2 + $0x1] sm:$0xff] }
 0x203   : > { %v1568_v31 = vpop.permute.xlu1 %1567  ;;  %v1566_v21 = vpop.permute.xlu0 %1565 }
 0x204   : > { %1659 = vst.msk [vmem:[#allocation3 + $0x50] sm:$0xff] %vm1653_vm10, %v1568_v31  ;;  %1658 = vst.msk [vmem:[#allocation3 + $0x40] sm:$0xff] %vm1653_vm10, %v1566_v21  ;;  %v2692_v31 = vld [vmem:[#allocation2 + $0xd9] sm:$0xff] }
 0x205   : > { %1812 = vrot.lane.b32.xlu1 %v1717_v20, %s5439_s10  ;;  %1810 = vrot.lane.b32.xlu0 %v1716_v24, %s5439_s10  ;;  %v6853_v20 = vld [vmem:[#allocation2 + $0x128] sm:$0xff]  ;;  %v6857_v21 = vld [vmem:[#allocation2 + $0x120] sm:$0xff] }
 0x206   : > { %v2693_v24 = vld [vmem:[#allocation2 + $0xe1] sm:$0xff]  ;;  %2667 = vst.msk [vmem:[#allocation4 + $0xc8] sm:$0xff] %vm2577_vm5, %v6853_v20  ;;  %2666 = vst.msk [vmem:[#allocation4 + $0xc0] sm:$0xff] %vm2577_vm5, %v6857_v21 }
 0x207   : > { %v1572_v3 = vpop.permute.xlu1 %1571  ;;  %v1570_v4 = vpop.permute.xlu0 %1569 }
 0x208   : > { %1661 = vst.msk [vmem:[#allocation3 + $0x70] sm:$0xff] %vm1653_vm10, %v1572_v3  ;;  %1660 = vst.msk [vmem:[#allocation3 + $0x60] sm:$0xff] %vm1653_vm10, %v1570_v4  ;;  %v2695_v3 = vld [vmem:[#allocation2 + $0xf9] sm:$0xff]  ;;  %v2694_v4 = vld [vmem:[#allocation2 + $0xf1] sm:$0xff] }
 0x209   : > { %2740 = vrot.lane.b32.xlu1 %v2675_v22, %s5440_s11  ;;  %2738 = vrot.lane.b32.xlu0 %v2674_v45, %s5440_s11  ;;  %v6865_v45 = vld [vmem:[#allocation2 + $0x140] sm:$0xff] }
 0x20a   : > { %2669 = vst.msk [vmem:[#allocation4 + $0xd8] sm:$0xff] %vm2577_vm5, %v6865_v45 }
 0x20b   : > { %v1576_v5 = vpop.permute.xlu1 %1575  ;;  %v1574_v37 = vpop.permute.xlu0 %1573 }
 0x20c   : > { %1663 = vst.msk [vmem:[#allocation3 + $0x90] sm:$0xff] %vm1653_vm10, %v1576_v5  ;;  %1662 = vst.msk [vmem:[#allocation3 + $0x80] sm:$0xff] %vm1653_vm10, %v1574_v37  ;;  %v6877_v5 = vld [vmem:[#allocation2 + $0x158] sm:$0xff] }
 0x20d   : > { %2744 = vrot.lane.b32.xlu1 %v2677_v26, %s5440_s11  ;;  %2742 = vrot.lane.b32.xlu0 %v2676_v25, %s5440_s11  ;;  %v2697_v37 = vld [vmem:[#allocation2 + $0x111] sm:$0xff]  ;;  %2671 = vst.msk [vmem:[#allocation4 + $0xe8] sm:$0xff] %vm2577_vm5, %v6877_v5 }
 0x20f   : > { %v1580_v9 = vpop.permute.xlu1 %1579  ;;  %v1578_v42 = vpop.permute.xlu0 %1577 }
 0x210   : > { %1665 = vst.msk [vmem:[#allocation3 + $0xb0] sm:$0xff] %vm1653_vm10, %v1580_v9  ;;  %1664 = vst.msk [vmem:[#allocation3 + $0xa0] sm:$0xff] %vm1653_vm10, %v1578_v42 }
 0x211   : > { %2748 = vrot.lane.b32.xlu1 %v2679_v54, %s5440_s11  ;;  %2746 = vrot.lane.b32.xlu0 %v2678_v38, %s5440_s11  ;;  %v2696_v38 = vld [vmem:[#allocation2 + $0x109] sm:$0xff] }
 0x212   : > { %v6881_v54 = vld [vmem:[#allocation2 + $0x150] sm:$0xff] }
 0x213   : > { %v1584_v56 = vpop.permute.xlu1 %1583  ;;  %v1582_v7 = vpop.permute.xlu0 %1581  ;;  %2670 = vst.msk [vmem:[#allocation4 + $0xe0] sm:$0xff] %vm2577_vm5, %v6881_v54 }
 0x214   : > { %1667 = vst.msk [vmem:[#allocation3 + $0xd0] sm:$0xff] %vm1653_vm10, %v1584_v56  ;;  %1666 = vst.msk [vmem:[#allocation3 + $0xc0] sm:$0xff] %vm1653_vm10, %v1582_v7  ;;  %v2698_v56 = vld [vmem:[#allocation2 + $0x121] sm:$0xff] }
 0x215   : > { %2752 = vrot.lane.b32.xlu1 %v2681_v50, %s5440_s11  ;;  %2750 = vrot.lane.b32.xlu0 %v2680_v55, %s5440_s11  ;;  %v6889_v50 = vld [vmem:[#allocation2 + $0x170] sm:$0xff]  ;;  %v6893_v7 = vld [vmem:[#allocation2 + $0x168] sm:$0xff] }
 0x216   : > { %v2699_v55 = vld [vmem:[#allocation2 + $0x129] sm:$0xff]  ;;  %2673 = vst.msk [vmem:[#allocation4 + $0xf8] sm:$0xff] %vm2577_vm5, %v6889_v50  ;;  %2672 = vst.msk [vmem:[#allocation4 + $0xf0] sm:$0xff] %vm2577_vm5, %v6893_v7 }
 0x217   : > { %v1588_v33 = vpop.permute.xlu1 %1587  ;;  %v1586_v0 = vpop.permute.xlu0 %1585 }
 0x218   : > { %1669 = vst.msk [vmem:[#allocation3 + $0xf0] sm:$0xff] %vm1653_vm10, %v1588_v33  ;;  %1668 = vst.msk [vmem:[#allocation3 + $0xe0] sm:$0xff] %vm1653_vm10, %v1586_v0  ;;  %v2701_v33 = vld [vmem:[#allocation2 + $0x141] sm:$0xff]  ;;  %v2700_v0 = vld [vmem:[#allocation2 + $0x139] sm:$0xff] }
 0x219   : > { %2756 = vrot.lane.b32.xlu1 %v2683_v30, %s5440_s11  ;;  %2754 = vrot.lane.b32.xlu0 %v2682_v47, %s5440_s11 }
 0x21b   : > { %v1592_v57 = vpop.permute.xlu1 %1591  ;;  %v1590_v59 = vpop.permute.xlu0 %1589 }
 0x21c   : > { %1671 = vst.msk [vmem:[#allocation3 + $0x110] sm:$0xff] %vm1653_vm10, %v1592_v57  ;;  %1670 = vst.msk [vmem:[#allocation3 + $0x100] sm:$0xff] %vm1653_vm10, %v1590_v59  ;;  %v2703_v57 = vld [vmem:[#allocation2 + $0x159] sm:$0xff]  ;;  %v2702_v59 = vld [vmem:[#allocation2 + $0x151] sm:$0xff] }
 0x21d   : > { %2760 = vrot.lane.b32.xlu1 %v2685_v39, %s5440_s11  ;;  %2758 = vrot.lane.b32.xlu0 %v2684_v53, %s5440_s11 }
 0x21f   : > { %v1596_v23 = vpop.permute.xlu1 %1595  ;;  %v1594_v2 = vpop.permute.xlu0 %1593 }
 0x220   : > { %1673 = vst.msk [vmem:[#allocation3 + $0x130] sm:$0xff] %vm1653_vm10, %v1596_v23  ;;  %1672 = vst.msk [vmem:[#allocation3 + $0x120] sm:$0xff] %vm1653_vm10, %v1594_v2  ;;  %v2705_v23 = vld [vmem:[#allocation2 + $0x171] sm:$0xff]  ;;  %v2704_v2 = vld [vmem:[#allocation2 + $0x169] sm:$0xff] }
 0x221   : > { %2764 = vrot.lane.b32.xlu1 %v2687_v61, %s5440_s11  ;;  %2762 = vrot.lane.b32.xlu0 %v2686_v11, %s5440_s11 }
 0x223   : > { %v1600_v6 = vpop.permute.xlu1 %1599  ;;  %v1598_v40 = vpop.permute.xlu0 %1597 }
 0x224   : > { %1675 = vst.msk [vmem:[#allocation3 + $0x150] sm:$0xff] %vm1653_vm10, %v1600_v6  ;;  %1674 = vst.msk [vmem:[#allocation3 + $0x140] sm:$0xff] %vm1653_vm10, %v1598_v40  ;;  %v1946_v40 = vld [vmem:[#allocation3 + $0x18] sm:$0xff] }
 0x225   : > { %2768 = vrot.lane.b32.xlu1 %v2689_v46, %s5440_s11  ;;  %2766 = vrot.lane.b32.xlu0 %v2688_v49, %s5440_s11 }
 0x227   : > { %v1604_v15 = vpop.permute.xlu1 %1603  ;;  %v1602_v16 = vpop.permute.xlu0 %1601 }
 0x228   : > { %1677 = vst.msk [vmem:[#allocation3 + $0x170] sm:$0xff] %vm1653_vm10, %v1604_v15  ;;  %1676 = vst.msk [vmem:[#allocation3 + $0x160] sm:$0xff] %vm1653_vm10, %v1602_v16 }
 0x229   : > { %2772 = vrot.lane.b32.xlu1 %v2691_v48, %s5440_s11  ;;  %2770 = vrot.lane.b32.xlu0 %v2690_v62, %s5440_s11  ;;  %v2868_v48 = vld [vmem:[#allocation2 + $0xa] sm:$0xff]  ;;  %v2867_v62 = vld [vmem:[#allocation2 + $0x2] sm:$0xff] }
 0x22b   : > { %v1608_v27 = vpop.permute.xlu1 %1607  ;;  %v1606_v22 = vpop.permute.xlu0 %1605 }
 0x22c   : > { %1679 = vst.msk [vmem:[#allocation3 + $0x190] sm:$0xff] %vm1653_vm10, %v1608_v27  ;;  %1678 = vst.msk [vmem:[#allocation3 + $0x180] sm:$0xff] %vm1653_vm10, %v1606_v22  ;;  %v2870_v27 = vld [vmem:[#allocation2 + $0x22] sm:$0xff]  ;;  %v2869_v22 = vld [vmem:[#allocation2 + $0x1a] sm:$0xff] }
 0x22d   : > { %2776 = vrot.lane.b32.xlu1 %v2693_v24, %s5440_s11  ;;  %2774 = vrot.lane.b32.xlu0 %v2692_v31, %s5440_s11  ;;  %v1948_v31 = vld [vmem:[#allocation3 + $0x28] sm:$0xff] }
 0x22f   : > { %v1612_v26 = vpop.permute.xlu1 %1611  ;;  %v1610_v25 = vpop.permute.xlu0 %1609 }
 0x230   : > { %1681 = vst.msk [vmem:[#allocation3 + $0x1b0] sm:$0xff] %vm1653_vm10, %v1612_v26  ;;  %1680 = vst.msk [vmem:[#allocation3 + $0x1a0] sm:$0xff] %vm1653_vm10, %v1610_v25  ;;  %v1950_v25 = vld [vmem:[#allocation3 + $0x38] sm:$0xff] }
 0x231   : > { %2780 = vrot.lane.b32.xlu1 %v2695_v3, %s5440_s11  ;;  %2778 = vrot.lane.b32.xlu0 %v2694_v4, %s5440_s11 }
 0x233   : > { %v1616_v9 = vpop.permute.xlu1 %1615  ;;  %v1614_v42 = vpop.permute.xlu0 %1613 }
 0x234   : > { %1683 = vst.msk [vmem:[#allocation3 + $0x1d0] sm:$0xff] %vm1653_vm10, %v1616_v9  ;;  %1682 = vst.msk [vmem:[#allocation3 + $0x1c0] sm:$0xff] %vm1653_vm10, %v1614_v42 }
 0x235   : > { %2784 = vrot.lane.b32.xlu1 %v2697_v37, %s5440_s11  ;;  %2782 = vrot.lane.b32.xlu0 %v2696_v38, %s5440_s11  ;;  %v2872_v37 = vld [vmem:[#allocation2 + $0x3a] sm:$0xff]  ;;  %v2871_v38 = vld [vmem:[#allocation2 + $0x32] sm:$0xff] }
 0x237   : > { %v1620_v30 = vpop.permute.xlu1 %1619  ;;  %v1618_v47 = vpop.permute.xlu0 %1617 }
 0x238   : > { %1685 = vst.msk [vmem:[#allocation3 + $0x1f0] sm:$0xff] %vm1653_vm10, %v1620_v30  ;;  %1684 = vst.msk [vmem:[#allocation3 + $0x1e0] sm:$0xff] %vm1653_vm10, %v1618_v47  ;;  %v2874_v30 = vld [vmem:[#allocation2 + $0x52] sm:$0xff]  ;;  %v2873_v47 = vld [vmem:[#allocation2 + $0x4a] sm:$0xff] }
 0x239   : > { %2788 = vrot.lane.b32.xlu1 %v2699_v55, %s5440_s11  ;;  %2786 = vrot.lane.b32.xlu0 %v2698_v56, %s5440_s11  ;;  %v1952_v56 = vld [vmem:[#allocation3 + $0x48] sm:$0xff] }
 0x23b   : > { %v1753_v39 = vpop.permute.xlu1 %1752  ;;  %v1751_v53 = vpop.permute.xlu0 %1750 }
 0x23c   : > { %1848 = vst.msk [vmem:[#allocation3 + $0x10] sm:$0xff] %vm1846_vm11, %v1753_v39  ;;  %1847 = vst.msk [vmem:[#allocation3] sm:$0xff] %vm1846_vm11, %v1751_v53  ;;  %v1954_v53 = vld [vmem:[#allocation3 + $0x58] sm:$0xff] }
 0x23d   : > { %2792 = vrot.lane.b32.xlu1 %v2701_v33, %s5440_s11  ;;  %2790 = vrot.lane.b32.xlu0 %v2700_v0, %s5440_s11 }
 0x23f   : > { %v1757_v61 = vpop.permute.xlu1 %1756  ;;  %v1755_v11 = vpop.permute.xlu0 %1754 }
 0x240   : > { %1850 = vst.msk [vmem:[#allocation3 + $0x30] sm:$0xff] %vm1846_vm11, %v1757_v61  ;;  %1849 = vst.msk [vmem:[#allocation3 + $0x20] sm:$0xff] %vm1846_vm11, %v1755_v11 }
 0x241   : > { %2796 = vrot.lane.b32.xlu1 %v2703_v57, %s5440_s11  ;;  %2794 = vrot.lane.b32.xlu0 %v2702_v59, %s5440_s11  ;;  %v2876_v57 = vld [vmem:[#allocation2 + $0x6a] sm:$0xff]  ;;  %v2875_v59 = vld [vmem:[#allocation2 + $0x62] sm:$0xff] }
 0x243   : > { %v1761_v46 = vpop.permute.xlu1 %1760  ;;  %v1759_v49 = vpop.permute.xlu0 %1758  ;;  %v1943_v6 = vld [vmem:[#allocation3] sm:$0xff]  ;;  %v1945_v24 = vld [vmem:[#allocation3 + $0x10] sm:$0xff] }
 0x244   : > { %1852 = vst.msk [vmem:[#allocation3 + $0x50] sm:$0xff] %vm1846_vm11, %v1761_v46  ;;  %1851 = vst.msk [vmem:[#allocation3 + $0x40] sm:$0xff] %vm1846_vm11, %v1759_v49  ;;  %2193 = vmatmul.mubr.f32.vlgmr.msra.gmra.mxu0 %v1943_v6  ;;  %v2878_v46 = vld [vmem:[#allocation2 + $0x82] sm:$0xff]  ;;  %v2877_v49 = vld [vmem:[#allocation2 + $0x7a] sm:$0xff] }
 0x245   : > { %2800 = vrot.lane.b32.xlu1 %v2705_v23, %s5440_s11  ;;  %2798 = vrot.lane.b32.xlu0 %v2704_v2, %s5440_s11  ;;  %v1956_v2 = vld [vmem:[#allocation3 + $0x68] sm:$0xff] }
 0x246   : > { %4965 = vmatprep.mubr.msk.f32.mxu0 %vm493_vm3, %v1946_v40 }
 0x247   : > { %v1765_v15 = vpop.permute.xlu1 %1764  ;;  %v1763_v16 = vpop.permute.xlu0 %1762  ;;  %v1947_v26 = vld [vmem:[#allocation3 + $0x20] sm:$0xff]  ;;  %v1949_v55 = vld [vmem:[#allocation3 + $0x30] sm:$0xff] }
 0x248   : > { %1854 = vst.msk [vmem:[#allocation3 + $0x70] sm:$0xff] %vm1846_vm11, %v1765_v15  ;;  %1853 = vst.msk [vmem:[#allocation3 + $0x60] sm:$0xff] %vm1846_vm11, %v1763_v16  ;;  %2198 = vmatmul.mubr.f32.gmra.mxu0 %v1945_v24  ;;  %v2880_v15 = vld [vmem:[#allocation2 + $0x9a] sm:$0xff]  ;;  %v2879_v16 = vld [vmem:[#allocation2 + $0x92] sm:$0xff] }
 0x249   : > { %2933 = vrot.lane.b32.xlu1 %v2868_v48, %s5432_s26  ;;  %2931 = vrot.lane.b32.xlu0 %v2867_v62, %s5432_s26  ;;  %v1958_v62 = vld [vmem:[#allocation3 + $0x78] sm:$0xff] }
 0x24a   : > { %4966 = vmatprep.mubr.msk.f32.mxu0 %vm493_vm3, %v1948_v31 }
 0x24b   : > { %v1769_v3 = vpop.permute.xlu1 %1768  ;;  %v1767_v4 = vpop.permute.xlu0 %1766  ;;  %v1951_v39 = vld [vmem:[#allocation3 + $0x40] sm:$0xff]  ;;  %v1953_v23 = vld [vmem:[#allocation3 + $0x50] sm:$0xff] }
 0x24c   : > { %1856 = vst.msk [vmem:[#allocation3 + $0x90] sm:$0xff] %vm1846_vm11, %v1769_v3  ;;  %1855 = vst.msk [vmem:[#allocation3 + $0x80] sm:$0xff] %vm1846_vm11, %v1767_v4  ;;  %2203 = vmatmul.mubr.f32.gmra.mxu0 %v1947_v26  ;;  %v2882_v3 = vld [vmem:[#allocation2 + $0xb2] sm:$0xff]  ;;  %v2881_v4 = vld [vmem:[#allocation2 + $0xaa] sm:$0xff] }
 0x24d   : > { %2937 = vrot.lane.b32.xlu1 %v2870_v27, %s5432_s26  ;;  %2935 = vrot.lane.b32.xlu0 %v2869_v22, %s5432_s26  ;;  %v1960_v22 = vld [vmem:[#allocation3 + $0x88] sm:$0xff] }
 0x24e   : > { %4967 = vmatprep.mubr.msk.f32.mxu0 %vm493_vm3, %v1950_v25 }
 0x24f   : > { %v1773_v9 = vpop.permute.xlu1 %1772  ;;  %v1771_v42 = vpop.permute.xlu0 %1770  ;;  %v1955_v48 = vld [vmem:[#allocation3 + $0x60] sm:$0xff]  ;;  %v1957_v27 = vld [vmem:[#allocation3 + $0x70] sm:$0xff] }
 0x250   : > { %1858 = vst.msk [vmem:[#allocation3 + $0xb0] sm:$0xff] %vm1846_vm11, %v1773_v9  ;;  %1857 = vst.msk [vmem:[#allocation3 + $0xa0] sm:$0xff] %vm1846_vm11, %v1771_v42  ;;  %2208 = vmatmul.mubr.f32.gmra.mxu0 %v1949_v55  ;;  %v2884_v9 = vld [vmem:[#allocation2 + $0xca] sm:$0xff]  ;;  %v2883_v42 = vld [vmem:[#allocation2 + $0xc2] sm:$0xff] }
 0x251   : > { %2941 = vrot.lane.b32.xlu1 %v2872_v37, %s5432_s26  ;;  %2939 = vrot.lane.b32.xlu0 %v2871_v38, %s5432_s26  ;;  %v1962_v38 = vld [vmem:[#allocation3 + $0x98] sm:$0xff] }
 0x252   : > { %4968 = vmatprep.mubr.msk.f32.mxu0 %vm493_vm3, %v1952_v56 }
 0x253   : > { %v1777_v33 = vpop.permute.xlu1 %1776  ;;  %v1775_v0 = vpop.permute.xlu0 %1774  ;;  %v1959_v37 = vld [vmem:[#allocation3 + $0x80] sm:$0xff] }
 0x254   : > { %1860 = vst.msk [vmem:[#allocation3 + $0xd0] sm:$0xff] %vm1846_vm11, %v1777_v33  ;;  %1859 = vst.msk [vmem:[#allocation3 + $0xc0] sm:$0xff] %vm1846_vm11, %v1775_v0  ;;  %2213 = vmatmul.mubr.f32.gmra.mxu0 %v1951_v39  ;;  %v2886_v33 = vld [vmem:[#allocation2 + $0xe2] sm:$0xff]  ;;  %v2885_v0 = vld [vmem:[#allocation2 + $0xda] sm:$0xff] }
 0x255   : > { %2945 = vrot.lane.b32.xlu1 %v2874_v30, %s5432_s26  ;;  %2943 = vrot.lane.b32.xlu0 %v2873_v47, %s5432_s26  ;;  %v1961_v30 = vld [vmem:[#allocation3 + $0x90] sm:$0xff]  ;;  %v1964_v47 = vld [vmem:[#allocation3 + $0xa8] sm:$0xff] }
 0x256   : > { %4969 = vmatprep.mubr.msk.f32.mxu0 %vm493_vm3, %v1954_v53 }
 0x257   : > { %v1781_v61 = vpop.permute.xlu1 %1780  ;;  %v1779_v11 = vpop.permute.xlu0 %1778 }
 0x258   : > { %1862 = vst.msk [vmem:[#allocation3 + $0xf0] sm:$0xff] %vm1846_vm11, %v1781_v61  ;;  %1861 = vst.msk [vmem:[#allocation3 + $0xe0] sm:$0xff] %vm1846_vm11, %v1779_v11  ;;  %2218 = vmatmul.mubr.f32.gmra.mxu0 %v1953_v23  ;;  %v2888_v61 = vld [vmem:[#allocation2 + $0xfa] sm:$0xff]  ;;  %v2887_v11 = vld [vmem:[#allocation2 + $0xf2] sm:$0xff] }
 0x259   : > { %2949 = vrot.lane.b32.xlu1 %v2876_v57, %s5432_s26  ;;  %2947 = vrot.lane.b32.xlu0 %v2875_v59, %s5432_s26  ;;  %v1963_v57 = vld [vmem:[#allocation3 + $0xa0] sm:$0xff]  ;;  %v1966_v59 = vld [vmem:[#allocation3 + $0xb8] sm:$0xff] }
 0x25a   : > { %4970 = vmatprep.mubr.msk.f32.mxu0 %vm493_vm3, %v1956_v2 }
 0x25b   : > { %v1785_v6 = vpop.permute.xlu1 %1784  ;;  %v1783_v40 = vpop.permute.xlu0 %1782 }
 0x25c   : > { %1864 = vst.msk [vmem:[#allocation3 + $0x110] sm:$0xff] %vm1846_vm11, %v1785_v6  ;;  %1863 = vst.msk [vmem:[#allocation3 + $0x100] sm:$0xff] %vm1846_vm11, %v1783_v40  ;;  %2223 = vmatmul.mubr.f32.gmra.mxu0 %v1955_v48  ;;  %v2890_v6 = vld [vmem:[#allocation2 + $0x112] sm:$0xff]  ;;  %v2889_v40 = vld [vmem:[#allocation2 + $0x10a] sm:$0xff] }
 0x25d   : > { %2953 = vrot.lane.b32.xlu1 %v2878_v46, %s5432_s26  ;;  %2951 = vrot.lane.b32.xlu0 %v2877_v49, %s5432_s26  ;;  %v1965_v46 = vld [vmem:[#allocation3 + $0xb0] sm:$0xff]  ;;  %v1968_v49 = vld [vmem:[#allocation3 + $0xc8] sm:$0xff]  ;;  %v1970_v48 = vld [vmem:[#allocation3 + $0xd8] sm:$0xff] }
 0x25e   : > { %4971 = vmatprep.mubr.msk.f32.mxu0 %vm493_vm3, %v1958_v62 }
 0x25f   : > { %v1789_v24 = vpop.permute.xlu1 %1788  ;;  %v1787_v31 = vpop.permute.xlu0 %1786 }
 0x260   : > { %1866 = vst.msk [vmem:[#allocation3 + $0x130] sm:$0xff] %vm1846_vm11, %v1789_v24  ;;  %1865 = vst.msk [vmem:[#allocation3 + $0x120] sm:$0xff] %vm1846_vm11, %v1787_v31  ;;  %2228 = vmatmul.mubr.f32.gmra.mxu0 %v1957_v27  ;;  %v1994_v31 = vld [vmem:[#allocation3 + $0x198] sm:$0xff] }
 0x261   : > { %2957 = vrot.lane.b32.xlu1 %v2880_v15, %s5432_s26  ;;  %2955 = vrot.lane.b32.xlu0 %v2879_v16, %s5432_s26  ;;  %v1967_v16 = vld [vmem:[#allocation3 + $0xc0] sm:$0xff] }
 0x262   : > { %4972 = vmatprep.mubr.msk.f32.mxu0 %vm493_vm3, %v1960_v22  ;;  %v2892_v27 = vld [vmem:[#allocation2 + $0x12a] sm:$0xff]  ;;  %v2891_v22 = vld [vmem:[#allocation2 + $0x122] sm:$0xff] }
 0x263   : > { %v1793_v26 = vpop.permute.xlu1 %1792  ;;  %v1791_v25 = vpop.permute.xlu0 %1790 }
 0x264   : > { %1868 = vst.msk [vmem:[#allocation3 + $0x150] sm:$0xff] %vm1846_vm11, %v1793_v26  ;;  %1867 = vst.msk [vmem:[#allocation3 + $0x140] sm:$0xff] %vm1846_vm11, %v1791_v25  ;;  %2233 = vmatmul.mubr.f32.gmra.mxu0 %v1959_v37  ;;  %v1969_v25 = vld [vmem:[#allocation3 + $0xd0] sm:$0xff] }
 0x265   : > { %2961 = vrot.lane.b32.xlu1 %v2882_v3, %s5432_s26  ;;  %2959 = vrot.lane.b32.xlu0 %v2881_v4, %s5432_s26  ;;  %v1972_v3 = vld [vmem:[#allocation3 + $0xe8] sm:$0xff] }
 0x266   : > { %4973 = vmatprep.mubr.msk.f32.mxu0 %vm493_vm3, %v1962_v38  ;;  %v1996_v38 = vld [vmem:[#allocation3 + $0x1a8] sm:$0xff] }
 0x267   : > { %v1797_v55 = vpop.permute.xlu1 %1796  ;;  %v1795_v56 = vpop.permute.xlu0 %1794 }
 0x268   : > { %1870 = vst.msk [vmem:[#allocation3 + $0x170] sm:$0xff] %vm1846_vm11, %v1797_v55  ;;  %1869 = vst.msk [vmem:[#allocation3 + $0x160] sm:$0xff] %vm1846_vm11, %v1795_v56  ;;  %2238 = vmatmul.mubr.f32.gmra.mxu0 %v1961_v30  ;;  %v1998_v55 = vld [vmem:[#allocation3 + $0x1b8] sm:$0xff] }
 0x269   : > { %2965 = vrot.lane.b32.xlu1 %v2884_v9, %s5432_s26  ;;  %2963 = vrot.lane.b32.xlu0 %v2883_v42, %s5432_s26  ;;  %v2894_v9 = vld [vmem:[#allocation2 + $0x142] sm:$0xff]  ;;  %v2893_v42 = vld [vmem:[#allocation2 + $0x13a] sm:$0xff] }
 0x26a   : > { %4974 = vmatprep.mubr.msk.f32.mxu0 %vm493_vm3, %v1964_v47  ;;  %v1971_v47 = vld [vmem:[#allocation3 + $0xe0] sm:$0xff] }
 0x26b   : > { %v1801_v39 = vpop.permute.xlu1 %1800  ;;  %v1799_v53 = vpop.permute.xlu0 %1798 }
 0x26c   : > { %1872 = vst.msk [vmem:[#allocation3 + $0x190] sm:$0xff] %vm1846_vm11, %v1801_v39  ;;  %1871 = vst.msk [vmem:[#allocation3 + $0x180] sm:$0xff] %vm1846_vm11, %v1799_v53  ;;  %2243 = vmatmul.mubr.f32.gmra.mxu0 %v1963_v57  ;;  %v2896_v39 = vld [vmem:[#allocation2 + $0x15a] sm:$0xff]  ;;  %v2895_v53 = vld [vmem:[#allocation2 + $0x152] sm:$0xff] }
 0x26d   : > { %2969 = vrot.lane.b32.xlu1 %v2886_v33, %s5432_s26  ;;  %2967 = vrot.lane.b32.xlu0 %v2885_v0, %s5432_s26  ;;  %v1974_v0 = vld [vmem:[#allocation3 + $0xf8] sm:$0xff]  ;;  %v2000_v57 = vld [vmem:[#allocation3 + $0x1c8] sm:$0xff] }
 0x26e   : > { %4975 = vmatprep.mubr.msk.f32.mxu0 %vm493_vm3, %v1966_v59 }
 0x26f   : > { %v1805_v23 = vpop.permute.xlu1 %1804  ;;  %v1803_v2 = vpop.permute.xlu0 %1802 }
 0x270   : > { %1874 = vst.msk [vmem:[#allocation3 + $0x1b0] sm:$0xff] %vm1846_vm11, %v1805_v23  ;;  %1873 = vst.msk [vmem:[#allocation3 + $0x1a0] sm:$0xff] %vm1846_vm11, %v1803_v2  ;;  %2248 = vmatmul.mubr.f32.gmra.mxu0 %v1965_v46  ;;  %v1976_v2 = vld [vmem:[#allocation3 + $0x108] sm:$0xff] }
 0x271   : > { %2973 = vrot.lane.b32.xlu1 %v2888_v61, %s5432_s26  ;;  %2971 = vrot.lane.b32.xlu0 %v2887_v11, %s5432_s26  ;;  %v1973_v11 = vld [vmem:[#allocation3 + $0xf0] sm:$0xff]  ;;  %v2898_v46 = vld [vmem:[#allocation2 + $0x172] sm:$0xff] }
 0x272   : > { %4976 = vmatprep.mubr.msk.f32.mxu0 %vm493_vm3, %v1968_v49  ;;  %v2897_v49 = vld [vmem:[#allocation2 + $0x16a] sm:$0xff] }
 0x273   : > { %v1809_v62 = vpop.permute.xlu1 %1808  ;;  %v1807_v15 = vpop.permute.xlu0 %1806  ;;  %v1991_v24 = vld [vmem:[#allocation3 + $0x180] sm:$0xff]  ;;  %v1993_v37 = vld [vmem:[#allocation3 + $0x190] sm:$0xff] }
 0x274   : > { %1876 = vst.msk [vmem:[#allocation3 + $0x1d0] sm:$0xff] %vm1846_vm11, %v1809_v62  ;;  %1875 = vst.msk [vmem:[#allocation3 + $0x1c0] sm:$0xff] %vm1846_vm11, %v1807_v15  ;;  %2253 = vmatmul.mubr.f32.gmra.mxu0 %v1967_v16  ;;  %2313 = vmatmul.mubr.f32.vlgmr.msra.gmra.mxu1 %v1991_v24  ;;  %v1975_v62 = vld [vmem:[#allocation3 + $0x100] sm:$0xff]  ;;  %v1978_v16 = vld [vmem:[#allocation3 + $0x118] sm:$0xff] }
 0x275   : > { %2977 = vrot.lane.b32.xlu1 %v2890_v6, %s5432_s26  ;;  %2975 = vrot.lane.b32.xlu0 %v2889_v40, %s5432_s26  ;;  %v2002_v6 = vld [vmem:[#allocation3 + $0x1d8] sm:$0xff]  ;;  %v1980_v24 = vld [vmem:[#allocation3 + $0x128] sm:$0xff] }
 0x276   : > { %4977 = vmatprep.mubr.msk.f32.mxu0 %vm493_vm3, %v1970_v48  ;;  %4989 = vmatprep.mubr.msk.f32.mxu1 %vm493_vm3, %v1994_v31 }
 0x277   : > { %v1813_v4 = vpop.permute.xlu1 %1812  ;;  %v1811_v26 = vpop.permute.xlu0 %1810  ;;  %v1995_v33 = vld [vmem:[#allocation3 + $0x1a0] sm:$0xff]  ;;  %v1997_v23 = vld [vmem:[#allocation3 + $0x1b0] sm:$0xff] }
 0x278   : > { %1878 = vst.msk [vmem:[#allocation3 + $0x1f0] sm:$0xff] %vm1846_vm11, %v1813_v4  ;;  %1877 = vst.msk [vmem:[#allocation3 + $0x1e0] sm:$0xff] %vm1846_vm11, %v1811_v26  ;;  %2258 = vmatmul.mubr.f32.gmra.mxu0 %v1969_v25  ;;  %2318 = vmatmul.mubr.f32.gmra.mxu1 %v1993_v37  ;;  %v2004_v4 = vld [vmem:[#allocation3 + $0x1e8] sm:$0xff]  ;;  %v1982_v26 = vld [vmem:[#allocation3 + $0x138] sm:$0xff] }
 0x279   : > { %2981 = vrot.lane.b32.xlu1 %v2892_v27, %s5432_s26  ;;  %2979 = vrot.lane.b32.xlu0 %v2891_v22, %s5432_s26  ;;  %v1977_v22 = vld [vmem:[#allocation3 + $0x110] sm:$0xff] }
 0x27a   : > { %4978 = vmatprep.mubr.msk.f32.mxu0 %vm493_vm3, %v1972_v3  ;;  %4990 = vmatprep.mubr.msk.f32.mxu1 %vm493_vm3, %v1996_v38  ;;  %v1979_v38 = vld [vmem:[#allocation3 + $0x120] sm:$0xff] }
 0x27b   : > { %v2741_v56 = vpop.permute.xlu1 %2740  ;;  %v2739_v30 = vpop.permute.xlu0 %2738  ;;  %v1999_v15 = vld [vmem:[#allocation3 + $0x1c0] sm:$0xff]  ;;  %v2001_v3 = vld [vmem:[#allocation3 + $0x1d0] sm:$0xff] }
 0x27c   : > { %2836 = vst.msk [vmem:[#allocation4 + $0x8] sm:$0xff] %vm2834_vm12, %v2741_v56  ;;  %2835 = vst.msk [vmem:[#allocation4] sm:$0xff] %vm2834_vm12, %v2739_v30  ;;  %2263 = vmatmul.mubr.f32.gmra.mxu0 %v1971_v47  ;;  %2323 = vmatmul.mubr.f32.gmra.mxu1 %v1995_v33  ;;  %v1984_v30 = vld [vmem:[#allocation3 + $0x148] sm:$0xff] }
 0x27d   : > { %2985 = vrot.lane.b32.xlu1 %v2894_v9, %s5432_s26  ;;  %2983 = vrot.lane.b32.xlu0 %v2893_v42, %s5432_s26  ;;  %v2006_v42 = vld [vmem:[#allocation3 + $0x1f8] sm:$0xff] }
 0x27e   : > { %4991 = vmatprep.mubr.msk.f32.mxu1 %vm493_vm3, %v1998_v55  ;;  %4979 = vmatprep.mubr.msk.f32.mxu0 %vm493_vm3, %v1974_v0  ;;  %v1981_v55 = vld [vmem:[#allocation3 + $0x130] sm:$0xff]  ;;  %v1983_v0 = vld [vmem:[#allocation3 + $0x140] sm:$0xff] }
 0x27f   : > { %v2745_v59 = vpop.permute.xlu1 %2744  ;;  %v2743_v61 = vpop.permute.xlu0 %2742  ;;  %v2003_v9 = vld [vmem:[#allocation3 + $0x1e0] sm:$0xff]  ;;  %v2005_v56 = vld [vmem:[#allocation3 + $0x1f0] sm:$0xff] }
 0x280   : > { %2838 = vst.msk [vmem:[#allocation4 + $0x18] sm:$0xff] %vm2834_vm12, %v2745_v59  ;;  %2837 = vst.msk [vmem:[#allocation4 + $0x10] sm:$0xff] %vm2834_vm12, %v2743_v61  ;;  %2268 = vmatmul.mubr.f32.gmra.mxu0 %v1973_v11  ;;  %2328 = vmatmul.mubr.f32.gmra.mxu1 %v1997_v23  ;;  %v1985_v59 = vld [vmem:[#allocation3 + $0x150] sm:$0xff]  ;;  %v1988_v61 = vld [vmem:[#allocation3 + $0x168] sm:$0xff] }
 0x281   : > { %2989 = vrot.lane.b32.xlu1 %v2896_v39, %s5432_s26  ;;  %2987 = vrot.lane.b32.xlu0 %v2895_v53, %s5432_s26  ;;  %v1986_v39 = vld [vmem:[#allocation3 + $0x158] sm:$0xff] }
 0x282   : > { %4992 = vmatprep.mubr.msk.f32.mxu1 %vm493_vm3, %v2000_v57  ;;  %4980 = vmatprep.mubr.msk.f32.mxu0 %vm493_vm3, %v1976_v2  ;;  %v1987_v2 = vld [vmem:[#allocation3 + $0x160] sm:$0xff] }
 0x283   : > { %v2749_v40 = vpop.permute.xlu1 %2748  ;;  %v2747_v48 = vpop.permute.xlu0 %2746 }
 0x284   : > { %2840 = vst.msk [vmem:[#allocation4 + $0x28] sm:$0xff] %vm2834_vm12, %v2749_v40  ;;  %2839 = vst.msk [vmem:[#allocation4 + $0x20] sm:$0xff] %vm2834_vm12, %v2747_v48  ;;  %2273 = vmatmul.mubr.f32.gmra.mxu0 %v1975_v62  ;;  %2333 = vmatmul.mubr.f32.gmra.mxu1 %v1999_v15 }
 0x285   : > { %2993 = vrot.lane.b32.xlu1 %v2898_v46, %s5432_s26  ;;  %2991 = vrot.lane.b32.xlu0 %v2897_v49, %s5432_s26  ;;  %v1990_v46 = vld [vmem:[#allocation3 + $0x178] sm:$0xff] }
 0x286   : > { %4993 = vmatprep.mubr.msk.f32.mxu1 %vm493_vm3, %v2002_v6  ;;  %4981 = vmatprep.mubr.msk.f32.mxu0 %vm493_vm3, %v1978_v16  ;;  %v1989_v6 = vld [vmem:[#allocation3 + $0x170] sm:$0xff] }
 0x287   : > { %v2753_v31 = vpop.permute.xlu1 %2752  ;;  %v2751_v27 = vpop.permute.xlu0 %2750 }
 0x288   : > { %2842 = vst.msk [vmem:[#allocation4 + $0x38] sm:$0xff] %vm2834_vm12, %v2753_v31  ;;  %2841 = vst.msk [vmem:[#allocation4 + $0x30] sm:$0xff] %vm2834_vm12, %v2751_v27  ;;  %2278 = vmatmul.mubr.f32.gmra.mxu0 %v1977_v22  ;;  %2338 = vmatmul.mubr.f32.gmra.mxu1 %v2001_v3  ;;  %v7115_v22 = vld [vmem:[#allocation2 + $0x51] sm:$0xff]  ;;  %v7117_v3 = vld [vmem:[#allocation2 + $0x49] sm:$0xff] }
 0x289   : > { %3126 = vrot.lane.b32.xlu1 %v6719_v19, %s5441_s12  ;;  %3124 = vrot.lane.b32.xlu0 %v6717_v13, %s5441_s12 }
 0x28a   : > { %4994 = vmatprep.mubr.msk.f32.mxu1 %vm493_vm3, %v2004_v4  ;;  %4982 = vmatprep.mubr.msk.f32.mxu0 %vm493_vm3, %v1980_v24 }
 0x28b   : > { %v2757_v25 = vpop.permute.xlu1 %2756  ;;  %v2755_v37 = vpop.permute.xlu0 %2754 }
 0x28c   : > { %2844 = vst.msk [vmem:[#allocation4 + $0x48] sm:$0xff] %vm2834_vm12, %v2757_v25  ;;  %2843 = vst.msk [vmem:[#allocation4 + $0x40] sm:$0xff] %vm2834_vm12, %v2755_v37  ;;  %2283 = vmatmul.mubr.f32.gmra.mxu0 %v1979_v38  ;;  %2343 = vmatmul.mubr.f32.gmra.mxu1 %v2003_v9  ;;  %v7125_v25 = vld [vmem:[#allocation2 + $0x69] sm:$0xff]  ;;  %v7127_v37 = vld [vmem:[#allocation2 + $0x61] sm:$0xff] }
 0x28d   : > { %3130 = vrot.lane.b32.xlu1 %v6731_v29, %s5441_s12  ;;  %3128 = vrot.lane.b32.xlu0 %v6733_v1, %s5441_s12 }
 0x28e   : > { %4995 = vmatprep.mubr.msk.f32.mxu1 %vm493_vm3, %v2006_v42  ;;  %4983 = vmatprep.mubr.msk.f32.mxu0 %vm493_vm3, %v1982_v26  ;;  %v7135_v42 = vld [vmem:[#allocation2 + $0x81] sm:$0xff] }
 0x28f   : > { %v2761_v13 = vpop.permute.xlu1 %2760  ;;  %v2759_v19 = vpop.permute.xlu0 %2758 }
 0x290   : > { %2846 = vst.msk [vmem:[#allocation4 + $0x58] sm:$0xff] %vm2834_vm12, %v2761_v13  ;;  %2845 = vst.msk [vmem:[#allocation4 + $0x50] sm:$0xff] %vm2834_vm12, %v2759_v19  ;;  %2288 = vmatmul.mubr.f32.gmra.mxu0 %v1981_v55  ;;  %2348 = vmatmul.mubr.f32.gmra.mxu1 %v2005_v56  ;;  %v7137_v13 = vld [vmem:[#allocation2 + $0x79] sm:$0xff] }
 0x291   : > { %3134 = vrot.lane.b32.xlu1 %v6744_v28, %s5441_s12  ;;  %3132 = vrot.lane.b32.xlu0 %v6746_v36, %s5441_s12  ;;  %v7145_v56 = vld [vmem:[#allocation2 + $0x99] sm:$0xff] }
 0x292   : > { %4984 = vmatprep.mubr.msk.f32.mxu0 %vm493_vm3, %v1984_v30  ;;  %v7147_v30 = vld [vmem:[#allocation2 + $0x91] sm:$0xff] }
 0x293   : > { %v2765_v47 = vpop.permute.xlu1 %2764  ;;  %v2763_v33 = vpop.permute.xlu0 %2762 }
 0x294   : > { %2848 = vst.msk [vmem:[#allocation4 + $0x68] sm:$0xff] %vm2834_vm12, %v2765_v47  ;;  %2847 = vst.msk [vmem:[#allocation4 + $0x60] sm:$0xff] %vm2834_vm12, %v2763_v33  ;;  %2293 = vmatmul.mubr.f32.gmra.mxu0 %v1983_v0  ;;  %v7155_v0 = vld [vmem:[#allocation2 + $0xb1] sm:$0xff] }
 0x295   : > { %3138 = vrot.lane.b32.xlu1 %v6757_v52, %s5441_s12  ;;  %3136 = vrot.lane.b32.xlu0 %v6759_v35, %s5441_s12 }
 0x296   : > { %4985 = vmatprep.mubr.msk.f32.mxu0 %vm493_vm3, %v1986_v39  ;;  %v7157_v39 = vld [vmem:[#allocation2 + $0xa9] sm:$0xff] }
 0x297   : > { %v2769_v53 = vpop.permute.xlu1 %2768  ;;  %v2767_v57 = vpop.permute.xlu0 %2766 }
 0x298   : > { %2850 = vst.msk [vmem:[#allocation4 + $0x78] sm:$0xff] %vm2834_vm12, %v2769_v53  ;;  %2849 = vst.msk [vmem:[#allocation4 + $0x70] sm:$0xff] %vm2834_vm12, %v2767_v57  ;;  %2298 = vmatmul.mubr.f32.gmra.mxu0 %v1985_v59  ;;  %v7165_v59 = vld [vmem:[#allocation2 + $0xc9] sm:$0xff] }
 0x299   : > { %3142 = vrot.lane.b32.xlu1 %v6769_v41, %s5441_s12  ;;  %3140 = vrot.lane.b32.xlu0 %v6771_v10, %s5441_s12 }
 0x29a   : > { %4986 = vmatprep.mubr.msk.f32.mxu0 %vm493_vm3, %v1988_v61  ;;  %v7167_v61 = vld [vmem:[#allocation2 + $0xc1] sm:$0xff] }
 0x29b   : > { %v2773_v11 = vpop.permute.xlu1 %2772  ;;  %v2771_v23 = vpop.permute.xlu0 %2770 }
 0x29c   : > { %2852 = vst.msk [vmem:[#allocation4 + $0x88] sm:$0xff] %vm2834_vm12, %v2773_v11  ;;  %2851 = vst.msk [vmem:[#allocation4 + $0x80] sm:$0xff] %vm2834_vm12, %v2771_v23  ;;  %2303 = vmatmul.mubr.f32.gmra.mxu0 %v1987_v2  ;;  %v3270_v2 = vld [vmem:[#allocation2 + $0xe1] sm:$0xff] }
 0x29d   : > { %3146 = vrot.lane.b32.xlu1 %v6781_v44, %s5441_s12  ;;  %3144 = vrot.lane.b32.xlu0 %v6785_v14, %s5441_s12 }
 0x29e   : > { %4987 = vmatprep.mubr.msk.f32.mxu0 %vm493_vm3, %v1990_v46  ;;  %v3269_v46 = vld [vmem:[#allocation2 + $0xd9] sm:$0xff]  ;;  %vm4185_vm3 = vcmask 589312  }
 0x29f   : > { %v2777_v41 = vpop.permute.xlu1 %2776  ;;  %v2775_v49 = vpop.permute.xlu0 %2774 }
 0x2a0   : > { %2854 = vst.msk [vmem:[#allocation4 + $0x98] sm:$0xff] %vm2834_vm12, %v2777_v41  ;;  %2853 = vst.msk [vmem:[#allocation4 + $0x90] sm:$0xff] %vm2834_vm12, %v2775_v49  ;;  %2308 = vmatmul.mubr.f32.gmra.mxu0 %v1989_v6  ;;  %v3272_v6 = vld [vmem:[#allocation2 + $0xf9] sm:$0xff] }
 0x2a1   : > { %3150 = vrot.lane.b32.xlu1 %v6793_v8, %s5441_s12  ;;  %3148 = vrot.lane.b32.xlu0 %v6797_v51, %s5441_s12 }
 0x2a3   : > { %v2781_v44 = vpop.permute.xlu1 %2780  ;;  %v2779_v40 = vpop.permute.xlu0 %2778 }
 0x2a4   : > { %2856 = vst.msk [vmem:[#allocation4 + $0xa8] sm:$0xff] %vm2834_vm12, %v2781_v44  ;;  %2855 = vst.msk [vmem:[#allocation4 + $0xa0] sm:$0xff] %vm2834_vm12, %v2779_v40  ;;  %v3271_v44 = vld [vmem:[#allocation2 + $0xf1] sm:$0xff] }
 0x2a5   : > { %3154 = vrot.lane.b32.xlu1 %v6805_v12, %s5441_s12  ;;  %3152 = vrot.lane.b32.xlu0 %v6809_v43, %s5441_s12 }
 0x2a7   : > { %v2785_v14 = vpop.permute.xlu1 %2784  ;;  %v2783_v48 = vpop.permute.xlu0 %2782 }
 0x2a8   : > { %2858 = vst.msk [vmem:[#allocation4 + $0xb8] sm:$0xff] %vm2834_vm12, %v2785_v14  ;;  %2857 = vst.msk [vmem:[#allocation4 + $0xb0] sm:$0xff] %vm2834_vm12, %v2783_v48  ;;  %v3274_v48 = vld [vmem:[#allocation2 + $0x111] sm:$0xff] }
 0x2a9   : > { %3158 = vrot.lane.b32.xlu1 %v6817_v60, %s5441_s12  ;;  %3156 = vrot.lane.b32.xlu0 %v6821_v63, %s5441_s12 }
 0x2ab   : > { %v2789_v8 = vpop.permute.xlu1 %2788  ;;  %v2787_v51 = vpop.permute.xlu0 %2786 }
 0x2ac   : > { %2860 = vst.msk [vmem:[#allocation4 + $0xc8] sm:$0xff] %vm2834_vm12, %v2789_v8  ;;  %2859 = vst.msk [vmem:[#allocation4 + $0xc0] sm:$0xff] %vm2834_vm12, %v2787_v51  ;;  %v3273_v8 = vld [vmem:[#allocation2 + $0x109] sm:$0xff] }
 0x2ad   : > { %3162 = vrot.lane.b32.xlu1 %v6829_v34, %s5441_s12  ;;  %3160 = vrot.lane.b32.xlu0 %v6833_v18, %s5441_s12 }
 0x2af   : > { %v2793_v12 = vpop.permute.xlu1 %2792  ;;  %v2791_v43 = vpop.permute.xlu0 %2790 }
 0x2b0   : > { %2862 = vst.msk [vmem:[#allocation4 + $0xd8] sm:$0xff] %vm2834_vm12, %v2793_v12  ;;  %2861 = vst.msk [vmem:[#allocation4 + $0xd0] sm:$0xff] %vm2834_vm12, %v2791_v43  ;;  %v3276_v43 = vld [vmem:[#allocation2 + $0x129] sm:$0xff] }
 0x2b1   : > { %3166 = vrot.lane.b32.xlu1 %v6841_v58, %s5441_s12  ;;  %3164 = vrot.lane.b32.xlu0 %v6845_v17, %s5441_s12 }
 0x2b3   : > { %v2797_v60 = vpop.permute.xlu1 %2796  ;;  %v2795_v63 = vpop.permute.xlu0 %2794 }
 0x2b4   : > { %2864 = vst.msk [vmem:[#allocation4 + $0xe8] sm:$0xff] %vm2834_vm12, %v2797_v60  ;;  %2863 = vst.msk [vmem:[#allocation4 + $0xe0] sm:$0xff] %vm2834_vm12, %v2795_v63  ;;  %v3275_v60 = vld [vmem:[#allocation2 + $0x121] sm:$0xff] }
 0x2b5   : > { %3170 = vrot.lane.b32.xlu1 %v6853_v20, %s5441_s12  ;;  %3168 = vrot.lane.b32.xlu0 %v6857_v21, %s5441_s12 }
 0x2b7   : > { %v2801_v34 = vpop.permute.xlu1 %2800  ;;  %v2799_v18 = vpop.permute.xlu0 %2798 }
 0x2b8   : > { %2866 = vst.msk [vmem:[#allocation4 + $0xf8] sm:$0xff] %vm2834_vm12, %v2801_v34  ;;  %2865 = vst.msk [vmem:[#allocation4 + $0xf0] sm:$0xff] %vm2834_vm12, %v2799_v18  ;;  %v3278_v18 = vld [vmem:[#allocation2 + $0x141] sm:$0xff] }
 0x2b9   : > { %3174 = vrot.lane.b32.xlu1 %v6865_v45, %s5441_s12  ;;  %3172 = vrot.lane.b32.xlu0 %v6869_v32, %s5441_s12  ;;  %v3091_v45 = vld [vmem:[#allocation2 + $0x188] sm:$0xff]  ;;  %v3090_v32 = vld [vmem:[#allocation2 + $0x180] sm:$0xff] }
 0x2bb   : > { %v2934_v58 = vpop.permute.xlu1 %2933  ;;  %v2932_v17 = vpop.permute.xlu0 %2931 }
 0x2bc   : > { %3029 = vst.msk [vmem:[#allocation4 + $0x8] sm:$0xff] %vm3027_vm13, %v2934_v58  ;;  %3028 = vst.msk [vmem:[#allocation4] sm:$0xff] %vm3027_vm13, %v2932_v17  ;;  %v3277_v58 = vld [vmem:[#allocation2 + $0x139] sm:$0xff] }
 0x2bd   : > { %3178 = vrot.lane.b32.xlu1 %v6877_v5, %s5441_s12  ;;  %3176 = vrot.lane.b32.xlu0 %v6881_v54, %s5441_s12  ;;  %v3254_v5 = vld [vmem:[#allocation2 + $0x21] sm:$0xff]  ;;  %v3253_v54 = vld [vmem:[#allocation2 + $0x19] sm:$0xff] }
 0x2bf   : > { %v2938_v20 = vpop.permute.xlu1 %2937  ;;  %v2936_v21 = vpop.permute.xlu0 %2935 }
 0x2c0   : > { %3031 = vst.msk [vmem:[#allocation4 + $0x18] sm:$0xff] %vm3027_vm13, %v2938_v20  ;;  %3030 = vst.msk [vmem:[#allocation4 + $0x10] sm:$0xff] %vm3027_vm13, %v2936_v21  ;;  %v4258_v21 = vld [vmem:[%s5531_s16 + $0x40] sm:$0xff] }
 0x2c1   : > { %3182 = vrot.lane.b32.xlu1 %v6889_v50, %s5441_s12  ;;  %3180 = vrot.lane.b32.xlu0 %v6893_v7, %s5441_s12  ;;  %v7105_v50 = vld [vmem:[#allocation2 + $0x39] sm:$0xff]  ;;  %v7107_v7 = vld [vmem:[#allocation2 + $0x31] sm:$0xff] }
 0x2c2   : > { %5105 = vmatprep.subr.mxu1 %v4258_v21 }
 0x2c3   : > { %v2942_v62 = vpop.permute.xlu1 %2941  ;;  %v2940_v15 = vpop.permute.xlu0 %2939  ;;  %5106 = vmatpush3.msra.mxu1 %v4258_v21 }
 0x2c4   : > { %3033 = vst.msk [vmem:[#allocation4 + $0x28] sm:$0xff] %vm3027_vm13, %v2942_v62  ;;  %3032 = vst.msk [vmem:[#allocation4 + $0x20] sm:$0xff] %vm3027_vm13, %v2940_v15 }
 0x2c5   : > { %3186 = vrot.lane.b32.xlu1 %v3091_v45, %s5441_s12  ;;  %3184 = vrot.lane.b32.xlu0 %v3090_v32, %s5441_s12  ;;  %v3280_v45 = vld [vmem:[#allocation2 + $0x159] sm:$0xff]  ;;  %v3279_v32 = vld [vmem:[#allocation2 + $0x151] sm:$0xff] }
 0x2c7   : > { %v2946_v16 = vpop.permute.xlu1 %2945  ;;  %v2944_v24 = vpop.permute.xlu0 %2943 }
 0x2c8   : > { %3035 = vst.msk [vmem:[#allocation4 + $0x38] sm:$0xff] %vm3027_vm13, %v2946_v16  ;;  %3034 = vst.msk [vmem:[#allocation4 + $0x30] sm:$0xff] %vm3027_vm13, %v2944_v24  ;;  %v3446_v16 = vld [vmem:[#allocation2 + $0x1a] sm:$0xff]  ;;  %v3281_v24 = vld [vmem:[#allocation2 + $0x169] sm:$0xff] }
 0x2c9   : > { %3319 = vrot.lane.b32.xlu1 %v3254_v5, %s5433_s29  ;;  %3317 = vrot.lane.b32.xlu0 %v3253_v54, %s5433_s29  ;;  %v4257_v5 = vld [vmem:[%s5531_s16 + $0x38] sm:$0xff]  ;;  %v4256_v54 = vld [vmem:[%s5531_s16 + $0x30] sm:$0xff] }
 0x2ca   : > { %5107 = vmatprep.subr.mxu1 %v4257_v5 }
 0x2cb   : > { %v2950_v31 = vpop.permute.xlu1 %2949  ;;  %v2948_v27 = vpop.permute.xlu0 %2947  ;;  %5108 = vmatpush3.msra.mxu1 %v4257_v5 }
 0x2cc   : > { %3037 = vst.msk [vmem:[#allocation4 + $0x48] sm:$0xff] %vm3027_vm13, %v2950_v31  ;;  %3036 = vst.msk [vmem:[#allocation4 + $0x40] sm:$0xff] %vm3027_vm13, %v2948_v27  ;;  %5109 = vmatprep.subr.mxu1 %v4256_v54 }
 0x2cd   : > { %3323 = vrot.lane.b32.xlu1 %v7105_v50, %s5433_s29  ;;  %3321 = vrot.lane.b32.xlu0 %v7107_v7, %s5433_s29 }
 0x2ce   : > { %5110 = vmatpush3.msra.mxu1 %v4256_v54 }
 0x2cf   : > { %v2954_v4 = vpop.permute.xlu1 %2953  ;;  %v2952_v26 = vpop.permute.xlu0 %2951 }
 0x2d0   : > { %3039 = vst.msk [vmem:[#allocation4 + $0x58] sm:$0xff] %vm3027_vm13, %v2954_v4  ;;  %3038 = vst.msk [vmem:[#allocation4 + $0x50] sm:$0xff] %vm3027_vm13, %v2952_v26  ;;  %v4255_v4 = vld [vmem:[%s5531_s16 + $0x28] sm:$0xff] }
 0x2d1   : > { %3327 = vrot.lane.b32.xlu1 %v7115_v22, %s5433_s29  ;;  %3325 = vrot.lane.b32.xlu0 %v7117_v3, %s5433_s29  ;;  %v3447_v26 = vld [vmem:[#allocation2 + $0x22] sm:$0xff] }
 0x2d2   : > { %5111 = vmatprep.subr.mxu1 %v4255_v4 }
 0x2d3   : > { %v2958_v38 = vpop.permute.xlu1 %2957  ;;  %v2956_v9 = vpop.permute.xlu0 %2955  ;;  %5112 = vmatpush3.msra.mxu1 %v4255_v4  ;;  %v4029_v4 = vld [vmem:[#allocation2 + $0x62] sm:$0xff] }
 0x2d4   : > { %3041 = vst.msk [vmem:[#allocation4 + $0x68] sm:$0xff] %vm3027_vm13, %v2958_v38  ;;  %3040 = vst.msk [vmem:[#allocation4 + $0x60] sm:$0xff] %vm3027_vm13, %v2956_v9 }
 0x2d5   : > { %3331 = vrot.lane.b32.xlu1 %v7125_v25, %s5433_s29  ;;  %3329 = vrot.lane.b32.xlu0 %v7127_v37, %s5433_s29 }
 0x2d7   : > { %v2962_v19 = vpop.permute.xlu1 %2961  ;;  %v2960_v55 = vpop.permute.xlu0 %2959 }
 0x2d8   : > { %3043 = vst.msk [vmem:[#allocation4 + $0x78] sm:$0xff] %vm3027_vm13, %v2962_v19  ;;  %3042 = vst.msk [vmem:[#allocation4 + $0x70] sm:$0xff] %vm3027_vm13, %v2960_v55  ;;  %v4254_v19 = vld [vmem:[%s5531_s16 + $0x20] sm:$0xff] }
 0x2d9   : > { %3335 = vrot.lane.b32.xlu1 %v7135_v42, %s5433_s29  ;;  %3333 = vrot.lane.b32.xlu0 %v7137_v13, %s5433_s29 }
 0x2da   : > { %5113 = vmatprep.subr.mxu1 %v4254_v19 }
 0x2db   : > { %v2966_v47 = vpop.permute.xlu1 %2965  ;;  %v2964_v33 = vpop.permute.xlu0 %2963  ;;  %5114 = vmatpush3.msra.mxu1 %v4254_v19 }
 0x2dc   : > { %3045 = vst.msk [vmem:[#allocation4 + $0x88] sm:$0xff] %vm3027_vm13, %v2966_v47  ;;  %3044 = vst.msk [vmem:[#allocation4 + $0x80] sm:$0xff] %vm3027_vm13, %v2964_v33  ;;  %v4253_v47 = vld [vmem:[%s5531_s16 + $0x18] sm:$0xff] }
 0x2dd   : > { %3339 = vrot.lane.b32.xlu1 %v7145_v56, %s5433_s29  ;;  %3337 = vrot.lane.b32.xlu0 %v7147_v30, %s5433_s29 }
 0x2de   : > { %5115 = vmatprep.subr.mxu1 %v4253_v47 }
 0x2df   : > { %v2970_v53 = vpop.permute.xlu1 %2969  ;;  %v2968_v57 = vpop.permute.xlu0 %2967  ;;  %5116 = vmatpush3.msra.mxu1 %v4253_v47 }
 0x2e0   : > { %3047 = vst.msk [vmem:[#allocation4 + $0x98] sm:$0xff] %vm3027_vm13, %v2970_v53  ;;  %3046 = vst.msk [vmem:[#allocation4 + $0x90] sm:$0xff] %vm3027_vm13, %v2968_v57 }
 0x2e1   : > { %3343 = vrot.lane.b32.xlu1 %v7155_v0, %s5433_s29  ;;  %3341 = vrot.lane.b32.xlu0 %v7157_v39, %s5433_s29 }
 0x2e3   : > { %v2974_v11 = vpop.permute.xlu1 %2973  ;;  %v2972_v23 = vpop.permute.xlu0 %2971 }
 0x2e4   : > { %3049 = vst.msk [vmem:[#allocation4 + $0xa8] sm:$0xff] %vm3027_vm13, %v2974_v11  ;;  %3048 = vst.msk [vmem:[#allocation4 + $0xa0] sm:$0xff] %vm3027_vm13, %v2972_v23  ;;  %v4252_v23 = vld [vmem:[%s5531_s16 + $0x10] sm:$0xff] }
 0x2e5   : > { %3347 = vrot.lane.b32.xlu1 %v7165_v59, %s5433_s29  ;;  %3345 = vrot.lane.b32.xlu0 %v7167_v61, %s5433_s29 }
 0x2e6   : > { %5117 = vmatprep.subr.mxu1 %v4252_v23 }
 0x2e7   : > { %v2978_v41 = vpop.permute.xlu1 %2977  ;;  %v2976_v49 = vpop.permute.xlu0 %2975  ;;  %5118 = vmatpush3.msra.mxu1 %v4252_v23 }
 0x2e8   : > { %3051 = vst.msk [vmem:[#allocation4 + $0xb8] sm:$0xff] %vm3027_vm13, %v2978_v41  ;;  %3050 = vst.msk [vmem:[#allocation4 + $0xb0] sm:$0xff] %vm3027_vm13, %v2976_v49  ;;  %v4251_v49 = vld [vmem:[%s5531_s16 + $0x8] sm:$0xff] }
 0x2e9   : > { %3351 = vrot.lane.b32.xlu1 %v3270_v2, %s5433_s29  ;;  %3349 = vrot.lane.b32.xlu0 %v3269_v46, %s5433_s29  ;;  %v4025_v2 = vld [vmem:[#allocation2 + $0x32] sm:$0xff] }
 0x2ea   : > { %5119 = vmatprep.subr.mxu1 %v4251_v49 }
 0x2eb   : > { %v2982_v40 = vpop.permute.xlu1 %2981  ;;  %v2980_v14 = vpop.permute.xlu0 %2979  ;;  %5120 = vmatpush3.msra.mxu1 %v4251_v49 }
 0x2ec   : > { %3053 = vst.msk [vmem:[#allocation4 + $0xc8] sm:$0xff] %vm3027_vm13, %v2982_v40  ;;  %3052 = vst.msk [vmem:[#allocation4 + $0xc0] sm:$0xff] %vm3027_vm13, %v2980_v14 }
 0x2ed   : > { %3355 = vrot.lane.b32.xlu1 %v3272_v6, %s5433_s29  ;;  %3353 = vrot.lane.b32.xlu0 %v3271_v44, %s5433_s29  ;;  %v4026_v44 = vld [vmem:[#allocation2 + $0x3a] sm:$0xff] }
 0x2ef   : > { %v2986_v51 = vpop.permute.xlu1 %2985  ;;  %v2984_v12 = vpop.permute.xlu0 %2983 }
 0x2f0   : > { %3055 = vst.msk [vmem:[#allocation4 + $0xd8] sm:$0xff] %vm3027_vm13, %v2986_v51  ;;  %3054 = vst.msk [vmem:[#allocation4 + $0xd0] sm:$0xff] %vm3027_vm13, %v2984_v12 }
 0x2f1   : > { %3359 = vrot.lane.b32.xlu1 %v3274_v48, %s5433_s29  ;;  %3357 = vrot.lane.b32.xlu0 %v3273_v8, %s5433_s29 }
 0x2f3   : > { %v2990_v63 = vpop.permute.xlu1 %2989  ;;  %v2988_v34 = vpop.permute.xlu0 %2987 }
 0x2f4   : > { %3057 = vst.msk [vmem:[#allocation4 + $0xe8] sm:$0xff] %vm3027_vm13, %v2990_v63  ;;  %3056 = vst.msk [vmem:[#allocation4 + $0xe0] sm:$0xff] %vm3027_vm13, %v2988_v34 }
 0x2f5   : > { %3363 = vrot.lane.b32.xlu1 %v3276_v43, %s5433_s29  ;;  %3361 = vrot.lane.b32.xlu0 %v3275_v60, %s5433_s29 }
 0x2f7   : > { %v2994_v17 = vpop.permute.xlu1 %2993  ;;  %v2992_v20 = vpop.permute.xlu0 %2991 }
 0x2f8   : > { %3059 = vst.msk [vmem:[#allocation4 + $0xf8] sm:$0xff] %vm3027_vm13, %v2994_v17  ;;  %3058 = vst.msk [vmem:[#allocation4 + $0xf0] sm:$0xff] %vm3027_vm13, %v2992_v20 }
 0x2f9   : > { %3367 = vrot.lane.b32.xlu1 %v3278_v18, %s5433_s29  ;;  %3365 = vrot.lane.b32.xlu0 %v3277_v58, %s5433_s29  ;;  %v4027_v58 = vld [vmem:[#allocation2 + $0x4a] sm:$0xff] }
 0x2fb   : > { %v3127_v62 = vpop.permute.xlu1 %3126  ;;  %v3125_v15 = vpop.permute.xlu0 %3124 }
 0x2fc   : > { %3222 = vst.msk [vmem:[#allocation4 + $0x8] sm:$0xff] %vm3220_vm14, %v3127_v62  ;;  %3221 = vst.msk [vmem:[#allocation4] sm:$0xff] %vm3220_vm14, %v3125_v15 }
 0x2fd   : > { %3371 = vrot.lane.b32.xlu1 %v3280_v45, %s5433_s29  ;;  %3369 = vrot.lane.b32.xlu0 %v3279_v32, %s5433_s29 }
 0x2ff   : > { %v3131_v31 = vpop.permute.xlu1 %3130  ;;  %v3129_v27 = vpop.permute.xlu0 %3128 }
 0x300   : > { %3224 = vst.msk [vmem:[#allocation4 + $0x18] sm:$0xff] %vm3220_vm14, %v3131_v31  ;;  %3223 = vst.msk [vmem:[#allocation4 + $0x10] sm:$0xff] %vm3220_vm14, %v3129_v27 }
 0x301   : > { %3510 = vrot.lane.b32.xlu1 %v3446_v16, %s5442_s13  ;;  %3373 = vrot.lane.b32.xlu0 %v3281_v24, %s5433_s29 }
 0x303   : > { %v3135_v38 = vpop.permute.xlu1 %3134  ;;  %v3133_v9 = vpop.permute.xlu0 %3132 }
 0x304   : > { %3226 = vst.msk [vmem:[#allocation4 + $0x28] sm:$0xff] %vm3220_vm14, %v3135_v38  ;;  %3225 = vst.msk [vmem:[#allocation4 + $0x20] sm:$0xff] %vm3220_vm14, %v3133_v9  ;;  %v7210_v55 = vpop.f32.mrf.mxu0 }
 0x305   : > { %3703 = vrot.lane.b32.xlu1 %v6733_v1, %s5434_s30  ;;  %3512 = vrot.lane.b32.xlu0 %v3447_v26, %s5442_s13 }
 0x306   : > { %v2196_v33 = vpop.f32.mrf.mxu0 }
 0x307   : > { %v3139_v53 = vpop.permute.xlu1 %3138  ;;  %v3137_v57 = vpop.permute.xlu0 %3136 }
 0x308   : > { %3228 = vst.msk [vmem:[#allocation4 + $0x38] sm:$0xff] %vm3220_vm14, %v3139_v53  ;;  %3227 = vst.msk [vmem:[#allocation4 + $0x30] sm:$0xff] %vm3220_vm14, %v3137_v57  ;;  %v7218_v11 = vpop.f32.mrf.mxu0 }
 0x309   : > { %3896 = vrot.lane.b32.xlu1 %v7107_v7, %s5443_s14  ;;  %3705 = vrot.lane.b32.xlu0 %v6731_v29, %s5434_s30  ;;  %v4250_v29 = vld [vmem:[%s5531_s16] sm:$0xff] }
 0x30a   : > { %v2201_v1 = vpop.f32.mrf.mxu0  ;;  %5121 = vmatprep.subr.mxu1 %v4250_v29 }
 0x30b   : > { %v3143_v46 = vpop.permute.xlu1 %3142  ;;  %v3141_v41 = vpop.permute.xlu0 %3140  ;;  %5122 = vmatpush3.msra.mxu1 %v4250_v29 }
 0x30c   : > { %3230 = vst.msk [vmem:[#allocation4 + $0x48] sm:$0xff] %vm3220_vm14, %v3143_v46  ;;  %3229 = vst.msk [vmem:[#allocation4 + $0x40] sm:$0xff] %vm3220_vm14, %v3141_v41  ;;  %v7228_v6 = vpop.f32.mrf.mxu0  ;;  %v3646_v46 = vld [vmem:[#allocation2 + $0x80] sm:$0xff] }
 0x30d   : > { %4089 = vrot.lane.b32.xlu1 %v4025_v2, %s5435_s6  ;;  %3898 = vrot.lane.b32.xlu0 %v7105_v50, %s5443_s14 }
 0x30e   : > { %v2206_v7 = vpop.f32.mrf.mxu0 }
 0x30f   : > { %v3147_v40 = vpop.permute.xlu1 %3146  ;;  %v3145_v14 = vpop.permute.xlu0 %3144 }
 0x310   : > { %3232 = vst.msk [vmem:[#allocation4 + $0x58] sm:$0xff] %vm3220_vm14, %v3147_v40  ;;  %3231 = vst.msk [vmem:[#allocation4 + $0x50] sm:$0xff] %vm3220_vm14, %v3145_v14  ;;  %v7236_v48 = vpop.f32.mrf.mxu0  ;;  %v4031_v40 = vld [vmem:[#allocation2 + $0x7a] sm:$0xff] }
 0x311   : > { %4091 = vrot.lane.b32.xlu1 %v4026_v44, %s5435_s6  ;;  %3514 = vrot.lane.b32.xlu0 %v4025_v2, %s5442_s13 }
 0x312   : > { %v2211_v8 = vpop.f32.mrf.mxu0 }
 0x313   : > { %v3151_v50 = vpop.permute.xlu1 %3150  ;;  %v3149_v51 = vpop.permute.xlu0 %3148 }
 0x314   : > { %3234 = vst.msk [vmem:[#allocation4 + $0x68] sm:$0xff] %vm3220_vm14, %v3151_v50  ;;  %3233 = vst.msk [vmem:[#allocation4 + $0x60] sm:$0xff] %vm3220_vm14, %v3149_v51  ;;  %v7242_v12 = vpop.f32.mrf.mxu0 }
 0x315   : > { %3707 = vrot.lane.b32.xlu1 %v6746_v36, %s5434_s30  ;;  %3516 = vrot.lane.b32.xlu0 %v4026_v44, %s5442_s13 }
 0x316   : > { %v2216_v43 = vpop.f32.mrf.mxu0 }
 0x317   : > { %v3155_v60 = vpop.permute.xlu1 %3154  ;;  %v3153_v63 = vpop.permute.xlu0 %3152 }
 0x318   : > { %3236 = vst.msk [vmem:[#allocation4 + $0x78] sm:$0xff] %vm3220_vm14, %v3155_v60  ;;  %3235 = vst.msk [vmem:[#allocation4 + $0x70] sm:$0xff] %vm3220_vm14, %v3153_v63  ;;  %v7249_v34 = vpop.f32.mrf.mxu0  ;;  %v4032_v60 = vld [vmem:[#allocation2 + $0x82] sm:$0xff] }
 0x319   : > { %3900 = vrot.lane.b32.xlu1 %v7117_v3, %s5443_s14  ;;  %3709 = vrot.lane.b32.xlu0 %v6744_v28, %s5434_s30  ;;  %v4028_v3 = vld [vmem:[#allocation2 + $0x52] sm:$0xff] }
 0x31a   : > { %v2221_v18 = vpop.f32.mrf.mxu0 }
 0x31b   : > { %v3159_v36 = vpop.permute.xlu1 %3158  ;;  %v3157_v17 = vpop.permute.xlu0 %3156 }
 0x31c   : > { %3238 = vst.msk [vmem:[#allocation4 + $0x88] sm:$0xff] %vm3220_vm14, %v3159_v36  ;;  %3237 = vst.msk [vmem:[#allocation4 + $0x80] sm:$0xff] %vm3220_vm14, %v3157_v17  ;;  %v7257_v20 = vpop.f32.mrf.mxu0 }
 0x31d   : > { %4093 = vrot.lane.b32.xlu1 %v4027_v58, %s5435_s6  ;;  %3902 = vrot.lane.b32.xlu0 %v7115_v22, %s5443_s14 }
 0x31e   : > { %v2226_v21 = vpop.f32.mrf.mxu0 }
 0x31f   : > { %v3163_v45 = vpop.permute.xlu1 %3162  ;;  %v3161_v32 = vpop.permute.xlu0 %3160 }
 0x320   : > { %3240 = vst.msk [vmem:[#allocation4 + $0x98] sm:$0xff] %vm3220_vm14, %v3163_v45  ;;  %3239 = vst.msk [vmem:[#allocation4 + $0x90] sm:$0xff] %vm3220_vm14, %v3161_v32  ;;  %v7264_v28 = vpop.f32.mrf.mxu0 }
 0x321   : > { %4095 = vrot.lane.b32.xlu1 %v4028_v3, %s5435_s6  ;;  %3518 = vrot.lane.b32.xlu0 %v4027_v58, %s5442_s13 }
 0x322   : > { %v2231_v62 = vpop.f32.mrf.mxu0 }
 0x323   : > { %v3167_v15 = vpop.permute.xlu1 %3166  ;;  %v3165_v5 = vpop.permute.xlu0 %3164 }
 0x324   : > { %3242 = vst.msk [vmem:[#allocation4 + $0xa8] sm:$0xff] %vm3220_vm14, %v3167_v15  ;;  %3241 = vst.msk [vmem:[#allocation4 + $0xa0] sm:$0xff] %vm3220_vm14, %v3165_v5  ;;  %v7270_v22 = vpop.f32.mrf.mxu0 }
 0x325   : > { %3711 = vrot.lane.b32.xlu1 %v6759_v35, %s5434_s30  ;;  %3520 = vrot.lane.b32.xlu0 %v4028_v3, %s5442_s13 }
 0x326   : > { %v2236_v54 = vpop.f32.mrf.mxu0 }
 0x327   : > { %v3171_v16 = vpop.permute.xlu1 %3170  ;;  %v3169_v24 = vpop.permute.xlu0 %3168  ;;  %v3648_v54 = vld [vmem:[#allocation2 + $0x98] sm:$0xff] }
 0x328   : > { %3244 = vst.msk [vmem:[#allocation4 + $0xb8] sm:$0xff] %vm3220_vm14, %v3171_v16  ;;  %3243 = vst.msk [vmem:[#allocation4 + $0xb0] sm:$0xff] %vm3220_vm14, %v3169_v24  ;;  %v7277_v31 = vpop.f32.mrf.mxu0 }
 0x329   : > { %3904 = vrot.lane.b32.xlu1 %v7127_v37, %s5443_s14  ;;  %3713 = vrot.lane.b32.xlu0 %v6757_v52, %s5434_s30  ;;  %v4030_v37 = vld [vmem:[#allocation2 + $0x6a] sm:$0xff] }
 0x32a   : > { %v2241_v27 = vpop.f32.mrf.mxu0 }
 0x32b   : > { %v3175_v35 = vpop.permute.xlu1 %3174  ;;  %v3173_v26 = vpop.permute.xlu0 %3172 }
 0x32c   : > { %3246 = vst.msk [vmem:[#allocation4 + $0xc8] sm:$0xff] %vm3220_vm14, %v3175_v35  ;;  %3245 = vst.msk [vmem:[#allocation4 + $0xc0] sm:$0xff] %vm3220_vm14, %v3173_v26  ;;  %v7285_v38 = vpop.f32.mrf.mxu0 }
 0x32d   : > { %4097 = vrot.lane.b32.xlu1 %v4029_v4, %s5435_s6  ;;  %3906 = vrot.lane.b32.xlu0 %v7125_v25, %s5443_s14 }
 0x32e   : > { %v2246_v9 = vpop.f32.mrf.mxu0 }
 0x32f   : > { %v3179_v19 = vpop.permute.xlu1 %3178  ;;  %v3177_v47 = vpop.permute.xlu0 %3176  ;;  %v4033_v9 = vld [vmem:[#allocation2 + $0x92] sm:$0xff] }
 0x330   : > { %3248 = vst.msk [vmem:[#allocation4 + $0xd8] sm:$0xff] %vm3220_vm14, %v3179_v19  ;;  %3247 = vst.msk [vmem:[#allocation4 + $0xd0] sm:$0xff] %vm3220_vm14, %v3177_v47  ;;  %v7292_v52 = vpop.f32.mrf.mxu0 }
 0x331   : > { %4099 = vrot.lane.b32.xlu1 %v4030_v37, %s5435_s6  ;;  %3522 = vrot.lane.b32.xlu0 %v4029_v4, %s5442_s13 }
 0x332   : > { %v2251_v33 = vpop.f32.mrf.mxu0 }
 0x333   : > { %v3183_v53 = vpop.permute.xlu1 %3182  ;;  %v3181_v57 = vpop.permute.xlu0 %3180 }
 0x334   : > { %3250 = vst.msk [vmem:[#allocation4 + $0xe8] sm:$0xff] %vm3220_vm14, %v3183_v53  ;;  %3249 = vst.msk [vmem:[#allocation4 + $0xe0] sm:$0xff] %vm3220_vm14, %v3181_v57  ;;  %v7298_v25 = vpop.f32.mrf.mxu0  ;;  %v7300_v23 = vpop.f32.mrf.mxu1  ;;  %v4034_v57 = vld [vmem:[#allocation2 + $0x9a] sm:$0xff] }
 0x335   : > { %3715 = vrot.lane.b32.xlu1 %v6771_v10, %s5434_s30  ;;  %3524 = vrot.lane.b32.xlu0 %v4030_v37, %s5442_s13 }
 0x336   : > { %v2256_v1 = vpop.f32.mrf.mxu0  ;;  %v2316_v2 = vpop.f32.mrf.mxu1 }
 0x337   : > { %v3187_v41 = vpop.permute.xlu1 %3186  ;;  %v3185_v49 = vpop.permute.xlu0 %3184 }
 0x338   : > { %3252 = vst.msk [vmem:[#allocation4 + $0xf8] sm:$0xff] %vm3220_vm14, %v3187_v41  ;;  %3251 = vst.msk [vmem:[#allocation4 + $0xf0] sm:$0xff] %vm3220_vm14, %v3185_v49  ;;  %v7307_v29 = vpop.f32.mrf.mxu0  ;;  %v7309_v7 = vpop.f32.mrf.mxu1 }
 0x339   : > { %3908 = vrot.lane.b32.xlu1 %v7137_v13, %s5443_s14  ;;  %3717 = vrot.lane.b32.xlu0 %v3646_v46, %s5434_s30 }
 0x33a   : > { %v2261_v10 = vpop.f32.mrf.mxu0  ;;  %v2321_v44 = vpop.f32.mrf.mxu1 }
 0x33b   : > { %v3320_v14 = vpop.permute.xlu1 %3319  ;;  %v3318_v8 = vpop.permute.xlu0 %3317 }
 0x33c   : > { %3415 = vst.msk [vmem:[#allocation4 + $0x8] sm:$0xff] %vm3413_vm15, %v3320_v14  ;;  %3414 = vst.msk [vmem:[#allocation4] sm:$0xff] %vm3413_vm15, %v3318_v8  ;;  %v7316_v50 = vpop.f32.mrf.mxu0  ;;  %v7318_v51 = vpop.f32.mrf.mxu1 }
 0x33d   : > { %4101 = vrot.lane.b32.xlu1 %v4031_v40, %s5435_s6  ;;  %3910 = vrot.lane.b32.xlu0 %v7135_v42, %s5443_s14  ;;  %v3647_v42 = vld [vmem:[#allocation2 + $0x90] sm:$0xff] }
 0x33e   : > { %v2266_v13 = vpop.f32.mrf.mxu0  ;;  %v2326_v43 = vpop.f32.mrf.mxu1 }
 0x33f   : > { %v3324_v63 = vpop.permute.xlu1 %3323  ;;  %v3322_v18 = vpop.permute.xlu0 %3321  ;;  %v3650_v13 = vld [vmem:[#allocation2 + $0xb0] sm:$0xff] }
 0x340   : > { %3417 = vst.msk [vmem:[#allocation4 + $0x18] sm:$0xff] %vm3413_vm15, %v3324_v63  ;;  %3416 = vst.msk [vmem:[#allocation4 + $0x10] sm:$0xff] %vm3413_vm15, %v3322_v18  ;;  %v7325_v58 = vpop.f32.mrf.mxu0  ;;  %v7327_v36 = vpop.f32.mrf.mxu1 }
 0x341   : > { %4103 = vrot.lane.b32.xlu1 %v4032_v60, %s5435_s6  ;;  %3526 = vrot.lane.b32.xlu0 %v4031_v40, %s5442_s13 }
 0x342   : > { %v2271_v17 = vpop.f32.mrf.mxu0  ;;  %v2331_v21 = vpop.f32.mrf.mxu1 }
 0x343   : > { %v3328_v3 = vpop.permute.xlu1 %3327  ;;  %v3326_v45 = vpop.permute.xlu0 %3325  ;;  %v4035_v17 = vld [vmem:[#allocation2 + $0xaa] sm:$0xff] }
 0x344   : > { %3419 = vst.msk [vmem:[#allocation4 + $0x28] sm:$0xff] %vm3413_vm15, %v3328_v3  ;;  %3418 = vst.msk [vmem:[#allocation4 + $0x20] sm:$0xff] %vm3413_vm15, %v3326_v45  ;;  %v7333_v32 = vpop.f32.mrf.mxu0  ;;  %v7335_v62 = vpop.f32.mrf.mxu1 }
 0x345   : > { %3719 = vrot.lane.b32.xlu1 %v3647_v42, %s5434_s30  ;;  %3528 = vrot.lane.b32.xlu0 %v4032_v60, %s5442_s13 }
 0x346   : > { %v2276_v15 = vpop.f32.mrf.mxu0  ;;  %v2336_v5 = vpop.f32.mrf.mxu1 }
 0x347   : > { %v3332_v16 = vpop.permute.xlu1 %3331  ;;  %v3330_v24 = vpop.permute.xlu0 %3329  ;;  %v4036_v15 = vld [vmem:[#allocation2 + $0xb2] sm:$0xff] }
 0x348   : > { %3421 = vst.msk [vmem:[#allocation4 + $0x38] sm:$0xff] %vm3413_vm15, %v3332_v16  ;;  %3420 = vst.msk [vmem:[#allocation4 + $0x30] sm:$0xff] %vm3413_vm15, %v3330_v24  ;;  %v7341_v27 = vpop.f32.mrf.mxu0  ;;  %v7343_v4 = vpop.f32.mrf.mxu1  ;;  %v3651_v24 = vld [vmem:[#allocation2 + $0xc0] sm:$0xff] }
 0x349   : > { %3912 = vrot.lane.b32.xlu1 %v7147_v30, %s5443_s14  ;;  %3721 = vrot.lane.b32.xlu0 %v3648_v54, %s5434_s30 }
 0x34a   : > { %v2281_v35 = vpop.f32.mrf.mxu0  ;;  %v2341_v26 = vpop.f32.mrf.mxu1 }
 0x34b   : > { %v3336_v37 = vpop.permute.xlu1 %3335  ;;  %v3334_v19 = vpop.permute.xlu0 %3333 }
 0x34c   : > { %3423 = vst.msk [vmem:[#allocation4 + $0x48] sm:$0xff] %vm3413_vm15, %v3336_v37  ;;  %3422 = vst.msk [vmem:[#allocation4 + $0x40] sm:$0xff] %vm3413_vm15, %v3334_v19  ;;  %v7350_v47 = vpop.f32.mrf.mxu0  ;;  %v7352_v33 = vpop.f32.mrf.mxu1  ;;  %v4037_v19 = vld [vmem:[#allocation2 + $0xc2] sm:$0xff] }
 0x34d   : > { %4105 = vrot.lane.b32.xlu1 %v4033_v9, %s5435_s6  ;;  %3914 = vrot.lane.b32.xlu0 %v7145_v56, %s5443_s14  ;;  %v3649_v56 = vld [vmem:[#allocation2 + $0xa8] sm:$0xff] }
 0x34e   : > { %v2286_v30 = vpop.f32.mrf.mxu0  ;;  %v2346_v53 = vpop.f32.mrf.mxu1 }
 0x34f   : > { %v3340_v1 = vpop.permute.xlu1 %3339  ;;  %v3338_v2 = vpop.permute.xlu0 %3337 }
 0x350   : > { %3425 = vst.msk [vmem:[#allocation4 + $0x58] sm:$0xff] %vm3413_vm15, %v3340_v1  ;;  %3424 = vst.msk [vmem:[#allocation4 + $0x50] sm:$0xff] %vm3413_vm15, %v3338_v2  ;;  %v7359_v46 = vpop.f32.mrf.mxu0  ;;  %v7361_v41 = vpop.f32.mrf.mxu1 }
 0x351   : > { %4107 = vrot.lane.b32.xlu1 %v4034_v57, %s5435_s6  ;;  %3530 = vrot.lane.b32.xlu0 %v4033_v9, %s5442_s13 }
 0x352   : > { %v2291_v49 = vpop.f32.mrf.mxu0  ;;  %v2351_v10 = vpop.f32.mrf.mxu1 }
 0x353   : > { %v3344_v44 = vpop.permute.xlu1 %3343  ;;  %v3342_v40 = vpop.permute.xlu0 %3341 }
 0x354   : > { %3427 = vst.msk [vmem:[#allocation4 + $0x68] sm:$0xff] %vm3413_vm15, %v3344_v44  ;;  %3426 = vst.msk [vmem:[#allocation4 + $0x60] sm:$0xff] %vm3413_vm15, %v3342_v40  ;;  %v7367_v14 = vpop.f32.mrf.mxu0 }
 0x355   : > { %3723 = vrot.lane.b32.xlu1 %v3649_v56, %s5434_s30  ;;  %3532 = vrot.lane.b32.xlu0 %v4034_v57, %s5442_s13  ;;  %v4038_v57 = vld [vmem:[#allocation2 + $0xca] sm:$0xff]  ;;  %v3654_v56 = vld [vmem:[#allocation2 + $0xe0] sm:$0xff] }
 0x356   : > { %v2296_v8 = vpop.f32.mrf.mxu0 }
 0x357   : > { %v3348_v43 = vpop.permute.xlu1 %3347  ;;  %v3346_v60 = vpop.permute.xlu0 %3345  ;;  %v4039_v8 = vld [vmem:[#allocation2 + $0xda] sm:$0xff] }
 0x358   : > { %3429 = vst.msk [vmem:[#allocation4 + $0x78] sm:$0xff] %vm3413_vm15, %v3348_v43  ;;  %3428 = vst.msk [vmem:[#allocation4 + $0x70] sm:$0xff] %vm3413_vm15, %v3346_v60  ;;  %v7373_v63 = vpop.f32.mrf.mxu0 }
 0x359   : > { %3916 = vrot.lane.b32.xlu1 %v7157_v39, %s5443_s14  ;;  %3725 = vrot.lane.b32.xlu0 %v3650_v13, %s5434_s30  ;;  %v3847_v13 = vld [vmem:[#allocation2 + $0xe1] sm:$0xff] }
 0x35a   : > { %v2301_v18 = vpop.f32.mrf.mxu0 }
 0x35b   : > { %v3352_v21 = vpop.permute.xlu1 %3351  ;;  %v3350_v42 = vpop.permute.xlu0 %3349  ;;  %v4040_v18 = vld [vmem:[#allocation2 + $0xe2] sm:$0xff] }
 0x35c   : > { %3431 = vst.msk [vmem:[#allocation4 + $0x88] sm:$0xff] %vm3413_vm15, %v3352_v21  ;;  %3430 = vst.msk [vmem:[#allocation4 + $0x80] sm:$0xff] %vm3413_vm15, %v3350_v42  ;;  %v7380_v3 = vpop.f32.mrf.mxu0  ;;  %v3655_v42 = vld [vmem:[#allocation2 + $0xf0] sm:$0xff] }
 0x35d   : > { %4109 = vrot.lane.b32.xlu1 %v4035_v17, %s5435_s6  ;;  %3918 = vrot.lane.b32.xlu0 %v7155_v0, %s5443_s14  ;;  %v3652_v0 = vld [vmem:[#allocation2 + $0xc8] sm:$0xff] }
 0x35e   : > { %v2306_v45 = vpop.f32.mrf.mxu0 }
 0x35f   : > { %v3356_v39 = vpop.permute.xlu1 %3355  ;;  %v3354_v5 = vpop.permute.xlu0 %3353 }
 0x360   : > { %3433 = vst.msk [vmem:[#allocation4 + $0x98] sm:$0xff] %vm3413_vm15, %v3356_v39  ;;  %3432 = vst.msk [vmem:[#allocation4 + $0x90] sm:$0xff] %vm3413_vm15, %v3354_v5  ;;  %v7387_v54 = vpop.f32.mrf.mxu0  ;;  %v3848_v39 = vld [vmem:[#allocation2 + $0xf1] sm:$0xff] }
 0x361   : > { %4111 = vrot.lane.b32.xlu1 %v4036_v15, %s5435_s6  ;;  %3534 = vrot.lane.b32.xlu0 %v4035_v17, %s5442_s13  ;;  %v3656_v5 = vld [vmem:[#allocation2 + $0xf8] sm:$0xff] }
 0x362   : > { %v2311_v16 = vpop.f32.mrf.mxu0 }
 0x363   : > { %v3360_v35 = vpop.permute.xlu1 %3359  ;;  %v3358_v26 = vpop.permute.xlu0 %3357 }
 0x364   : > { %3435 = vst.msk [vmem:[#allocation4 + $0xa8] sm:$0xff] %vm3413_vm15, %v3360_v35  ;;  %3434 = vst.msk [vmem:[#allocation4 + $0xa0] sm:$0xff] %vm3413_vm15, %v3358_v26  ;;  %v4041_v26 = vld [vmem:[#allocation2 + $0xf2] sm:$0xff] }
 0x365   : > { %3727 = vrot.lane.b32.xlu1 %v3651_v24, %s5434_s30  ;;  %3536 = vrot.lane.b32.xlu0 %v4036_v15, %s5442_s13 }
 0x367   : > { %v3364_v9 = vpop.permute.xlu1 %3363  ;;  %v3362_v37 = vpop.permute.xlu0 %3361 }
 0x368   : > { %3437 = vst.msk [vmem:[#allocation4 + $0xb8] sm:$0xff] %vm3413_vm15, %v3364_v9  ;;  %3436 = vst.msk [vmem:[#allocation4 + $0xb0] sm:$0xff] %vm3413_vm15, %v3362_v37 }
 0x369   : > { %3920 = vrot.lane.b32.xlu1 %v7167_v61, %s5443_s14  ;;  %3729 = vrot.lane.b32.xlu0 %v3652_v0, %s5434_s30  ;;  %v3653_v61 = vld [vmem:[#allocation2 + $0xd8] sm:$0xff] }
 0x36a   : > { %v3849_v0 = vld [vmem:[#allocation2 + $0xf9] sm:$0xff] }
 0x36b   : > { %v3368_v30 = vpop.permute.xlu1 %3367  ;;  %v3366_v53 = vpop.permute.xlu0 %3365 }
 0x36c   : > { %3439 = vst.msk [vmem:[#allocation4 + $0xc8] sm:$0xff] %vm3413_vm15, %v3368_v30  ;;  %3438 = vst.msk [vmem:[#allocation4 + $0xc0] sm:$0xff] %vm3413_vm15, %v3366_v53  ;;  %v4042_v30 = vld [vmem:[#allocation2 + $0xfa] sm:$0xff] }
 0x36d   : > { %4113 = vrot.lane.b32.xlu1 %v4037_v19, %s5435_s6  ;;  %3922 = vrot.lane.b32.xlu0 %v7165_v59, %s5443_s14  ;;  %v3846_v59 = vld [vmem:[#allocation2 + $0xd9] sm:$0xff] }
 0x36f   : > { %v3372_v1 = vpop.permute.xlu1 %3371  ;;  %v3370_v2 = vpop.permute.xlu0 %3369 }
 0x370   : > { %3441 = vst.msk [vmem:[#allocation4 + $0xd8] sm:$0xff] %vm3413_vm15, %v3372_v1  ;;  %3440 = vst.msk [vmem:[#allocation4 + $0xd0] sm:$0xff] %vm3413_vm15, %v3370_v2  ;;  %v3657_v1 = vld [vmem:[#allocation2 + $0x108] sm:$0xff] }
 0x371   : > { %4115 = vrot.lane.b32.xlu1 %v4038_v57, %s5435_s6  ;;  %3538 = vrot.lane.b32.xlu0 %v4037_v19, %s5442_s13 }
 0x373   : > { %v3511_v49 = vpop.permute.xlu1 %3510  ;;  %v3374_v10 = vpop.permute.xlu0 %3373 }
 0x374   : > { %3607 = vst.msk [vmem:[#allocation4] sm:$0xff] %vm3606_vm0, %v3511_v49  ;;  %v3850_v49 = vld [vmem:[#allocation2 + $0x109] sm:$0xff] }
 0x375   : > { %3442 = vst.msk [vmem:[#allocation4 + $0xe0] sm:$0xff] %vm3413_vm15, %v3374_v10  ;;  %3731 = vrot.lane.b32.xlu1 %v3653_v61, %s5434_s30  ;;  %3540 = vrot.lane.b32.xlu0 %v4038_v57, %s5442_s13  ;;  %v3658_v10 = vld [vmem:[#allocation2 + $0x110] sm:$0xff] }
 0x377   : > { %v3704_v44 = vpop.permute.xlu1 %3703  ;;  %v3513_v40 = vpop.permute.xlu0 %3512 }
 0x378   : > { %3800 = vst.msk [vmem:[#allocation4] sm:$0xff] %vm3799_vm1, %v3704_v44 }
 0x379   : > { %3608 = vst.msk [vmem:[#allocation4 + $0x8] sm:$0xff] %vm3606_vm0, %v3513_v40  ;;  %3924 = vrot.lane.b32.xlu1 %v3846_v59, %s5443_s14  ;;  %3733 = vrot.lane.b32.xlu0 %v3654_v56, %s5434_s30  ;;  %v4043_v40 = vld [vmem:[#allocation2 + $0x10a] sm:$0xff] }
 0x37b   : > { %v3897_v43 = vpop.permute.xlu1 %3896  ;;  %v3706_v60 = vpop.permute.xlu0 %3705 }
 0x37c   : > { %3993 = vst.msk [vmem:[#allocation4] sm:$0xff] %vm3992_vm2, %v3897_v43 }
 0x37d   : > { %3801 = vst.msk [vmem:[#allocation4 + $0x8] sm:$0xff] %vm3799_vm1, %v3706_v60  ;;  %4117 = vrot.lane.b32.xlu1 %v4039_v8, %s5435_s6  ;;  %3926 = vrot.lane.b32.xlu0 %v3847_v13, %s5443_s14 }
 0x37f   : > { %v4090_v17 = vpop.permute.xlu1 %4089  ;;  %v3899_v21 = vpop.permute.xlu0 %3898 }
 0x380   : > { %4186 = vst.msk [vmem:[#allocation4] sm:$0xff] %vm4185_vm3, %v4090_v17 }
 0x381   : > { %3994 = vst.msk [vmem:[#allocation4 + $0x8] sm:$0xff] %vm3992_vm2, %v3899_v21  ;;  %4119 = vrot.lane.b32.xlu1 %v4040_v18, %s5435_s6  ;;  %3542 = vrot.lane.b32.xlu0 %v4039_v8, %s5442_s13  ;;  %v3851_v8 = vld [vmem:[#allocation2 + $0x111] sm:$0xff] }
 0x383   : > { %v4092_v45 = vpop.permute.xlu1 %4091  ;;  %v3515_v15 = vpop.permute.xlu0 %3514 }
 0x384   : > { %4187 = vst.msk [vmem:[#allocation4 + $0x8] sm:$0xff] %vm4185_vm3, %v4092_v45 }
 0x385   : > { %3609 = vst.msk [vmem:[#allocation4 + $0x10] sm:$0xff] %vm3606_vm0, %v3515_v15  ;;  %3735 = vrot.lane.b32.xlu1 %v3655_v42, %s5434_s30  ;;  %3544 = vrot.lane.b32.xlu0 %v4040_v18, %s5442_s13  ;;  %v4044_v18 = vld [vmem:[#allocation2 + $0x112] sm:$0xff]  ;;  %v3659_v42 = vld [vmem:[#allocation2 + $0x120] sm:$0xff] }
 0x387   : > { %v3708_v16 = vpop.permute.xlu1 %3707  ;;  %v3517_v24 = vpop.permute.xlu0 %3516  ;;  %v4218_v35 = vld [vmem:[#allocation4] sm:$0xff] }
 0x388   : > { %3802 = vst.msk [vmem:[#allocation4 + $0x10] sm:$0xff] %vm3799_vm1, %v3708_v16  ;;  %5123 = vmatprep.mubr.msk.f32.mxu1 %vm4259_vm4, %v4218_v35 }
 0x389   : > { %3610 = vst.msk [vmem:[#allocation4 + $0x18] sm:$0xff] %vm3606_vm0, %v3517_v24  ;;  %3928 = vrot.lane.b32.xlu1 %v3848_v39, %s5443_s14  ;;  %3737 = vrot.lane.b32.xlu0 %v3656_v5, %s5434_s30  ;;  %v3852_v39 = vld [vmem:[#allocation2 + $0x121] sm:$0xff] }
 0x38a   : > { %v3660_v5 = vld [vmem:[#allocation2 + $0x128] sm:$0xff] }
 0x38b   : > { %v3901_v9 = vpop.permute.xlu1 %3900  ;;  %v3710_v37 = vpop.permute.xlu0 %3709  ;;  %v4219_v19 = vld [vmem:[#allocation4 + $0x8] sm:$0xff] }
 0x38c   : > { %3995 = vst.msk [vmem:[#allocation4 + $0x10] sm:$0xff] %vm3992_vm2, %v3901_v9  ;;  %5124 = vmatmul.mubr.msk.f32.vlgmr.msra.gmra.mxu1 %vm4259_vm4, %v4219_v19 }
 0x38d   : > { %3803 = vst.msk [vmem:[#allocation4 + $0x18] sm:$0xff] %vm3799_vm1, %v3710_v37  ;;  %4121 = vrot.lane.b32.xlu1 %v4041_v26, %s5435_s6  ;;  %3930 = vrot.lane.b32.xlu0 %v3849_v0, %s5443_s14  ;;  %v3853_v0 = vld [vmem:[#allocation2 + $0x129] sm:$0xff] }
 0x38f   : > { %v4094_v53 = vpop.permute.xlu1 %4093  ;;  %v3903_v57 = vpop.permute.xlu0 %3902 }
 0x390   : > { %4188 = vst.msk [vmem:[#allocation4 + $0x10] sm:$0xff] %vm4185_vm3, %v4094_v53 }
 0x391   : > { %3996 = vst.msk [vmem:[#allocation4 + $0x18] sm:$0xff] %vm3992_vm2, %v3903_v57  ;;  %4123 = vrot.lane.b32.xlu1 %v4042_v30, %s5435_s6  ;;  %3546 = vrot.lane.b32.xlu0 %v4041_v26, %s5442_s13  ;;  %v4045_v26 = vld [vmem:[#allocation2 + $0x122] sm:$0xff] }
 0x393   : > { %v4096_v2 = vpop.permute.xlu1 %4095  ;;  %v3519_v61 = vpop.permute.xlu0 %3518 }
 0x394   : > { %4189 = vst.msk [vmem:[#allocation4 + $0x18] sm:$0xff] %vm4185_vm3, %v4096_v2 }
 0x395   : > { %3611 = vst.msk [vmem:[#allocation4 + $0x20] sm:$0xff] %vm3606_vm0, %v3519_v61  ;;  %3739 = vrot.lane.b32.xlu1 %v3657_v1, %s5434_s30  ;;  %3548 = vrot.lane.b32.xlu0 %v4042_v30, %s5442_s13  ;;  %v4046_v30 = vld [vmem:[#allocation2 + $0x12a] sm:$0xff]  ;;  %v3661_v1 = vld [vmem:[#allocation2 + $0x138] sm:$0xff] }
 0x397   : > { %v3712_v59 = vpop.permute.xlu1 %3711  ;;  %v3521_v56 = vpop.permute.xlu0 %3520  ;;  %v4220_v44 = vld [vmem:[#allocation4 + $0x10] sm:$0xff] }
 0x398   : > { %3804 = vst.msk [vmem:[#allocation4 + $0x20] sm:$0xff] %vm3799_vm1, %v3712_v59  ;;  %5126 = vmatprep.mubr.msk.f32.mxu1 %vm4259_vm4, %v4220_v44 }
 0x399   : > { %3612 = vst.msk [vmem:[#allocation4 + $0x28] sm:$0xff] %vm3606_vm0, %v3521_v56  ;;  %3932 = vrot.lane.b32.xlu1 %v3850_v49, %s5443_s14  ;;  %3741 = vrot.lane.b32.xlu0 %v3658_v10, %s5434_s30  ;;  %v3854_v49 = vld [vmem:[#allocation2 + $0x139] sm:$0xff] }
 0x39a   : > { %v3662_v10 = vld [vmem:[#allocation2 + $0x140] sm:$0xff] }
 0x39b   : > { %v3905_v13 = vpop.permute.xlu1 %3904  ;;  %v3714_v43 = vpop.permute.xlu0 %3713  ;;  %v4221_v60 = vld [vmem:[#allocation4 + $0x18] sm:$0xff] }
 0x39c   : > { %3997 = vst.msk [vmem:[#allocation4 + $0x20] sm:$0xff] %vm3992_vm2, %v3905_v13  ;;  %5127 = vmatmul.mubr.msk.f32.gmra.mxu1 %vm4259_vm4, %v4221_v60 }
 0x39d   : > { %3805 = vst.msk [vmem:[#allocation4 + $0x28] sm:$0xff] %vm3799_vm1, %v3714_v43  ;;  %4125 = vrot.lane.b32.xlu1 %v4043_v40, %s5435_s6  ;;  %3934 = vrot.lane.b32.xlu0 %v3851_v8, %s5443_s14  ;;  %v3855_v8 = vld [vmem:[#allocation2 + $0x141] sm:$0xff] }
 0x39f   : > { %v4098_v17 = vpop.permute.xlu1 %4097  ;;  %v3907_v21 = vpop.permute.xlu0 %3906 }
 0x3a0   : > { %4190 = vst.msk [vmem:[#allocation4 + $0x20] sm:$0xff] %vm4185_vm3, %v4098_v17 }
 0x3a1   : > { %3998 = vst.msk [vmem:[#allocation4 + $0x28] sm:$0xff] %vm3992_vm2, %v3907_v21  ;;  %4127 = vrot.lane.b32.xlu1 %v4044_v18, %s5435_s6  ;;  %3550 = vrot.lane.b32.xlu0 %v4043_v40, %s5442_s13  ;;  %v4047_v40 = vld [vmem:[#allocation2 + $0x13a] sm:$0xff] }
 0x3a3   : > { %v4100_v45 = vpop.permute.xlu1 %4099  ;;  %v3523_v15 = vpop.permute.xlu0 %3522 }
 0x3a4   : > { %4191 = vst.msk [vmem:[#allocation4 + $0x28] sm:$0xff] %vm4185_vm3, %v4100_v45 }
 0x3a5   : > { %3613 = vst.msk [vmem:[#allocation4 + $0x30] sm:$0xff] %vm3606_vm0, %v3523_v15  ;;  %3743 = vrot.lane.b32.xlu1 %v3659_v42, %s5434_s30  ;;  %3552 = vrot.lane.b32.xlu0 %v4044_v18, %s5442_s13  ;;  %v4048_v18 = vld [vmem:[#allocation2 + $0x142] sm:$0xff]  ;;  %v3663_v42 = vld [vmem:[#allocation2 + $0x150] sm:$0xff] }
 0x3a7   : > { %v3716_v16 = vpop.permute.xlu1 %3715  ;;  %v3525_v24 = vpop.permute.xlu0 %3524  ;;  %v4222_v35 = vld [vmem:[#allocation4 + $0x20] sm:$0xff] }
 0x3a8   : > { %3806 = vst.msk [vmem:[#allocation4 + $0x30] sm:$0xff] %vm3799_vm1, %v3716_v16  ;;  %5129 = vmatprep.mubr.msk.f32.mxu1 %vm4259_vm4, %v4222_v35 }
 0x3a9   : > { %3614 = vst.msk [vmem:[#allocation4 + $0x38] sm:$0xff] %vm3606_vm0, %v3525_v24  ;;  %3936 = vrot.lane.b32.xlu1 %v3852_v39, %s5443_s14  ;;  %3745 = vrot.lane.b32.xlu0 %v3660_v5, %s5434_s30  ;;  %v3856_v39 = vld [vmem:[#allocation2 + $0x151] sm:$0xff] }
 0x3aa   : > { %v3664_v5 = vld [vmem:[#allocation2 + $0x158] sm:$0xff] }
 0x3ab   : > { %v3909_v9 = vpop.permute.xlu1 %3908  ;;  %v3718_v37 = vpop.permute.xlu0 %3717  ;;  %v4223_v19 = vld [vmem:[#allocation4 + $0x28] sm:$0xff] }
 0x3ac   : > { %3999 = vst.msk [vmem:[#allocation4 + $0x30] sm:$0xff] %vm3992_vm2, %v3909_v9  ;;  %5130 = vmatmul.mubr.msk.f32.gmra.mxu1 %vm4259_vm4, %v4223_v19 }
 0x3ad   : > { %3807 = vst.msk [vmem:[#allocation4 + $0x38] sm:$0xff] %vm3799_vm1, %v3718_v37  ;;  %4129 = vrot.lane.b32.xlu1 %v4045_v26, %s5435_s6  ;;  %3938 = vrot.lane.b32.xlu0 %v3853_v0, %s5443_s14  ;;  %v3857_v0 = vld [vmem:[#allocation2 + $0x159] sm:$0xff] }
 0x3af   : > { %v4102_v53 = vpop.permute.xlu1 %4101  ;;  %v3911_v57 = vpop.permute.xlu0 %3910 }
 0x3b0   : > { %4192 = vst.msk [vmem:[#allocation4 + $0x30] sm:$0xff] %vm4185_vm3, %v4102_v53 }
 0x3b1   : > { %4000 = vst.msk [vmem:[#allocation4 + $0x38] sm:$0xff] %vm3992_vm2, %v3911_v57  ;;  %4131 = vrot.lane.b32.xlu1 %v4046_v30, %s5435_s6  ;;  %3554 = vrot.lane.b32.xlu0 %v4045_v26, %s5442_s13  ;;  %v4049_v26 = vld [vmem:[#allocation2 + $0x152] sm:$0xff] }
 0x3b3   : > { %v4104_v2 = vpop.permute.xlu1 %4103  ;;  %v3527_v61 = vpop.permute.xlu0 %3526 }
 0x3b4   : > { %4193 = vst.msk [vmem:[#allocation4 + $0x38] sm:$0xff] %vm4185_vm3, %v4104_v2 }
 0x3b5   : > { %3615 = vst.msk [vmem:[#allocation4 + $0x40] sm:$0xff] %vm3606_vm0, %v3527_v61  ;;  %3747 = vrot.lane.b32.xlu1 %v3661_v1, %s5434_s30  ;;  %3556 = vrot.lane.b32.xlu0 %v4046_v30, %s5442_s13  ;;  %v4050_v30 = vld [vmem:[#allocation2 + $0x15a] sm:$0xff]  ;;  %v3665_v1 = vld [vmem:[#allocation2 + $0x168] sm:$0xff] }
 0x3b7   : > { %v3720_v59 = vpop.permute.xlu1 %3719  ;;  %v3529_v56 = vpop.permute.xlu0 %3528  ;;  %v4224_v44 = vld [vmem:[#allocation4 + $0x30] sm:$0xff] }
 0x3b8   : > { %3808 = vst.msk [vmem:[#allocation4 + $0x40] sm:$0xff] %vm3799_vm1, %v3720_v59  ;;  %5132 = vmatprep.mubr.msk.f32.mxu1 %vm4259_vm4, %v4224_v44 }
 0x3b9   : > { %3616 = vst.msk [vmem:[#allocation4 + $0x48] sm:$0xff] %vm3606_vm0, %v3529_v56  ;;  %3940 = vrot.lane.b32.xlu1 %v3854_v49, %s5443_s14  ;;  %3749 = vrot.lane.b32.xlu0 %v3662_v10, %s5434_s30  ;;  %v3858_v49 = vld [vmem:[#allocation2 + $0x169] sm:$0xff] }
 0x3ba   : > { %v3666_v10 = vld [vmem:[#allocation2 + $0x170] sm:$0xff] }
 0x3bb   : > { %v3913_v13 = vpop.permute.xlu1 %3912  ;;  %v3722_v43 = vpop.permute.xlu0 %3721  ;;  %v4225_v60 = vld [vmem:[#allocation4 + $0x38] sm:$0xff] }
 0x3bc   : > { %4001 = vst.msk [vmem:[#allocation4 + $0x40] sm:$0xff] %vm3992_vm2, %v3913_v13  ;;  %5133 = vmatmul.mubr.msk.f32.gmra.mxu1 %vm4259_vm4, %v4225_v60  ;;  %v7529_v13 = vld [vmem:[%s320_s8] ss:$0 sm:$0xff]  ;;  %s4773_s8 = sadd.s32 1, %s5413_s18 }
 0x3bd   : > { %3809 = vst.msk [vmem:[#allocation4 + $0x48] sm:$0xff] %vm3799_vm1, %v3722_v43  ;;  %4133 = vrot.lane.b32.xlu1 %v4047_v40, %s5435_s6  ;;  %3942 = vrot.lane.b32.xlu0 %v3855_v8, %s5443_s14  ;;  %v3859_v8 = vld [vmem:[#allocation2 + $0x171] sm:$0xff]  ;;  %p5060_p8 = scmp.ge.s32.totalorder %s4773_s8, 2 }
 0x3bf   : > { %v4106_v17 = vpop.permute.xlu1 %4105  ;;  %v3915_v21 = vpop.permute.xlu0 %3914 }
 0x3c0   : > { %4194 = vst.msk [vmem:[#allocation4 + $0x40] sm:$0xff] %vm4185_vm3, %v4106_v17  ;;  %v2195_v17 = vadd.f32 %v7529_v13, %v7210_v55  ;;  %v2210_v55 = vadd.f32 %v7529_v13, %v7236_v48  ;;  %v3667_v48 = vld [vmem:[#allocation2 + $0x180] sm:$0xff] }
 0x3c1   : > { %4002 = vst.msk [vmem:[#allocation4 + $0x48] sm:$0xff] %vm3992_vm2, %v3915_v21  ;;  %4135 = vrot.lane.b32.xlu1 %v4048_v18, %s5435_s6  ;;  %3558 = vrot.lane.b32.xlu0 %v4047_v40, %s5442_s13  ;;  %v4051_v40 = vld [vmem:[#allocation2 + $0x16a] sm:$0xff]  ;;  %v2200_v21 = vadd.f32 %v7529_v13, %v7218_v11 }
 0x3c3   : > { %v4108_v45 = vpop.permute.xlu1 %4107  ;;  %v3531_v15 = vpop.permute.xlu0 %3530 }
 0x3c4   : > { %4195 = vst.msk [vmem:[#allocation4 + $0x48] sm:$0xff] %vm4185_vm3, %v4108_v45 }
 0x3c5   : > { %3617 = vst.msk [vmem:[#allocation4 + $0x50] sm:$0xff] %vm3606_vm0, %v3531_v15  ;;  %3751 = vrot.lane.b32.xlu1 %v3663_v42, %s5434_s30  ;;  %3560 = vrot.lane.b32.xlu0 %v4048_v18, %s5442_s13  ;;  %v4996_v15 = vmul.f32 -1.442695, %v2195_v17 }
 0x3c7   : > { %v3724_v16 = vpop.permute.xlu1 %3723  ;;  %v3533_v24 = vpop.permute.xlu0 %3532  ;;  %v4226_v35 = vld [vmem:[#allocation4 + $0x40] sm:$0xff]  ;;  %5263 = vpow2.f32 %v4996_v15 }
 0x3c8   : > { %3810 = vst.msk [vmem:[#allocation4 + $0x50] sm:$0xff] %vm3799_vm1, %v3724_v16  ;;  %5135 = vmatprep.mubr.msk.f32.mxu1 %vm4259_vm4, %v4226_v35  ;;  %v4997_v16 = vmul.f32 -1.442695, %v2200_v21  ;;  %v2215_v35 = vadd.f32 %v7529_v13, %v7242_v12 }
 0x3c9   : > { %3618 = vst.msk [vmem:[#allocation4 + $0x58] sm:$0xff] %vm3606_vm0, %v3533_v24  ;;  %3944 = vrot.lane.b32.xlu1 %v3856_v39, %s5443_s14  ;;  %3753 = vrot.lane.b32.xlu0 %v3664_v5, %s5434_s30  ;;  %v2205_v39 = vadd.f32 %v7529_v13, %v7228_v6  ;;  %v3475_v5 = vld [vmem:[#allocation2 + $0x172] sm:$0xff] }
 0x3ca   : > { %5265 = vpow2.f32 %v4997_v16 }
 0x3cb   : > { %v3917_v9 = vpop.permute.xlu1 %3916  ;;  %v3726_v37 = vpop.permute.xlu0 %3725  ;;  %v4227_v19 = vld [vmem:[#allocation4 + $0x48] sm:$0xff]  ;;  %v4998_v6 = vmul.f32 -1.442695, %v2205_v39 }
 0x3cc   : > { %4003 = vst.msk [vmem:[#allocation4 + $0x50] sm:$0xff] %vm3992_vm2, %v3917_v9  ;;  %5136 = vmatmul.mubr.msk.f32.gmra.mxu1 %vm4259_vm4, %v4227_v19  ;;  %v4999_v9 = vmul.f32 -1.442695, %v2210_v55 }
 0x3cd   : > { %3811 = vst.msk [vmem:[#allocation4 + $0x58] sm:$0xff] %vm3799_vm1, %v3726_v37  ;;  %4137 = vrot.lane.b32.xlu1 %v4049_v26, %s5435_s6  ;;  %3946 = vrot.lane.b32.xlu0 %v3857_v0, %s5443_s14  ;;  %v3668_v0 = vld [vmem:[#allocation2 + $0x188] sm:$0xff]  ;;  %5267 = vpow2.f32 %v4998_v6 }
 0x3ce   : > { %5269 = vpow2.f32 %v4999_v9  ;;  %v2265_v9 = vadd.f32 %v7529_v13, %v7316_v50 }
 0x3cf   : > { %v4110_v53 = vpop.permute.xlu1 %4109  ;;  %v3919_v57 = vpop.permute.xlu0 %3918 }
 0x3d0   : > { %4196 = vst.msk [vmem:[#allocation4 + $0x50] sm:$0xff] %vm4185_vm3, %v4110_v53  ;;  %v2225_v53 = vadd.f32 %v7529_v13, %v7257_v20 }
 0x3d1   : > { %4004 = vst.msk [vmem:[#allocation4 + $0x58] sm:$0xff] %vm3992_vm2, %v3919_v57  ;;  %4139 = vrot.lane.b32.xlu1 %v4050_v30, %s5435_s6  ;;  %3562 = vrot.lane.b32.xlu0 %v4049_v26, %s5442_s13  ;;  %v2220_v26 = vadd.f32 %v7529_v13, %v7249_v34  ;;  %v2230_v57 = vadd.f32 %v7529_v13, %v7264_v28 }
 0x3d3   : > { %v4112_v2 = vpop.permute.xlu1 %4111  ;;  %v3535_v61 = vpop.permute.xlu0 %3534  ;;  %v5001_v34 = vmul.f32 -1.442695, %v2220_v26  ;;  %v5003_v28 = vmul.f32 -1.442695, %v2230_v57 }
 0x3d4   : > { %4197 = vst.msk [vmem:[#allocation4 + $0x58] sm:$0xff] %vm4185_vm3, %v4112_v2 }
 0x3d5   : > { %3619 = vst.msk [vmem:[#allocation4 + $0x60] sm:$0xff] %vm3606_vm0, %v3535_v61  ;;  %3755 = vrot.lane.b32.xlu1 %v3665_v1, %s5434_s30  ;;  %3564 = vrot.lane.b32.xlu0 %v4050_v30, %s5442_s13  ;;  %v5000_v30 = vmul.f32 -1.442695, %v2215_v35  ;;  %v3283_v1 = vld [vmem:[#allocation2 + $0x181] sm:$0xff] }
 0x3d7   : > { %v3728_v59 = vpop.permute.xlu1 %3727  ;;  %v3537_v56 = vpop.permute.xlu0 %3536  ;;  %v4228_v44 = vld [vmem:[#allocation4 + $0x50] sm:$0xff]  ;;  %5271 = vpow2.f32 %v5000_v30  ;;  %v2270_v30 = vadd.f32 %v7529_v13, %v7325_v58  ;;  %v5010_v58 = vmul.f32 -1.442695, %v2265_v9  ;;  %v2310_v9 = vadd.f32 %v7529_v13, %v7387_v54 }
 0x3d8   : > { %3812 = vst.msk [vmem:[#allocation4 + $0x60] sm:$0xff] %vm3799_vm1, %v3728_v59  ;;  %5138 = vmatprep.mubr.msk.f32.mxu1 %vm4259_vm4, %v4228_v44  ;;  %5273 = vpow2.f32 %v5001_v34  ;;  %v2240_v59 = vadd.f32 %v7529_v13, %v7277_v31  ;;  %v3861_v44 = vld [vmem:[#allocation2 + $0x189] sm:$0xff]  ;;  %v2250_v31 = vadd.f32 %v7529_v13, %v7292_v52  ;;  %v2260_v52 = vadd.f32 %v7529_v13, %v7307_v29 }
 0x3d9   : > { %3620 = vst.msk [vmem:[#allocation4 + $0x68] sm:$0xff] %vm3606_vm0, %v3537_v56  ;;  %3948 = vrot.lane.b32.xlu1 %v3858_v49, %s5443_s14  ;;  %3757 = vrot.lane.b32.xlu0 %v3666_v10, %s5434_s30  ;;  %v5002_v49 = vmul.f32 -1.442695, %v2225_v53  ;;  %v2235_v10 = vadd.f32 %v7529_v13, %v7270_v22  ;;  %v4053_v56 = vld [vmem:[#allocation2 + $0x182] sm:$0xff]  ;;  %v2320_v54 = vadd.f32 %v7529_v13, %v7309_v7 }
 0x3da   : > { %v5007_v15 = vmul.f32 -1.442695, %v2250_v31  ;;  %v5009_v6 = vmul.f32 -1.442695, %v2260_v52  ;;  %v4055_v31 = vld [vmem:[#allocation2 + $0x19a] sm:$0xff] }
 0x3db   : > { %v3921_v43 = vpop.permute.xlu1 %3920  ;;  %v3730_v60 = vpop.permute.xlu0 %3729  ;;  %v4229_v18 = vld [vmem:[#allocation4 + $0x58] sm:$0xff]  ;;  %5275 = vpow2.f32 %v5002_v49  ;;  %v5004_v22 = vmul.f32 -1.442695, %v2235_v10  ;;  %v3862_v10 = vld [vmem:[#allocation2 + $0x199] sm:$0xff] }
 0x3dc   : > { %4005 = vst.msk [vmem:[#allocation4 + $0x60] sm:$0xff] %vm3992_vm2, %v3921_v43  ;;  %5139 = vmatmul.mubr.msk.f32.gmra.mxu1 %vm4259_vm4, %v4229_v18  ;;  %v2245_v43 = vadd.f32 %v7529_v13, %v7285_v38  ;;  %5277 = vpow2.f32 %v5003_v28  ;;  %v5264_v18 = vpop.eup %5263  ;;  %v2255_v38 = vadd.f32 %v7529_v13, %v7298_v25  ;;  %v3863_v49 = vld [vmem:[#allocation2 + $0x1a1] sm:$0xff]  ;;  %v5011_v28 = vmul.f32 -1.442695, %v2270_v30 }
 0x3dd   : > { %3813 = vst.msk [vmem:[#allocation4 + $0x68] sm:$0xff] %vm3799_vm1, %v3730_v60  ;;  %4141 = vrot.lane.b32.xlu1 %v4051_v40, %s5435_s6  ;;  %3950 = vrot.lane.b32.xlu0 %v3859_v8, %s5443_s14  ;;  %v5005_v60 = vmul.f32 -1.442695, %v2240_v59  ;;  %5279 = vpow2.f32 %v5004_v22  ;;  %v2449_v39 = vadd.f32 1.0, %v5264_v18  ;;  %v2280_v59 = vadd.f32 %v7529_v13, %v7341_v27 }
 0x3de   : > { %v5008_v26 = vmul.f32 -1.442695, %v2255_v38  ;;  %v2285_v27 = vadd.f32 %v7529_v13, %v7350_v47 }
 0x3df   : > { %v4114_v42 = vpop.permute.xlu1 %4113  ;;  %v3923_v45 = vpop.permute.xlu0 %3922  ;;  %5281 = vpow2.f32 %v5005_v60  ;;  %v4056_v60 = vld [vmem:[#allocation2 + $0x1a2] sm:$0xff]  ;;  %v5013_v18 = vmul.f32 -1.442695, %v2280_v59  ;;  %v2330_v59 = vadd.f32 %v7529_v13, %v7327_v36 }
 0x3e0   : > { %4198 = vst.msk [vmem:[#allocation4 + $0x60] sm:$0xff] %vm4185_vm3, %v4114_v42  ;;  %v5266_v42 = vpop.eup %5265  ;;  %v5014_v52 = vmul.f32 -1.442695, %v2285_v27  ;;  %v2335_v27 = vadd.f32 %v7529_v13, %v7335_v62 }
 0x3e1   : > { %4006 = vst.msk [vmem:[#allocation4 + $0x68] sm:$0xff] %vm3992_vm2, %v3923_v45  ;;  %3566 = vrot.lane.b32.xlu1 %v4051_v40, %s5442_s13  ;;  %3375 = vrot.lane.b32.xlu0 %v3859_v8, %s5433_s29  ;;  %v5006_v45 = vmul.f32 -1.442695, %v2245_v43  ;;  %v5268_v16 = vpop.eup %5267  ;;  %v2450_v55 = vadd.f32 1.0, %v5266_v42 }
 0x3e2   : > { %v5270_v35 = vpop.eup %5269 }
 0x3e3   : > { %v4116_v11 = vpop.permute.xlu1 %4115  ;;  %v3539_v24 = vpop.permute.xlu0 %3538  ;;  %5283 = vpow2.f32 %v5006_v45 }
 0x3e4   : > { %4199 = vst.msk [vmem:[#allocation4 + $0x68] sm:$0xff] %vm4185_vm3, %v4116_v11  ;;  %v5272_v29 = vpop.eup %5271  ;;  %5285 = vpow2.f32 %v5007_v15 }
 0x3e5   : > { %3621 = vst.msk [vmem:[#allocation4 + $0x70] sm:$0xff] %vm3606_vm0, %v3539_v24  ;;  %3568 = vrot.lane.b32.xlu1 %v3475_v5, %s5442_s13  ;;  %4143 = vrot.lane.b32.xlu0 %v3475_v5, %s5435_s6  ;;  %v3477_v5 = vld [vmem:[#allocation2 + $0x18a] sm:$0xff]  ;;  %5287 = vrcp.f32 %v2449_v39 }
 0x3e6   : > { %5289 = vrcp.f32 %v2450_v55 }
 0x3e7   : > { %v3732_v37 = vpop.permute.xlu1 %3731  ;;  %v3541_v19 = vpop.permute.xlu0 %3540  ;;  %v4230_v12 = vld [vmem:[#allocation4 + $0x60] sm:$0xff]  ;;  %5291 = vpow2.f32 %v5008_v26 }
 0x3e8   : > { %3814 = vst.msk [vmem:[#allocation4 + $0x70] sm:$0xff] %vm3799_vm1, %v3732_v37  ;;  %5141 = vmatprep.mubr.msk.f32.mxu1 %vm4259_vm4, %v4230_v12  ;;  %v3670_v37 = vld [vmem:[#allocation2 + $0x1a0] sm:$0xff]  ;;  %v2452_v12 = vadd.f32 1.0, %v5270_v35  ;;  %5293 = vpow2.f32 %v5009_v6  ;;  %v2305_v6 = vadd.f32 %v7529_v13, %v7380_v3 }
 0x3e9   : > { %3622 = vst.msk [vmem:[#allocation4 + $0x78] sm:$0xff] %vm3606_vm0, %v3541_v19  ;;  %3761 = vrot.lane.b32.xlu1 %v3668_v0, %s5434_s30  ;;  %3759 = vrot.lane.b32.xlu0 %v3667_v48, %s5434_s30  ;;  %v5274_v0 = vpop.eup %5273  ;;  %v2451_v48 = vadd.f32 1.0, %v5268_v16  ;;  %v3669_v19 = vld [vmem:[#allocation2 + $0x198] sm:$0xff]  ;;  %v2300_v16 = vadd.f32 %v7529_v13, %v7373_v63 }
 0x3ea   : > { %v2454_v50 = vadd.f32 1.0, %v5274_v0 }
 0x3eb   : > { %v3925_v2 = vpop.permute.xlu1 %3924  ;;  %v3734_v61 = vpop.permute.xlu0 %3733  ;;  %v4231_v20 = vld [vmem:[#allocation4 + $0x68] sm:$0xff]  ;;  %5295 = vrcp.f32 %v2451_v48  ;;  %v5017_v48 = vmul.f32 -1.442695, %v2300_v16 }
 0x3ec   : > { %4007 = vst.msk [vmem:[#allocation4 + $0x70] sm:$0xff] %vm3992_vm2, %v3925_v2  ;;  %5142 = vmatmul.mubr.msk.f32.gmra.mxu1 %vm4259_vm4, %v4231_v20  ;;  %v5276_v2 = vpop.eup %5275  ;;  %v2275_v20 = vadd.f32 %v7529_v13, %v7333_v32  ;;  %5297 = vrcp.f32 %v2452_v12 }
 0x3ed   : > { %3815 = vst.msk [vmem:[#allocation4 + $0x78] sm:$0xff] %vm3799_vm1, %v3734_v61  ;;  %3377 = vrot.lane.b32.xlu1 %v3283_v1, %s5433_s29  ;;  %3952 = vrot.lane.b32.xlu0 %v3283_v1, %s5443_s14  ;;  %v2453_v1 = vadd.f32 1.0, %v5272_v29  ;;  %v5278_v61 = vpop.eup %5277 }
 0x3ee   : > { %v2456_v22 = vadd.f32 1.0, %v5278_v61  ;;  %v5012_v43 = vmul.f32 -1.442695, %v2275_v20 }
 0x3ef   : > { %v4118_v40 = vpop.permute.xlu1 %4117  ;;  %v3927_v8 = vpop.permute.xlu0 %3926  ;;  %5299 = vrcp.f32 %v2453_v1 }
 0x3f0   : > { %4200 = vst.msk [vmem:[#allocation4 + $0x70] sm:$0xff] %vm4185_vm3, %v4118_v40  ;;  %v2455_v40 = vadd.f32 1.0, %v5276_v2  ;;  %5301 = vrcp.f32 %v2454_v50  ;;  %v5018_v2 = vmul.f32 -1.442695, %v2305_v6  ;;  %v5019_v50 = vmul.f32 -1.442695, %v2310_v9 }
 0x3f1   : > { %4008 = vst.msk [vmem:[#allocation4 + $0x78] sm:$0xff] %vm3992_vm2, %v3927_v8  ;;  %4145 = vrot.lane.b32.xlu1 %v4053_v56, %s5435_s6  ;;  %3954 = vrot.lane.b32.xlu0 %v3861_v44, %s5443_s14  ;;  %v5280_v8 = vpop.eup %5279  ;;  %5303 = vpow2.f32 %v5010_v58 }
 0x3f2   : > { %v5282_v32 = vpop.eup %5281  ;;  %5305 = vpow2.f32 %v5011_v28  ;;  %v2457_v45 = vadd.f32 1.0, %v5280_v8  ;;  %v5021_v28 = vmul.f32 -1.442695, %v2320_v54 }
 0x3f3   : > { %v4120_v17 = vpop.permute.xlu1 %4119  ;;  %v3543_v21 = vpop.permute.xlu0 %3542  ;;  %5307 = vrcp.f32 %v2455_v40  ;;  %v2458_v15 = vadd.f32 1.0, %v5282_v32 }
 0x3f4   : > { %4201 = vst.msk [vmem:[#allocation4 + $0x78] sm:$0xff] %vm4185_vm3, %v4120_v17  ;;  %v2290_v17 = vadd.f32 %v7529_v13, %v7359_v46  ;;  %v5284_v38 = vpop.eup %5283  ;;  %5309 = vrcp.f32 %v2456_v22  ;;  %v2295_v46 = vadd.f32 %v7529_v13, %v7367_v14 }
 0x3f5   : > { %3623 = vst.msk [vmem:[#allocation4 + $0x80] sm:$0xff] %vm3606_vm0, %v3543_v21  ;;  %3570 = vrot.lane.b32.xlu1 %v4053_v56, %s5442_s13  ;;  %3379 = vrot.lane.b32.xlu0 %v3861_v44, %s5433_s29  ;;  %v5286_v47 = vpop.eup %5285  ;;  %5311 = vpow2.f32 %v5012_v43  ;;  %v2459_v35 = vadd.f32 1.0, %v5284_v38 }
 0x3f6   : > { %v5288_v39 = vpop.eup %5287  ;;  %5313 = vpow2.f32 %v5013_v18  ;;  %v2460_v14 = vadd.f32 1.0, %v5286_v47  ;;  %v5016_v29 = vmul.f32 -1.442695, %v2295_v46  ;;  %v5024_v47 = vmul.f32 -1.442695, %v2335_v27 }
 0x3f7   : > { %v3736_v11 = vpop.permute.xlu1 %3735  ;;  %v3545_v24 = vpop.permute.xlu0 %3544  ;;  %v4232_v25 = vld [vmem:[#allocation4 + $0x70] sm:$0xff]  ;;  %5315 = vrcp.f32 %v2457_v45 }
 0x3f8   : > { %3816 = vst.msk [vmem:[#allocation4 + $0x80] sm:$0xff] %vm3799_vm1, %v3736_v11  ;;  %5144 = vmatprep.mubr.msk.f32.mxu1 %vm4259_vm4, %v4232_v25  ;;  %v5290_v25 = vpop.eup %5289  ;;  %5317 = vrcp.f32 %v2458_v15 }
 0x3f9   : > { %3624 = vst.msk [vmem:[#allocation4 + $0x88] sm:$0xff] %vm3606_vm0, %v3545_v24  ;;  %3572 = vrot.lane.b32.xlu1 %v3477_v5, %s5442_s13  ;;  %4147 = vrot.lane.b32.xlu0 %v3477_v5, %s5435_s6  ;;  %v5015_v5 = vmul.f32 -1.442695, %v2290_v17  ;;  %v5292_v26 = vpop.eup %5291  ;;  %5319 = vpow2.f32 %v5014_v52  ;;  %v2345_v52 = vadd.f32 %v7529_v13, %v7352_v33 }
 0x3fa   : > { %v5294_v63 = vpop.eup %5293 }
 0x3fb   : > { %v3929_v53 = vpop.permute.xlu1 %3928  ;;  %v3738_v34 = vpop.permute.xlu0 %3737  ;;  %v4233_v57 = vld [vmem:[#allocation4 + $0x78] sm:$0xff]  ;;  %5321 = vpow2.f32 %v5015_v5 }
 0x3fc   : > { %4009 = vst.msk [vmem:[#allocation4 + $0x80] sm:$0xff] %vm3992_vm2, %v3929_v53  ;;  %5145 = vmatmul.mubr.msk.f32.gmra.mxu1 %vm4259_vm4, %v4233_v57  ;;  %v5296_v0 = vpop.eup %5295  ;;  %5323 = vrcp.f32 %v2459_v35  ;;  %v2461_v53 = vadd.f32 1.0, %v5292_v26  ;;  %v2462_v57 = vadd.f32 1.0, %v5294_v63  ;;  %v5026_v26 = vmul.f32 -1.442695, %v2345_v52 }
 0x3fd   : > { %3817 = vst.msk [vmem:[#allocation4 + $0x88] sm:$0xff] %vm3799_vm1, %v3738_v34  ;;  %3765 = vrot.lane.b32.xlu1 %v3670_v37, %s5434_s30  ;;  %3763 = vrot.lane.b32.xlu0 %v3669_v19, %s5434_s30  ;;  %v5298_v30 = vpop.eup %5297  ;;  %v2315_v34 = vadd.f32 %v7529_v13, %v7300_v23  ;;  %5325 = vrcp.f32 %v2460_v14 }
 0x3fe   : > { %v5300_v3 = vpop.eup %5299  ;;  %5327 = vpow2.f32 %v5016_v29 }
 0x3ff   : > { %v4122_v56 = vpop.permute.xlu1 %4121  ;;  %v3931_v44 = vpop.permute.xlu0 %3930  ;;  %5329 = vpow2.f32 %v5017_v48 }
 0x400   : > { %4202 = vst.msk [vmem:[#allocation4 + $0x80] sm:$0xff] %vm4185_vm3, %v4122_v56  ;;  %v5302_v1 = vpop.eup %5301  ;;  %5331 = vrcp.f32 %v2461_v53 }
 0x401   : > { %4010 = vst.msk [vmem:[#allocation4 + $0x88] sm:$0xff] %vm3992_vm2, %v3931_v44  ;;  %3958 = vrot.lane.b32.xlu1 %v3863_v49, %s5443_s14  ;;  %3956 = vrot.lane.b32.xlu0 %v3862_v10, %s5443_s14  ;;  %v5304_v23 = vpop.eup %5303  ;;  %v5020_v49 = vmul.f32 -1.442695, %v2315_v34  ;;  %v2325_v10 = vadd.f32 %v7529_v13, %v7318_v51  ;;  %5333 = vrcp.f32 %v2462_v57 }
 0x402   : > { %v5306_v20 = vpop.eup %5305  ;;  %v2463_v44 = vadd.f32 1.0, %v5304_v23  ;;  %5335 = vpow2.f32 %v5018_v2 }
 0x403   : > { %v4124_v21 = vpop.permute.xlu1 %4123  ;;  %v3547_v42 = vpop.permute.xlu0 %3546  ;;  %v2464_v8 = vadd.f32 1.0, %v5306_v20  ;;  %5337 = vpow2.f32 %v5019_v50  ;;  %v5022_v43 = vmul.f32 -1.442695, %v2325_v10 }
 0x404   : > { %4203 = vst.msk [vmem:[#allocation4 + $0x88] sm:$0xff] %vm4185_vm3, %v4124_v21  ;;  %v5308_v7 = vpop.eup %5307  ;;  %5339 = vpow2.f32 %v5020_v49 }
 0x405   : > { %3625 = vst.msk [vmem:[#allocation4 + $0x90] sm:$0xff] %vm3606_vm0, %v3547_v42  ;;  %4151 = vrot.lane.b32.xlu1 %v4056_v60, %s5435_s6  ;;  %4149 = vrot.lane.b32.xlu0 %v4055_v31, %s5435_s6  ;;  %v5310_v56 = vpop.eup %5309  ;;  %5341 = vpow2.f32 %v5021_v28  ;;  %v5023_v60 = vmul.f32 -1.442695, %v2330_v59  ;;  %v2340_v31 = vadd.f32 %v7529_v13, %v7343_v4 }
 0x406   : > { %v5312_v40 = vpop.eup %5311  ;;  %5343 = vrcp.f32 %v2463_v44 }
 0x407   : > { %v3740_v55 = vpop.permute.xlu1 %3739  ;;  %v3549_v11 = vpop.permute.xlu0 %3548  ;;  %v4234_v24 = vld [vmem:[#allocation4 + $0x80] sm:$0xff]  ;;  %v2465_v17 = vadd.f32 1.0, %v5312_v40  ;;  %v5025_v46 = vmul.f32 -1.442695, %v2340_v31 }
 0x408   : > { %3818 = vst.msk [vmem:[#allocation4 + $0x90] sm:$0xff] %vm3799_vm1, %v3740_v55  ;;  %5147 = vmatprep.mubr.msk.f32.mxu1 %vm4259_vm4, %v4234_v24  ;;  %v5314_v32 = vpop.eup %5313  ;;  %5345 = vrcp.f32 %v2464_v8 }
 0x409   : > { %3626 = vst.msk [vmem:[#allocation4 + $0x98] sm:$0xff] %vm3606_vm0, %v3549_v11  ;;  %4615 = vrot.lane.b32.xlu1 %v5290_v25, %s5444_s24  ;;  %4613 = vrot.lane.b32.xlu0 %v5288_v39, %s5444_s24  ;;  %v5316_v36 = vpop.eup %5315  ;;  %v2466_v62 = vadd.f32 1.0, %v5314_v32  ;;  %5347 = vpow2.f32 %v5022_v43  ;;  %v2350_v39 = vadd.f32 %v7529_v13, %v7361_v41 }
 0x40a   : > { %v5318_v18 = vpop.eup %5317  ;;  %5349 = vpow2.f32 %v5023_v60 }
 0x40b   : > { %v3933_v37 = vpop.permute.xlu1 %3932  ;;  %v3742_v19 = vpop.permute.xlu0 %3741  ;;  %v4235_v12 = vld [vmem:[#allocation4 + $0x88] sm:$0xff]  ;;  %v5027_v13 = vmul.f32 -1.442695, %v2350_v39 }
 0x40c   : > { %4011 = vst.msk [vmem:[#allocation4 + $0x90] sm:$0xff] %vm3992_vm2, %v3933_v37  ;;  %5148 = vmatmul.mubr.msk.f32.gmra.mxu1 %vm4259_vm4, %v4235_v12  ;;  %v5320_v21 = vpop.eup %5319  ;;  %5351 = vrcp.f32 %v2465_v17 }
 0x40d   : > { %3819 = vst.msk [vmem:[#allocation4 + $0x98] sm:$0xff] %vm3799_vm1, %v3742_v19  ;;  %4619 = vrot.lane.b32.xlu1 %v5298_v30, %s5444_s24  ;;  %4617 = vrot.lane.b32.xlu0 %v5296_v0, %s5444_s24  ;;  %v5322_v15 = vpop.eup %5321  ;;  %v2467_v16 = vadd.f32 1.0, %v5320_v21  ;;  %5353 = vrcp.f32 %v2466_v62 }
 0x40e   : > { %v5324_v4 = vpop.eup %5323  ;;  %v2468_v55 = vadd.f32 1.0, %v5322_v15  ;;  %5355 = vpow2.f32 %v5024_v47 }
 0x40f   : > { %v4126_v61 = vpop.permute.xlu1 %4125  ;;  %v3935_v58 = vpop.permute.xlu0 %3934 }
 0x410   : > { %4204 = vst.msk [vmem:[#allocation4 + $0x90] sm:$0xff] %vm4185_vm3, %v4126_v61  ;;  %v5326_v5 = vpop.eup %5325  ;;  %5357 = vpow2.f32 %v5025_v46 }
 0x411   : > { %4012 = vst.msk [vmem:[#allocation4 + $0x98] sm:$0xff] %vm3992_vm2, %v3935_v58  ;;  %4623 = vrot.lane.b32.xlu1 %v5302_v1, %s5444_s24  ;;  %4621 = vrot.lane.b32.xlu0 %v5300_v3, %s5444_s24  ;;  %v5328_v33 = vpop.eup %5327  ;;  %5359 = vrcp.f32 %v2467_v16 }
 0x412   : > { %v5330_v35 = vpop.eup %5329  ;;  %v2469_v63 = vadd.f32 1.0, %v5328_v33  ;;  %5361 = vrcp.f32 %v2468_v55 }
 0x413   : > { %v4128_v51 = vpop.permute.xlu1 %4127  ;;  %v3551_v22 = vpop.permute.xlu0 %3550  ;;  %v2470_v6 = vadd.f32 1.0, %v5330_v35 }
 0x414   : > { %4205 = vst.msk [vmem:[#allocation4 + $0x98] sm:$0xff] %vm4185_vm3, %v4128_v51  ;;  %v5332_v41 = vpop.eup %5331  ;;  %5363 = vpow2.f32 %v5026_v26 }
 0x415   : > { %3627 = vst.msk [vmem:[#allocation4 + $0xa0] sm:$0xff] %vm3606_vm0, %v3551_v22  ;;  %4627 = vrot.lane.b32.xlu1 %v5310_v56, %s5444_s24  ;;  %4625 = vrot.lane.b32.xlu0 %v5308_v7, %s5444_s24  ;;  %v5334_v14 = vpop.eup %5333  ;;  %5365 = vpow2.f32 %v5027_v13 }
 0x416   : > { %v5336_v29 = vpop.eup %5335  ;;  %5367 = vrcp.f32 %v2469_v63 }
 0x417   : > { %v3744_v42 = vpop.permute.xlu1 %3743  ;;  %v3553_v45 = vpop.permute.xlu0 %3552  ;;  %v4236_v38 = vld [vmem:[#allocation4 + $0x90] sm:$0xff]  ;;  %v2471_v12 = vadd.f32 1.0, %v5336_v29 }
 0x418   : > { %3820 = vst.msk [vmem:[#allocation4 + $0xa0] sm:$0xff] %vm3799_vm1, %v3744_v42  ;;  %5150 = vmatprep.mubr.msk.f32.mxu1 %vm4259_vm4, %v4236_v38  ;;  %v5338_v9 = vpop.eup %5337  ;;  %5369 = vrcp.f32 %v2470_v6 }
 0x419   : > { %3628 = vst.msk [vmem:[#allocation4 + $0xa8] sm:$0xff] %vm3606_vm0, %v3553_v45  ;;  %4631 = vrot.lane.b32.xlu1 %v5318_v18, %s5444_s24  ;;  %4629 = vrot.lane.b32.xlu0 %v5316_v36, %s5444_s24  ;;  %v5340_v37 = vpop.eup %5339  ;;  %v2472_v53 = vadd.f32 1.0, %v5338_v9  ;;  %5371 = vrcp.f32 %v2471_v12 }
 0x41a   : > { %v5342_v19 = vpop.eup %5341  ;;  %v2473_v2 = vadd.f32 1.0, %v5340_v37 }
 0x41b   : > { %v3937_v11 = vpop.permute.xlu1 %3936  ;;  %v3746_v24 = vpop.permute.xlu0 %3745  ;;  %v4237_v25 = vld [vmem:[#allocation4 + $0x98] sm:$0xff]  ;;  %v2474_v50 = vadd.f32 1.0, %v5342_v19  ;;  %5373 = vrcp.f32 %v2472_v53 }
 0x41c   : > { %4013 = vst.msk [vmem:[#allocation4 + $0xa0] sm:$0xff] %vm3992_vm2, %v3937_v11  ;;  %5151 = vmatmul.mubr.msk.f32.gmra.mxu1 %vm4259_vm4, %v4237_v25  ;;  %v5344_v30 = vpop.eup %5343  ;;  %5375 = vrcp.f32 %v2473_v2 }
 0x41d   : > { %3821 = vst.msk [vmem:[#allocation4 + $0xa8] sm:$0xff] %vm3799_vm1, %v3746_v24  ;;  %4635 = vrot.lane.b32.xlu1 %v5326_v5, %s5444_s24  ;;  %4633 = vrot.lane.b32.xlu0 %v5324_v4, %s5444_s24  ;;  %v5346_v57 = vpop.eup %5345  ;;  %5377 = vrcp.f32 %v2474_v50 }
 0x41e   : > { %v5348_v54 = vpop.eup %5347 }
 0x41f   : > { %v4130_v0 = vpop.permute.xlu1 %4129  ;;  %v3939_v48 = vpop.permute.xlu0 %3938  ;;  %v2475_v28 = vadd.f32 1.0, %v5348_v54 }
 0x420   : > { %4206 = vst.msk [vmem:[#allocation4 + $0xa0] sm:$0xff] %vm4185_vm3, %v4130_v0  ;;  %v5350_v1 = vpop.eup %5349 }
 0x421   : > { %4014 = vst.msk [vmem:[#allocation4 + $0xa8] sm:$0xff] %vm3992_vm2, %v3939_v48  ;;  %4639 = vrot.lane.b32.xlu1 %v5334_v14, %s5444_s24  ;;  %4637 = vrot.lane.b32.xlu0 %v5332_v41, %s5444_s24  ;;  %v5352_v23 = vpop.eup %5351  ;;  %v2476_v56 = vadd.f32 1.0, %v5350_v1  ;;  %5379 = vrcp.f32 %v2475_v28 }
 0x422   : > { %v5354_v49 = vpop.eup %5353 }
 0x423   : > { %v4132_v34 = vpop.permute.xlu1 %4131  ;;  %v3555_v3 = vpop.permute.xlu0 %3554  ;;  %5381 = vrcp.f32 %v2476_v56 }
 0x424   : > { %4207 = vst.msk [vmem:[#allocation4 + $0xa8] sm:$0xff] %vm4185_vm3, %v4132_v34  ;;  %v5356_v10 = vpop.eup %5355 }
 0x425   : > { %3629 = vst.msk [vmem:[#allocation4 + $0xb0] sm:$0xff] %vm3606_vm0, %v3555_v3  ;;  %4643 = vrot.lane.b32.xlu1 %v5346_v57, %s5444_s24  ;;  %4641 = vrot.lane.b32.xlu0 %v5344_v30, %s5444_s24  ;;  %v5358_v7 = vpop.eup %5357  ;;  %v2477_v43 = vadd.f32 1.0, %v5356_v10 }
 0x426   : > { %v5360_v59 = vpop.eup %5359  ;;  %v2478_v36 = vadd.f32 1.0, %v5358_v7 }
 0x427   : > { %v3748_v61 = vpop.permute.xlu1 %3747  ;;  %v3557_v58 = vpop.permute.xlu0 %3556  ;;  %v4238_v20 = vld [vmem:[#allocation4 + $0xa0] sm:$0xff]  ;;  %5383 = vrcp.f32 %v2477_v43 }
 0x428   : > { %3822 = vst.msk [vmem:[#allocation4 + $0xb0] sm:$0xff] %vm3799_vm1, %v3748_v61  ;;  %5153 = vmatprep.mubr.msk.f32.mxu1 %vm4259_vm4, %v4238_v20  ;;  %v5362_v51 = vpop.eup %5361  ;;  %5385 = vrcp.f32 %v2478_v36 }
 0x429   : > { %3630 = vst.msk [vmem:[#allocation4 + $0xb8] sm:$0xff] %vm3606_vm0, %v3557_v58  ;;  %4647 = vrot.lane.b32.xlu1 %v5354_v49, %s5444_s24  ;;  %4645 = vrot.lane.b32.xlu0 %v5352_v23, %s5444_s24  ;;  %v5364_v22 = vpop.eup %5363 }
 0x42a   : > { %v5366_v32 = vpop.eup %5365  ;;  %v2479_v17 = vadd.f32 1.0, %v5364_v22 }
 0x42b   : > { %v3941_v44 = vpop.permute.xlu1 %3940  ;;  %v3750_v40 = vpop.permute.xlu0 %3749  ;;  %v4239_v8 = vld [vmem:[#allocation4 + $0xa8] sm:$0xff]  ;;  %v2480_v62 = vadd.f32 1.0, %v5366_v32 }
 0x42c   : > { %4015 = vst.msk [vmem:[#allocation4 + $0xb0] sm:$0xff] %vm3992_vm2, %v3941_v44  ;;  %5154 = vmatmul.mubr.msk.f32.gmra.mxu1 %vm4259_vm4, %v4239_v8  ;;  %v5368_v27 = vpop.eup %5367  ;;  %5387 = vrcp.f32 %v2479_v17 }
 0x42d   : > { %3823 = vst.msk [vmem:[#allocation4 + $0xb8] sm:$0xff] %vm3799_vm1, %v3750_v40  ;;  %4651 = vrot.lane.b32.xlu1 %v5362_v51, %s5444_s24  ;;  %4649 = vrot.lane.b32.xlu0 %v5360_v59, %s5444_s24  ;;  %v5370_v18 = vpop.eup %5369  ;;  %5389 = vrcp.f32 %v2480_v62 }
 0x42e   : > { %v5372_v21 = vpop.eup %5371 }
 0x42f   : > { %v4134_v60 = vpop.permute.xlu1 %4133  ;;  %v3943_v31 = vpop.permute.xlu0 %3942 }
 0x430   : > { %4208 = vst.msk [vmem:[#allocation4 + $0xb0] sm:$0xff] %vm4185_vm3, %v4134_v60  ;;  %v5374_v38 = vpop.eup %5373 }
 0x431   : > { %4016 = vst.msk [vmem:[#allocation4 + $0xb8] sm:$0xff] %vm3992_vm2, %v3943_v31  ;;  %4655 = vrot.lane.b32.xlu1 %v5370_v18, %s5444_s24  ;;  %4653 = vrot.lane.b32.xlu0 %v5368_v27, %s5444_s24  ;;  %v5376_v15 = vpop.eup %5375 }
 0x432   : > { %v5378_v46 = vpop.eup %5377 }
 0x433   : > { %v4136_v42 = vpop.permute.xlu1 %4135  ;;  %v3559_v45 = vpop.permute.xlu0 %3558 }
 0x434   : > { %4209 = vst.msk [vmem:[#allocation4 + $0xb8] sm:$0xff] %vm4185_vm3, %v4136_v42  ;;  %v5380_v39 = vpop.eup %5379 }
 0x435   : > { %3631 = vst.msk [vmem:[#allocation4 + $0xc0] sm:$0xff] %vm3606_vm0, %v3559_v45  ;;  %4659 = vrot.lane.b32.xlu1 %v5374_v38, %s5444_s24  ;;  %4657 = vrot.lane.b32.xlu0 %v5372_v21, %s5444_s24  ;;  %v5382_v55 = vpop.eup %5381 }
 0x436   : > { %v5384_v11 = vpop.eup %5383 }
 0x437   : > { %v3752_v47 = vpop.permute.xlu1 %3751  ;;  %v3561_v52 = vpop.permute.xlu0 %3560  ;;  %v4240_v4 = vld [vmem:[#allocation4 + $0xb0] sm:$0xff] }
 0x438   : > { %3824 = vst.msk [vmem:[#allocation4 + $0xc0] sm:$0xff] %vm3799_vm1, %v3752_v47  ;;  %5156 = vmatprep.mubr.msk.f32.mxu1 %vm4259_vm4, %v4240_v4  ;;  %v5386_v35 = vpop.eup %5385 }
 0x439   : > { %3632 = vst.msk [vmem:[#allocation4 + $0xc8] sm:$0xff] %vm3606_vm0, %v3561_v52  ;;  %4663 = vrot.lane.b32.xlu1 %v5378_v46, %s5444_s24  ;;  %4661 = vrot.lane.b32.xlu0 %v5376_v15, %s5444_s24  ;;  %v5388_v26 = vpop.eup %5387 }
 0x43a   : > { %v5390_v14 = vpop.eup %5389 }
 0x43b   : > { %v3945_v5 = vpop.permute.xlu1 %3944  ;;  %v3754_v16 = vpop.permute.xlu0 %3753  ;;  %v4241_v33 = vld [vmem:[#allocation4 + $0xb8] sm:$0xff] }
 0x43c   : > { %4017 = vst.msk [vmem:[#allocation4 + $0xc0] sm:$0xff] %vm3992_vm2, %v3945_v5  ;;  %5157 = vmatmul.mubr.msk.f32.gmra.mxu1 %vm4259_vm4, %v4241_v33 }
 0x43d   : > { %3825 = vst.msk [vmem:[#allocation4 + $0xc8] sm:$0xff] %vm3799_vm1, %v3754_v16  ;;  %4667 = vrot.lane.b32.xlu1 %v5382_v55, %s5444_s24  ;;  %4665 = vrot.lane.b32.xlu0 %v5380_v39, %s5444_s24 }
 0x43f   : > { %v4138_v24 = vpop.permute.xlu1 %4137  ;;  %v3947_v25 = vpop.permute.xlu0 %3946 }
 0x440   : > { %4210 = vst.msk [vmem:[#allocation4 + $0xc0] sm:$0xff] %vm4185_vm3, %v4138_v24 }
 0x441   : > { %4018 = vst.msk [vmem:[#allocation4 + $0xc8] sm:$0xff] %vm3992_vm2, %v3947_v25  ;;  %4671 = vrot.lane.b32.xlu1 %v5386_v35, %s5444_s24  ;;  %4669 = vrot.lane.b32.xlu0 %v5384_v11, %s5444_s24 }
 0x443   : > { %v4140_v41 = vpop.permute.xlu1 %4139  ;;  %v3563_v13 = vpop.permute.xlu0 %3562 }
 0x444   : > { %4211 = vst.msk [vmem:[#allocation4 + $0xc8] sm:$0xff] %vm4185_vm3, %v4140_v41 }
 0x445   : > { %3633 = vst.msk [vmem:[#allocation4 + $0xd0] sm:$0xff] %vm3606_vm0, %v3563_v13  ;;  %4675 = vrot.lane.b32.xlu1 %v5390_v14, %s5444_s24  ;;  %4673 = vrot.lane.b32.xlu0 %v5388_v26, %s5444_s24 }
 0x447   : > { %v3756_v63 = vpop.permute.xlu1 %3755  ;;  %v3565_v29 = vpop.permute.xlu0 %3564  ;;  %v4242_v6 = vld [vmem:[#allocation4 + $0xc0] sm:$0xff] }
 0x448   : > { %3826 = vst.msk [vmem:[#allocation4 + $0xd0] sm:$0xff] %vm3799_vm1, %v3756_v63  ;;  %5159 = vmatprep.mubr.msk.f32.mxu1 %vm4259_vm4, %v4242_v6 }
 0x449   : > { %3634 = vst.msk [vmem:[#allocation4 + $0xd8] sm:$0xff] %vm3606_vm0, %v3565_v29 }
 0x44b   : > { %v3949_v0 = vpop.permute.xlu1 %3948  ;;  %v3758_v48 = vpop.permute.xlu0 %3757  ;;  %v4243_v9 = vld [vmem:[#allocation4 + $0xc8] sm:$0xff] }
 0x44c   : > { %4019 = vst.msk [vmem:[#allocation4 + $0xd0] sm:$0xff] %vm3992_vm2, %v3949_v0  ;;  %5160 = vmatmul.mubr.msk.f32.gmra.mxu1 %vm4259_vm4, %v4243_v9  ;;  %v5125_v56 = vpop.f32.mrf.mxu1 }
 0x44d   : > { %3827 = vst.msk [vmem:[#allocation4 + $0xd8] sm:$0xff] %vm3799_vm1, %v3758_v48 }
 0x44e   : > { %v4422_v51 = vpop.f32.mrf.mxu1 }
 0x44f   : > { %v4142_v37 = vpop.permute.xlu1 %4141  ;;  %v3951_v19 = vpop.permute.xlu0 %3950 }
 0x450   : > { %4212 = vst.msk [vmem:[#allocation4 + $0xd0] sm:$0xff] %vm4185_vm3, %v4142_v37 }
 0x451   : > { %4020 = vst.msk [vmem:[#allocation4 + $0xd8] sm:$0xff] %vm3992_vm2, %v3951_v19 }
 0x453   : > { %v3567_v12 = vpop.permute.xlu1 %3566  ;;  %v3376_v30 = vpop.permute.xlu0 %3375 }
 0x454   : > { %3635 = vst.msk [vmem:[#allocation4 + $0xe0] sm:$0xff] %vm3606_vm0, %v3567_v12 }
 0x455   : > { %3443 = vst.msk [vmem:[#allocation4 + $0xe8] sm:$0xff] %vm3413_vm15, %v3376_v30 }
 0x457   : > { %v3569_v53 = vpop.permute.xlu1 %3568  ;;  %v4144_v34 = vpop.permute.xlu0 %4143  ;;  %v4244_v3 = vld [vmem:[#allocation4 + $0xd0] sm:$0xff] }
 0x458   : > { %3636 = vst.msk [vmem:[#allocation4 + $0xe8] sm:$0xff] %vm3606_vm0, %v3569_v53  ;;  %5162 = vmatprep.mubr.msk.f32.mxu1 %vm4259_vm4, %v4244_v3 }
 0x459   : > { %4213 = vst.msk [vmem:[#allocation4 + $0xd8] sm:$0xff] %vm4185_vm3, %v4144_v34 }
 0x45b   : > { %v3762_v57 = vpop.permute.xlu1 %3761  ;;  %v3760_v54 = vpop.permute.xlu0 %3759 }
 0x45c   : > { %3829 = vst.msk [vmem:[#allocation4 + $0xe8] sm:$0xff] %vm3799_vm1, %v3762_v57  ;;  %3828 = vst.msk [vmem:[#allocation4 + $0xe0] sm:$0xff] %vm3799_vm1, %v3760_v54  ;;  %v5128_v22 = vpop.f32.mrf.mxu1 }
 0x45e   : > { %v4432_v27 = vpop.f32.mrf.mxu1 }
 0x45f   : > { %v3378_v1 = vpop.permute.xlu1 %3377  ;;  %v3953_v2 = vpop.permute.xlu0 %3952 }
 0x460   : > { %v4245_v23 = vld [vmem:[#allocation4 + $0xd8] sm:$0xff]  ;;  %3444 = vst.msk [vmem:[#allocation4 + $0xf0] sm:$0xff] %vm3413_vm15, %v3378_v1 }
 0x461   : > { %4021 = vst.msk [vmem:[#allocation4 + $0xe0] sm:$0xff] %vm3992_vm2, %v3953_v2  ;;  %5163 = vmatmul.mubr.msk.f32.gmra.mxu1 %vm4259_vm4, %v4245_v23 }
 0x463   : > { %v4146_v50 = vpop.permute.xlu1 %4145  ;;  %v3955_v61 = vpop.permute.xlu0 %3954 }
 0x464   : > { %4214 = vst.msk [vmem:[#allocation4 + $0xe0] sm:$0xff] %vm4185_vm3, %v4146_v50 }
 0x465   : > { %4022 = vst.msk [vmem:[#allocation4 + $0xe8] sm:$0xff] %vm3992_vm2, %v3955_v61 }
 0x467   : > { %v3571_v58 = vpop.permute.xlu1 %3570  ;;  %v3380_v20 = vpop.permute.xlu0 %3379 }
 0x468   : > { %3637 = vst.msk [vmem:[#allocation4 + $0xf0] sm:$0xff] %vm3606_vm0, %v3571_v58 }
 0x469   : > { %3445 = vst.msk [vmem:[#allocation4 + $0xf8] sm:$0xff] %vm3413_vm15, %v3380_v20 }
 0x46b   : > { %v3573_v49 = vpop.permute.xlu1 %3572  ;;  %v4148_v10 = vpop.permute.xlu0 %4147  ;;  %v4246_v7 = vld [vmem:[#allocation4 + $0xe0] sm:$0xff] }
 0x46c   : > { %3638 = vst.msk [vmem:[#allocation4 + $0xf8] sm:$0xff] %vm3606_vm0, %v3573_v49  ;;  %5165 = vmatprep.mubr.msk.f32.mxu1 %vm4259_vm4, %v4246_v7  ;;  %v5131_v31 = vpop.f32.mrf.mxu1 }
 0x46d   : > { %4215 = vst.msk [vmem:[#allocation4 + $0xe8] sm:$0xff] %vm4185_vm3, %v4148_v10 }
 0x46e   : > { %v4442_v38 = vpop.f32.mrf.mxu1 }
 0x46f   : > { %v3766_v28 = vpop.permute.xlu1 %3765  ;;  %v3764_v59 = vpop.permute.xlu0 %3763 }
 0x470   : > { %3831 = vst.msk [vmem:[#allocation4 + $0xf8] sm:$0xff] %vm3799_vm1, %v3766_v28  ;;  %3830 = vst.msk [vmem:[#allocation4 + $0xf0] sm:$0xff] %vm3799_vm1, %v3764_v59 }
 0x473   : > { %v3959_v44 = vpop.permute.xlu1 %3958  ;;  %v3957_v40 = vpop.permute.xlu0 %3956 }
 0x474   : > { %v4247_v8 = vld [vmem:[#allocation4 + $0xe8] sm:$0xff]  ;;  %4024 = vst.msk [vmem:[#allocation4 + $0xf8] sm:$0xff] %vm3992_vm2, %v3959_v44  ;;  %4023 = vst.msk [vmem:[#allocation4 + $0xf0] sm:$0xff] %vm3992_vm2, %v3957_v40 }
 0x475   : > { %5166 = vmatmul.mubr.msk.f32.gmra.mxu1 %vm4259_vm4, %v4247_v8 }
 0x477   : > { %v4152_v32 = vpop.permute.xlu1 %4151  ;;  %v4150_v43 = vpop.permute.xlu0 %4149 }
 0x478   : > { %4217 = vst.msk [vmem:[#allocation4 + $0xf8] sm:$0xff] %vm4185_vm3, %v4152_v32  ;;  %4216 = vst.msk [vmem:[#allocation4 + $0xf0] sm:$0xff] %vm4185_vm3, %v4150_v43 }
 0x47b   : > { %v4616_v36 = vpop.permute.xlu1 %4615  ;;  %v4614_v60 = vpop.permute.xlu0 %4613 }
 0x47c   : > { %v7748_v18 = vmul.f32 %v5125_v56, %v4616_v36  ;;  %v7750_v17 = vmul.f32 %v4614_v60, %v4422_v51  ;;  %v5134_v52 = vpop.f32.mrf.mxu1 }
 0x47e   : > { %4742 = vst.msk [vmem:[%s5536_s28 + $0x8] sm:$0xff] %vm2577_vm5, %v7748_v18  ;;  %4741 = vst.msk [vmem:[%s5536_s28] sm:$0xff] %vm2577_vm5, %v7750_v17  ;;  %v4452_v16 = vpop.f32.mrf.mxu1 }
 0x47f   : > { %v4620_v21 = vpop.permute.xlu1 %4619  ;;  %v4618_v62 = vpop.permute.xlu0 %4617  ;;  %v4248_v42 = vld [vmem:[#allocation4 + $0xf0] sm:$0xff]  ;;  %v4249_v45 = vld [vmem:[#allocation4 + $0xf8] sm:$0xff] }
 0x480   : > { %v7758_v15 = vmul.f32 %v5128_v22, %v4620_v21  ;;  %v7760_v47 = vmul.f32 %v4618_v62, %v4432_v27  ;;  %5168 = vmatprep.mubr.msk.f32.mxu1 %vm4259_vm4, %v4248_v42 }
 0x481   : > { %5169 = vmatmul.mubr.msk.f32.gmra.mxu1 %vm4259_vm4, %v4249_v45 }
 0x482   : > { %4744 = vst.msk [vmem:[%s5536_s28 + $0x18] sm:$0xff] %vm2577_vm5, %v7758_v15  ;;  %4743 = vst.msk [vmem:[%s5536_s28 + $0x10] sm:$0xff] %vm2577_vm5, %v7760_v47 }
 0x483   : > { %v4624_v4 = vpop.permute.xlu1 %4623  ;;  %v4622_v46 = vpop.permute.xlu0 %4621 }
 0x484   : > { %v7770_v39 = vmul.f32 %v5131_v31, %v4624_v4  ;;  %v7772_v5 = vmul.f32 %v4622_v46, %v4442_v38 }
 0x486   : > { %4746 = vst.msk [vmem:[%s5536_s28 + $0x28] sm:$0xff] %vm2577_vm5, %v7770_v39  ;;  %4745 = vst.msk [vmem:[%s5536_s28 + $0x20] sm:$0xff] %vm2577_vm5, %v7772_v5 }
 0x487   : > { %v4628_v33 = vpop.permute.xlu1 %4627  ;;  %v4626_v55 = vpop.permute.xlu0 %4625 }
 0x488   : > { %v7780_v11 = vmul.f32 %v5134_v52, %v4628_v33  ;;  %v7782_v24 = vmul.f32 %v4626_v55, %v4452_v16 }
 0x48a   : > { %4748 = vst.msk [vmem:[%s5536_s28 + $0x38] sm:$0xff] %vm2577_vm5, %v7780_v11  ;;  %4747 = vst.msk [vmem:[%s5536_s28 + $0x30] sm:$0xff] %vm2577_vm5, %v7782_v24 }
 0x48b   : > { %v4632_v25 = vpop.permute.xlu1 %4631  ;;  %v4630_v41 = vpop.permute.xlu0 %4629 }
 0x48c   : > { %v5137_v35 = vpop.f32.mrf.mxu1 }
 0x48d   : > { %v7790_v26 = vmul.f32 %v5137_v35, %v4632_v25 }
 0x48e   : > { %v4462_v13 = vpop.f32.mrf.mxu1 }
 0x48f   : > { %4750 = vst.msk [vmem:[%s5536_s28 + $0x48] sm:$0xff] %vm2577_vm5, %v7790_v26  ;;  %v7795_v14 = vmul.f32 %v4630_v41, %v4462_v13  ;;  %v4636_v63 = vpop.permute.xlu1 %4635  ;;  %v4634_v0 = vpop.permute.xlu0 %4633 }
 0x491   : > { %4749 = vst.msk [vmem:[%s5536_s28 + $0x40] sm:$0xff] %vm2577_vm5, %v7795_v14 }
 0x493   : > { %v4640_v37 = vpop.permute.xlu1 %4639  ;;  %v4638_v30 = vpop.permute.xlu0 %4637 }
 0x497   : > { %v4644_v3 = vpop.permute.xlu1 %4643  ;;  %v4642_v1 = vpop.permute.xlu0 %4641 }
 0x49b   : > { %v4648_v50 = vpop.permute.xlu1 %4647  ;;  %v4646_v20 = vpop.permute.xlu0 %4645 }
 0x49c   : > { %v5140_v29 = vpop.f32.mrf.mxu1 }
 0x49d   : > { %v7800_v6 = vmul.f32 %v5140_v29, %v4636_v63 }
 0x49e   : > { %v4472_v48 = vpop.f32.mrf.mxu1 }
 0x49f   : > { %4752 = vst.msk [vmem:[%s5536_s28 + $0x58] sm:$0xff] %vm2577_vm5, %v7800_v6  ;;  %v7805_v9 = vmul.f32 %v4634_v0, %v4472_v48  ;;  %v4652_v7 = vpop.permute.xlu1 %4651  ;;  %v4650_v56 = vpop.permute.xlu0 %4649 }
 0x4a1   : > { %4751 = vst.msk [vmem:[%s5536_s28 + $0x50] sm:$0xff] %vm2577_vm5, %v7805_v9 }
 0x4a3   : > { %v4656_v8 = vpop.permute.xlu1 %4655  ;;  %v4654_v32 = vpop.permute.xlu0 %4653 }
 0x4a7   : > { %v4660_v36 = vpop.permute.xlu1 %4659  ;;  %v4658_v21 = vpop.permute.xlu0 %4657 }
 0x4ab   : > { %v4664_v45 = vpop.permute.xlu1 %4663  ;;  %v4662_v4 = vpop.permute.xlu0 %4661 }
 0x4ac   : > { %v5143_v19 = vpop.f32.mrf.mxu1 }
 0x4ad   : > { %v7810_v12 = vmul.f32 %v5143_v19, %v4640_v37 }
 0x4ae   : > { %v4482_v53 = vpop.f32.mrf.mxu1 }
 0x4af   : > { %4754 = vst.msk [vmem:[%s5536_s28 + $0x68] sm:$0xff] %vm2577_vm5, %v7810_v12  ;;  %v7815_v34 = vmul.f32 %v4638_v30, %v4482_v53  ;;  %v4668_v33 = vpop.permute.xlu1 %4667  ;;  %v4666_v35 = vpop.permute.xlu0 %4665 }
 0x4b1   : > { %4753 = vst.msk [vmem:[%s5536_s28 + $0x60] sm:$0xff] %vm2577_vm5, %v7815_v34 }
 0x4b3   : > { %v4672_v63 = vpop.permute.xlu1 %4671  ;;  %v4670_v48 = vpop.permute.xlu0 %4669 }
 0x4b7   : > { %v4676_v30 = vpop.permute.xlu1 %4675 }
 0x4bc   : > { %v5146_v57 = vpop.f32.mrf.mxu1 }
 0x4bd   : > { %v7820_v54 = vmul.f32 %v5146_v57, %v4644_v3  ;;  %v4674_v57 = vpop.permute.xlu0 %4673 }
 0x4be   : > { %v4492_v2 = vpop.f32.mrf.mxu1 }
 0x4bf   : > { %4756 = vst.msk [vmem:[%s5536_s28 + $0x78] sm:$0xff] %vm2577_vm5, %v7820_v54  ;;  %v7825_v23 = vmul.f32 %v4642_v1, %v4492_v2 }
 0x4c1   : > { %4755 = vst.msk [vmem:[%s5536_s28 + $0x70] sm:$0xff] %vm2577_vm5, %v7825_v23 }
 0x4cc   : > { %v5149_v61 = vpop.f32.mrf.mxu1 }
 0x4cd   : > { %v7831_v58 = vmul.f32 %v5149_v61, %v4648_v50 }
 0x4ce   : > { %v4502_v49 = vpop.f32.mrf.mxu1 }
 0x4cf   : > { %4758 = vst.msk [vmem:[%s5536_s28 + $0x88] sm:$0xff] %vm2577_vm5, %v7831_v58  ;;  %v7836_v10 = vmul.f32 %v4646_v20, %v4502_v49 }
 0x4d1   : > { %4757 = vst.msk [vmem:[%s5536_s28 + $0x80] sm:$0xff] %vm2577_vm5, %v7836_v10 }
 0x4dc   : > { %v5152_v28 = vpop.f32.mrf.mxu1 }
 0x4dd   : > { %v7841_v59 = vmul.f32 %v5152_v28, %v4652_v7 }
 0x4de   : > { %v4512_v44 = vpop.f32.mrf.mxu1 }
 0x4df   : > { %4760 = vst.msk [vmem:[%s5536_s28 + $0x98] sm:$0xff] %vm2577_vm5, %v7841_v59  ;;  %v7846_v40 = vmul.f32 %v4650_v56, %v4512_v44 }
 0x4e1   : > { %4759 = vst.msk [vmem:[%s5536_s28 + $0x90] sm:$0xff] %vm2577_vm5, %v7846_v40 }
 0x4ec   : > { %v5155_v51 = vpop.f32.mrf.mxu1 }
 0x4ed   : > { %v7851_v22 = vmul.f32 %v5155_v51, %v4656_v8 }
 0x4ee   : > { %v4522_v43 = vpop.f32.mrf.mxu1 }
 0x4ef   : > { %4762 = vst.msk [vmem:[%s5536_s28 + $0xa8] sm:$0xff] %vm2577_vm5, %v7851_v22  ;;  %v7856_v27 = vmul.f32 %v4654_v32, %v4522_v43 }
 0x4f1   : > { %4761 = vst.msk [vmem:[%s5536_s28 + $0xa0] sm:$0xff] %vm2577_vm5, %v7856_v27 }
 0x4fc   : > { %v5158_v60 = vpop.f32.mrf.mxu1 }
 0x4fd   : > { %v7861_v31 = vmul.f32 %v5158_v60, %v4660_v36 }
 0x4fe   : > { %v4532_v62 = vpop.f32.mrf.mxu1 }
 0x4ff   : > { %4764 = vst.msk [vmem:[%s5536_s28 + $0xb8] sm:$0xff] %vm2577_vm5, %v7861_v31  ;;  %v4731_v42 = vmul.f32 %v4658_v21, %v4532_v62 }
 0x501   : > { %4763 = vst.msk [vmem:[%s5536_s28 + $0xb0] sm:$0xff] %vm2577_vm5, %v4731_v42 }
 0x50c   : > { %v5161_v38 = vpop.f32.mrf.mxu1 }
 0x50d   : > { %v4734_v52 = vmul.f32 %v5161_v38, %v4664_v45 }
 0x50e   : > { %v4542_v46 = vpop.f32.mrf.mxu1 }
 0x50f   : > { %4766 = vst.msk [vmem:[%s5536_s28 + $0xc8] sm:$0xff] %vm2577_vm5, %v4734_v52  ;;  %v4733_v16 = vmul.f32 %v4662_v4, %v4542_v46 }
 0x511   : > { %4765 = vst.msk [vmem:[%s5536_s28 + $0xc0] sm:$0xff] %vm2577_vm5, %v4733_v16 }
 0x521   : > { %v5164_v55 = vpop.f32.mrf.mxu1 }
 0x522   : > { %v4736_v25 = vmul.f32 %v5164_v55, %v4668_v33 }
 0x523   : > { %v4552_v41 = vpop.f32.mrf.mxu1 }
 0x524   : > { %4768 = vst.msk [vmem:[%s5536_s28 + $0xd8] sm:$0xff] %vm2577_vm5, %v4736_v25  ;;  %v4735_v13 = vmul.f32 %v4666_v35, %v4552_v41 }
 0x526   : > { %4767 = vst.msk [vmem:[%s5536_s28 + $0xd0] sm:$0xff] %vm2577_vm5, %v4735_v13 }
 0x535   : > { %v5167_v29 = vpop.f32.mrf.mxu1 }
 0x536   : > { %v4738_v0 = vmul.f32 %v5167_v29, %v4672_v63 }
 0x537   : > { %v4562_v37 = vpop.f32.mrf.mxu1 }
 0x538   : > { %4770 = vst.msk [vmem:[%s5536_s28 + $0xe8] sm:$0xff] %vm2577_vm5, %v4738_v0  ;;  %v4737_v19 = vmul.f32 %v4670_v48, %v4562_v37 }
 0x53a   : > { %4769 = vst.msk [vmem:[%s5536_s28 + $0xe0] sm:$0xff] %vm2577_vm5, %v4737_v19 }
 0x541   : > { %v5170_v53 = vpop.f32.mrf.mxu1 }
 0x542   : > { %v4740_v3 = vmul.f32 %v5170_v53, %v4676_v30  ;;  %4777 = sbr.rel (%p5060_p8) target bundleno = 1367 (0x557), region = 48 }
 0x543   : > { %v4572_v1 = vpop.f32.mrf.mxu1 }
 0x544   : > { %4772 = vst.msk [vmem:[%s5536_s28 + $0xf8] sm:$0xff] %vm2577_vm5, %v4740_v3  ;;  %v4739_v2 = vmul.f32 %v4674_v57, %v4572_v1 }
 0x546   : > { %4771 = vst.msk [vmem:[%s5536_s28 + $0xf0] sm:$0xff] %vm2577_vm5, %v4739_v2 }
 0x547   : > { %4778 = vst.msk [vmem:[#allocation2 + $0x19] sm:$0xff] %vm2577_vm5, %v7750_v17  ;;  %4779 = vst.msk [vmem:[#allocation2 + $0x21] sm:$0xff] %vm2577_vm5, %v7748_v18 }
 0x548   : > { %4780 = vst.msk [vmem:[#allocation2 + $0x31] sm:$0xff] %vm2577_vm5, %v7760_v47  ;;  %4781 = vst.msk [vmem:[#allocation2 + $0x39] sm:$0xff] %vm2577_vm5, %v7758_v15 }
 0x549   : > { %4782 = vst.msk [vmem:[#allocation2 + $0x49] sm:$0xff] %vm2577_vm5, %v7772_v5  ;;  %4783 = vst.msk [vmem:[#allocation2 + $0x51] sm:$0xff] %vm2577_vm5, %v7770_v39 }
 0x54a   : > { %4784 = vst.msk [vmem:[#allocation2 + $0x61] sm:$0xff] %vm2577_vm5, %v7782_v24  ;;  %4785 = vst.msk [vmem:[#allocation2 + $0x69] sm:$0xff] %vm2577_vm5, %v7780_v11 }
 0x54b   : > { %4786 = vst.msk [vmem:[#allocation2 + $0x79] sm:$0xff] %vm2577_vm5, %v7795_v14  ;;  %4787 = vst.msk [vmem:[#allocation2 + $0x81] sm:$0xff] %vm2577_vm5, %v7790_v26 }
 0x54c   : > { %4788 = vst.msk [vmem:[#allocation2 + $0x91] sm:$0xff] %vm2577_vm5, %v7805_v9  ;;  %4789 = vst.msk [vmem:[#allocation2 + $0x99] sm:$0xff] %vm2577_vm5, %v7800_v6 }
 0x54d   : > { %4790 = vst.msk [vmem:[#allocation2 + $0xa9] sm:$0xff] %vm2577_vm5, %v7815_v34  ;;  %4791 = vst.msk [vmem:[#allocation2 + $0xb1] sm:$0xff] %vm2577_vm5, %v7810_v12 }
 0x54e   : > { %4792 = vst.msk [vmem:[#allocation2 + $0xc1] sm:$0xff] %vm2577_vm5, %v7825_v23  ;;  %4793 = vst.msk [vmem:[#allocation2 + $0xc9] sm:$0xff] %vm2577_vm5, %v7820_v54 }
 0x54f   : > { %4794 = vst.msk [vmem:[#allocation2 + $0xd9] sm:$0xff] %vm2577_vm5, %v7836_v10  ;;  %4795 = vst.msk [vmem:[#allocation2 + $0xe1] sm:$0xff] %vm2577_vm5, %v7831_v58 }
 0x550   : > { %4796 = vst.msk [vmem:[#allocation2 + $0xf1] sm:$0xff] %vm2577_vm5, %v7846_v40  ;;  %4797 = vst.msk [vmem:[#allocation2 + $0xf9] sm:$0xff] %vm2577_vm5, %v7841_v59 }
 0x551   : > { %4798 = vst.msk [vmem:[#allocation2 + $0x109] sm:$0xff] %vm2577_vm5, %v7856_v27  ;;  %4799 = vst.msk [vmem:[#allocation2 + $0x111] sm:$0xff] %vm2577_vm5, %v7851_v22 }
 0x552   : > { %4800 = vst.msk [vmem:[#allocation2 + $0x121] sm:$0xff] %vm2577_vm5, %v4731_v42  ;;  %4801 = vst.msk [vmem:[#allocation2 + $0x129] sm:$0xff] %vm2577_vm5, %v7861_v31 }
 0x553   : > { %4802 = vst.msk [vmem:[#allocation2 + $0x139] sm:$0xff] %vm2577_vm5, %v4733_v16  ;;  %4803 = vst.msk [vmem:[#allocation2 + $0x141] sm:$0xff] %vm2577_vm5, %v4734_v52 }
 0x554   : > { %4804 = vst.msk [vmem:[#allocation2 + $0x151] sm:$0xff] %vm2577_vm5, %v4735_v13  ;;  %4805 = vst.msk [vmem:[#allocation2 + $0x159] sm:$0xff] %vm2577_vm5, %v4736_v25 }
 0x555   : > { %4806 = vst.msk [vmem:[#allocation2 + $0x169] sm:$0xff] %vm2577_vm5, %v4737_v19  ;;  %4807 = vst.msk [vmem:[#allocation2 + $0x171] sm:$0xff] %vm2577_vm5, %v4738_v0 }
 0x556   : > { %4808 = vst.msk [vmem:[#allocation2 + $0x181] sm:$0xff] %vm2577_vm5, %v4739_v2  ;;  %4809 = vst.msk [vmem:[#allocation2 + $0x189] sm:$0xff] %vm2577_vm5, %v4740_v3 }
 0x557 PF: > { %s15_s1 = sadd.s32 1, %s5429_s1   ;;  %s8064_s18 = smov %s5421_s20 }
 0x558   : > { %p12_p9 = scmp.ge.s32.totalorder %s15_s1, 6   ;;  %s8065_s19 = smov %s5425_s21 }
 0x559   : > { %s8066_s20 = smov %s8069_s22  ;;  %s8067_s21 = smov %s8073_s23 }
 0x55a   :  { %14 = sbr.rel (!%p12_p9) target bundleno = 3 (0x3), region = 93 }

</bundles_post_ra>
